<compile_context>
chip_gen: v7x
topology: tpu7x:2x2x1
jax: 0.10.0
libtpu: 0.0.40
codegen_flags: <defaults>
</compile_context>

<pallas_src>
import functools
import math

import jax
import jax.numpy as jnp
from jax import lax
from jax.experimental import pallas as pl
from jax.experimental.pallas import tpu as pltpu


NEG_INF = -1e9
LN_EPS = 1e-6   # reference transformer uses LayerNorm(eps=1e-6)


# ----------------------------------------------------------------------------
# In-kernel helpers (operate on loaded values).
# ----------------------------------------------------------------------------
def _layernorm(y, gamma, beta, eps=LN_EPS):
    mu = jnp.mean(y, axis=-1, keepdims=True)
    var = jnp.mean(jnp.square(y - mu), axis=-1, keepdims=True)
    return (y - mu) * lax.rsqrt(var + eps) * gamma + beta


def _softmax_last(s):
    m = jnp.max(s, axis=-1, keepdims=True)
    e = jnp.exp(s - m)
    return e * pl.reciprocal(jnp.sum(e, axis=-1, keepdims=True), approx=True)


def _mha(xq2, xkv2, bias, wq_ref, wk_ref, wv_ref, wo_ref, gamma, beta,
         *, layer, branch, n_head, bt, lq, lk):
    """Multi-head attention + residual + post-LayerNorm on flat (bt*L, D) activations.

    Per-head weights come straight from stacked refs via static indexing; head
    outputs are accumulated through the per-head output projection, so there is no
    lane-axis slicing or concatenation on the critical path.
    """
    o = jnp.zeros_like(xq2)
    for h in range(n_head):
        # 1/sqrt(d_k) is already folded into wq at init time.
        q = jnp.dot(xq2, wq_ref[layer, branch, h], preferred_element_type=jnp.float32)
        k = jnp.dot(xkv2, wk_ref[layer, branch, h], preferred_element_type=jnp.float32)
        v = jnp.dot(xkv2, wv_ref[layer, branch, h], preferred_element_type=jnp.float32)
        q3 = q.reshape(bt, lq, q.shape[-1])
        k3 = k.reshape(bt, lk, k.shape[-1])
        v3 = v.reshape(bt, lk, v.shape[-1])
        s = jnp.einsum('bqk,bsk->bqs', q3, k3,
                       preferred_element_type=jnp.float32) + bias
        p = _softmax_last(s)
        head = jnp.einsum('bqs,bsv->bqv', p, v3, preferred_element_type=jnp.float32)
        o = o + jnp.dot(head.reshape(bt * lq, head.shape[-1]),
                        wo_ref[layer, branch, h], preferred_element_type=jnp.float32)
    return _layernorm(o + xq2, gamma, beta)


def _ffn(x2, w1, b1, w2, b2, gamma, beta):
    h = jnp.maximum(jnp.dot(x2, w1, preferred_element_type=jnp.float32) + b1, 0.0)
    y = jnp.dot(h, w2, preferred_element_type=jnp.float32) + b2
    return _layernorm(y + x2, gamma, beta)


# ----------------------------------------------------------------------------
# Fused decoder kernel: one grid step = one block of batch elements, full forward.
# ----------------------------------------------------------------------------
def decoder_kernel(pos_ref, x_ref, enc_ref, tbias_ref, sbias_ref,
                   frw_ref, frv_ref,
                   wq_ref, wk_ref, wv_ref, wo_ref,
                   fw1_ref, fw2_ref, fb1_ref, lvec_ref,
                   out_ref, *, n_layers, n_head):
    bt, lt, d = x_ref.shape
    ls = enc_ref.shape[1]

    # Row-wise work runs on flattened (bt*L, D) activations (bigger matmul M,
    # denser writebacks); L is a multiple of 8 so the reshapes are free.
    x2 = x_ref[...].reshape(bt * lt, d)
    pos2 = pos_ref[...].reshape(bt * lt, 2)
    enc2 = enc_ref[...].reshape(bt * ls, d)

    # ---- positional-encoding MLP + add + (identity dropout) + LayerNorm ----
    pe_w2 = frw_ref[0:d, :]                 # (D, D)
    pe_w1 = frw_ref[d:d + 2, :]             # (2, D)  Linear(2,D) weight, transposed
    pe_b1 = frv_ref[0:1, :]
    pe_b2 = frv_ref[1:2, :]
    ln_g = frv_ref[2:3, :]
    ln_b = frv_ref[3:4, :]
    # Linear(2,D) as two rank-1 broadcasts (avoids a K=2 matmul), ReLU, Linear(D,D).
    hmid = pos2[:, 0:1] * pe_w1[0:1, :] + pos2[:, 1:2] * pe_w1[1:2, :] + pe_b1
    hmid = jnp.maximum(hmid, 0.0)
    pe = jnp.dot(hmid, pe_w2, preferred_element_type=jnp.float32) + pe_b2
    dec = _layernorm(x2 + pe, ln_g, ln_b)                       # (bt*lt, D)

    tbias = tbias_ref[...]                                      # (bt, lt, lt)
    sbias = jnp.broadcast_to(sbias_ref[...], (bt, lt, ls))      # hoisted once

    # Static unroll is fine at small n_layers; for deep stacks switch to
    # lax.fori_loop (weights are already stacked along the leading layer axis).
    for l in range(n_layers):
        dec = _mha(dec, dec, tbias, wq_ref, wk_ref, wv_ref, wo_ref,
                   lvec_ref[l, 0:1, :], lvec_ref[l, 1:2, :],
                   layer=l, branch=0, n_head=n_head, bt=bt, lq=lt, lk=lt)
        dec = _mha(dec, enc2, sbias, wq_ref, wk_ref, wv_ref, wo_ref,
                   lvec_ref[l, 2:3, :], lvec_ref[l, 3:4, :],
                   layer=l, branch=1, n_head=n_head, bt=bt, lq=lt, lk=ls)
        dec = _ffn(dec, fw1_ref[l], fb1_ref[l], fw2_ref[l],
                   lvec_ref[l, 6:7, :], lvec_ref[l, 4:5, :], lvec_ref[l, 5:6, :])

    out_ref[...] = dec.reshape(bt, lt, d)


# ----------------------------------------------------------------------------
# Wrapper: Decoder.forward(trg_seq, trg_mask, enc_output, src_mask)
# ----------------------------------------------------------------------------
def _choose_batch_block(b):
    # Largest block that still leaves >= 2 grid steps: keeps both v7x TensorCores
    # busy while amortizing per-step overhead on single-TC v5e/v6e.
    best = 1
    for cand in range(1, b // 2 + 1):
        if b % cand == 0:
            best = cand
    return best if b >= 2 else max(b, 1)


def decoder_forward(params, trg_seq, trg_mask, enc_output, src_mask, *, cfg):
    b, lt, _ = trg_seq.shape
    ls = enc_output.shape[1]
    d = cfg["d_model"]

    pos = trg_seq[:, :, 0:2]
    x = trg_seq[:, :, 2:]
    # Additive mask biases (0 keep / -1e9 masked), matching masked_fill(-1e9).
    tbias = jnp.where(jnp.broadcast_to(trg_mask, (b, lt, lt)), 0.0, NEG_INF
                      ).astype(jnp.float32)
    sbias = jnp.where(src_mask, 0.0, NEG_INF).astype(jnp.float32).reshape(b, 1, ls)

    bt = _choose_batch_block(b)
    grid = (b // bt,)

    p = params
    weights = (p["front_w"], p["front_v"],
               p["a_wq"], p["a_wk"], p["a_wv"], p["a_wo"],
               p["f_w1"], p["f_w2"], p["f_b1"], p["lvec"])

    def batched(shape):
        blk = (bt,) + tuple(shape[1:])
        n = len(shape) - 1
        return pl.BlockSpec(blk, lambda i, _n=n: (i,) + (0,) * _n)

    def shared(shape):
        z = (0,) * len(shape)
        return pl.BlockSpec(tuple(shape), lambda i, _z=z: _z)

    in_specs = ([batched(pos.shape), batched(x.shape), batched(enc_output.shape),
                 batched(tbias.shape), batched(sbias.shape)]
                + [shared(w.shape) for w in weights])

    kernel = functools.partial(decoder_kernel,
                               n_layers=cfg["n_layers"], n_head=cfg["n_head"])

    # TODO(synk): return_attns=True path (emitting per-layer attention maps) is not
    # implemented; default Decoder.forward semantics (return_attns=False) only.
    # NOTE: for large (d_model, d_inner, n_layers) configs, stream weights per layer
    # (layer axis in the grid / single-buffered specs) on v7x (64 MiB VMEM/TC) and
    # raise vmem_limit_bytes only on v5e/v6e (128 MiB VMEM).
    out = pl.pallas_call(
        kernel,
        out_shape=jax.ShapeDtypeStruct((b, lt, d), jnp.float32),
        grid=grid,
        in_specs=in_specs,
        out_specs=pl.BlockSpec((bt, lt, d), lambda i: (i, 0, 0)),
        compiler_params=pltpu.CompilerParams(
            dimension_semantics=("parallel",),
            vmem_limit_bytes=32 * 1024 * 1024),
    )(pos, x, enc_output, tbias, sbias, *weights)
    return out


# ----------------------------------------------------------------------------
# Parameter init (deterministic; xavier_uniform on 2-D weights, PyTorch layout,
# then restacked per head / packed into dense slabs; 1/sqrt(d_k) folded into wq).
# ----------------------------------------------------------------------------
def init_params(key, cfg):
    d, di = cfg["d_model"], cfg["d_inner"]
    h, dk, dv, nl = cfg["n_head"], cfg["d_k"], cfg["d_v"], cfg["n_layers"]
    keys = iter(jax.random.split(key, 512))

    def xavier(shape):                      # PyTorch layout (out_features, in_features)
        fan_out, fan_in = shape
        bound = math.sqrt(6.0 / (fan_in + fan_out))
        return jax.random.uniform(next(keys), shape, jnp.float32, -bound, bound)

    inv_temp = 1.0 / math.sqrt(dk)

    def qkv_heads(out_per_head, scale=1.0):
        # Linear(d, h*out) weight (h*out, d) -> per-head (h, d, out) (pre-transposed).
        w = xavier((h * out_per_head, d)) * scale
        return w.reshape(h, out_per_head, d).transpose(0, 2, 1)

    def o_heads():
        # Linear(h*dv, d) weight (d, h*dv) -> per-head (h, dv, d) (pre-transposed).
        w = xavier((d, h * dv))
        return w.T.reshape(h, dv, d)

    def branch_stack(fn):                   # (nl, 2(self/cross), h, ., .)
        return jnp.stack([jnp.stack([fn() for _ in range(2)]) for _ in range(nl)])

    a_wq = branch_stack(lambda: qkv_heads(dk, inv_temp))   # scale folded into wq
    a_wk = branch_stack(lambda: qkv_heads(dk))
    a_wv = branch_stack(lambda: qkv_heads(dv))
    a_wo = branch_stack(o_heads)

    f_w1 = jnp.stack([xavier((di, d)).T for _ in range(nl)])    # (nl, d, di)
    f_w2 = jnp.stack([xavier((d, di)).T for _ in range(nl)])    # (nl, di, d)
    f_b1 = jnp.zeros((nl, 1, di), jnp.float32)

    # Per-layer D-wide vectors packed into one slab:
    # rows = [s_gamma, s_beta, c_gamma, c_beta, f_gamma, f_beta, f_b2, pad]
    ones_row = jnp.ones((nl, 1, d), jnp.float32)
    zeros_row = jnp.zeros((nl, 1, d), jnp.float32)
    lvec = jnp.concatenate([ones_row, zeros_row, ones_row, zeros_row,
                            ones_row, zeros_row, zeros_row, zeros_row], axis=1)

    # Front-path slabs: weights (pe_w2t on top so both pieces start sublane-aligned)
    pe_w1t = xavier((d, 2)).T               # (2, d)
    pe_w2t = xavier((d, d)).T               # (d, d)
    front_w = jnp.concatenate([pe_w2t, pe_w1t], axis=0)             # (d+2, d)
    # vectors: [pe_b1, pe_b2, ln_gamma, ln_beta]
    front_v = jnp.concatenate([jnp.zeros((2, d), jnp.float32),
                               jnp.ones((1, d), jnp.float32),
                               jnp.zeros((1, d), jnp.float32)], axis=0)  # (4, d)

    return {"front_w": front_w, "front_v": front_v,
            "a_wq": a_wq, "a_wk": a_wk, "a_wv": a_wv, "a_wo": a_wo,
            "f_w1": f_w1, "f_w2": f_w2, "f_b1": f_b1, "lvec": lvec}


# ----------------------------------------------------------------------------
if __name__ == "__main__":
    cfg = dict(d_model=32, d_inner=64, n_layers=2, n_head=2, d_k=16, d_v=16)
    trg_pad_idx = 0.0

    key = jax.random.PRNGKey(0)
    k_params, k_trg, k_enc = jax.random.split(key, 3)
    params = init_params(k_params, cfg)

    B, Lt, Ls = 2, 8, 8
    # trg_seq: first 2 channels = (x, y) positions, remaining d_model = features.
    trg_seq = jax.random.normal(k_trg, (B, Lt, cfg["d_model"] + 2), jnp.float32)
    trg_seq = trg_seq.at[:, -1, 0].set(trg_pad_idx)     # mark last trg position as pad
    enc_output = jax.random.normal(k_enc, (B, Ls, cfg["d_model"]), jnp.float32)

    # Masks as the parent Transformer would build them.
    trg_pad = (trg_seq[:, :, 0] != trg_pad_idx)[:, None, :]              # (B, 1, Lt)
    subsequent = jnp.tril(jnp.ones((1, Lt, Lt), dtype=bool))             # (1, Lt, Lt)
    trg_mask = trg_pad & subsequent                                      # (B, Lt, Lt)
    src_mask = jnp.ones((B, 1, Ls), dtype=bool).at[:, :, -1].set(False)  # (B, 1, Ls)

    fwd = jax.jit(functools.partial(decoder_forward, cfg=cfg))
    dec_out = fwd(params, trg_seq, trg_mask, enc_output, src_mask)
    jax.block_until_ready(dec_out)

    assert dec_out.shape == (B, Lt, cfg["d_model"])
    assert bool(jnp.all(jnp.isfinite(dec_out)))
    print("KERNEL_OK")
</pallas_src>

<mosaic_0001>
module attributes {stable_mosaic.version = 11 : i64} {
  func.func @decoder_kernel(%arg0: i32, %arg1: memref<1x8x2xf32, #tpu.memory_space<vmem>>, %arg2: memref<1x8x32xf32, #tpu.memory_space<vmem>>, %arg3: memref<1x8x32xf32, #tpu.memory_space<vmem>>, %arg4: memref<1x8x8xf32, #tpu.memory_space<vmem>>, %arg5: memref<1x1x8xf32, #tpu.memory_space<vmem>>, %arg6: memref<34x32xf32, #tpu.memory_space<vmem>>, %arg7: memref<4x32xf32, #tpu.memory_space<vmem>>, %arg8: memref<2x2x2x32x16xf32, #tpu.memory_space<vmem>>, %arg9: memref<2x2x2x32x16xf32, #tpu.memory_space<vmem>>, %arg10: memref<2x2x2x32x16xf32, #tpu.memory_space<vmem>>, %arg11: memref<2x2x2x16x32xf32, #tpu.memory_space<vmem>>, %arg12: memref<2x32x64xf32, #tpu.memory_space<vmem>>, %arg13: memref<2x64x32xf32, #tpu.memory_space<vmem>>, %arg14: memref<2x1x64xf32, #tpu.memory_space<vmem>>, %arg15: memref<2x8x32xf32, #tpu.memory_space<vmem>>, %arg16: memref<1x8x32xf32, #tpu.memory_space<vmem>>) attributes {dimension_semantics = [#tpu.dimension_semantics<parallel>], iteration_bounds = array<i64: 2>, scalar_prefetch = 0 : i64, scratch_operands = 0 : i64, tpu.core_type = #tpu.core_type<tc>, window_params = [{transform_indices = @transform_0, window_bounds = array<i64: 1, 8, 2>}, {transform_indices = @transform_1, window_bounds = array<i64: 1, 8, 32>}, {transform_indices = @transform_2, window_bounds = array<i64: 1, 8, 32>}, {transform_indices = @transform_3, window_bounds = array<i64: 1, 8, 8>}, {transform_indices = @transform_4, window_bounds = array<i64: 1, 1, 8>}, {pipeline_mode = #tpu.pipeline_mode<synchronous>, transform_indices = @transform_5, window_bounds = array<i64: 34, 32>}, {pipeline_mode = #tpu.pipeline_mode<synchronous>, transform_indices = @transform_6, window_bounds = array<i64: 4, 32>}, {pipeline_mode = #tpu.pipeline_mode<synchronous>, transform_indices = @transform_7, window_bounds = array<i64: 2, 2, 2, 32, 16>}, {pipeline_mode = #tpu.pipeline_mode<synchronous>, transform_indices = @transform_8, window_bounds = array<i64: 2, 2, 2, 32, 16>}, {pipeline_mode = #tpu.pipeline_mode<synchronous>, transform_indices = @transform_9, window_bounds = array<i64: 2, 2, 2, 32, 16>}, {pipeline_mode = #tpu.pipeline_mode<synchronous>, transform_indices = @transform_10, window_bounds = array<i64: 2, 2, 2, 16, 32>}, {pipeline_mode = #tpu.pipeline_mode<synchronous>, transform_indices = @transform_11, window_bounds = array<i64: 2, 32, 64>}, {pipeline_mode = #tpu.pipeline_mode<synchronous>, transform_indices = @transform_12, window_bounds = array<i64: 2, 64, 32>}, {pipeline_mode = #tpu.pipeline_mode<synchronous>, transform_indices = @transform_13, window_bounds = array<i64: 2, 1, 64>}, {pipeline_mode = #tpu.pipeline_mode<synchronous>, transform_indices = @transform_14, window_bounds = array<i64: 2, 8, 32>}, {transform_indices = @transform_15, window_bounds = array<i64: 1, 8, 32>}]} {
    %c0 = arith.constant 0 : index
    %c0_0 = arith.constant 0 : index
    %c0_1 = arith.constant 0 : index
    %0 = vector.load %arg2[%c0, %c0_0, %c0_1] : memref<1x8x32xf32, #tpu.memory_space<vmem>>, vector<1x8x32xf32>
    %1 = vector.shape_cast %0 : vector<1x8x32xf32> to vector<8x32xf32>
    %c0_2 = arith.constant 0 : index
    %c0_3 = arith.constant 0 : index
    %c0_4 = arith.constant 0 : index
    %2 = vector.load %arg1[%c0_2, %c0_3, %c0_4] : memref<1x8x2xf32, #tpu.memory_space<vmem>>, vector<1x8x2xf32>
    %3 = vector.shape_cast %2 : vector<1x8x2xf32> to vector<8x2xf32>
    %c0_5 = arith.constant 0 : index
    %c0_6 = arith.constant 0 : index
    %c0_7 = arith.constant 0 : index
    %4 = vector.load %arg3[%c0_5, %c0_6, %c0_7] : memref<1x8x32xf32, #tpu.memory_space<vmem>>, vector<1x8x32xf32>
    %5 = vector.shape_cast %4 : vector<1x8x32xf32> to vector<8x32xf32>
    %c0_8 = arith.constant 0 : index
    %c0_9 = arith.constant 0 : index
    %6 = vector.load %arg6[%c0_8, %c0_9] : memref<34x32xf32, #tpu.memory_space<vmem>>, vector<32x32xf32>
    %c32 = arith.constant 32 : index
    %c0_10 = arith.constant 0 : index
    %7 = vector.load %arg6[%c32, %c0_10] : memref<34x32xf32, #tpu.memory_space<vmem>>, vector<2x32xf32>
    %c0_11 = arith.constant 0 : index
    %c0_12 = arith.constant 0 : index
    %8 = vector.load %arg7[%c0_11, %c0_12] : memref<4x32xf32, #tpu.memory_space<vmem>>, vector<1x32xf32>
    %c1 = arith.constant 1 : index
    %c0_13 = arith.constant 0 : index
    %9 = vector.load %arg7[%c1, %c0_13] : memref<4x32xf32, #tpu.memory_space<vmem>>, vector<1x32xf32>
    %c2 = arith.constant 2 : index
    %c0_14 = arith.constant 0 : index
    %10 = vector.load %arg7[%c2, %c0_14] : memref<4x32xf32, #tpu.memory_space<vmem>>, vector<1x32xf32>
    %c3 = arith.constant 3 : index
    %c0_15 = arith.constant 0 : index
    %11 = vector.load %arg7[%c3, %c0_15] : memref<4x32xf32, #tpu.memory_space<vmem>>, vector<1x32xf32>
    %12 = vector.extract_strided_slice %3 {offsets = [0, 0], sizes = [8, 1], strides = [1, 1]} : vector<8x2xf32> to vector<8x1xf32>
    %13 = vector.extract_strided_slice %7 {offsets = [0, 0], sizes = [1, 32], strides = [1, 1]} : vector<2x32xf32> to vector<1x32xf32>
    %14 = vector.broadcast %12 : vector<8x1xf32> to vector<8x32xf32>
    %15 = vector.broadcast %13 : vector<1x32xf32> to vector<8x32xf32>
    %16 = arith.mulf %14, %15 : vector<8x32xf32>
    %17 = vector.extract_strided_slice %3 {offsets = [0, 1], sizes = [8, 1], strides = [1, 1]} : vector<8x2xf32> to vector<8x1xf32>
    %18 = vector.extract_strided_slice %7 {offsets = [1, 0], sizes = [1, 32], strides = [1, 1]} : vector<2x32xf32> to vector<1x32xf32>
    %19 = vector.broadcast %17 : vector<8x1xf32> to vector<8x32xf32>
    %20 = vector.broadcast %18 : vector<1x32xf32> to vector<8x32xf32>
    %21 = arith.mulf %19, %20 : vector<8x32xf32>
    %22 = arith.addf %16, %21 : vector<8x32xf32>
    %23 = vector.broadcast %8 : vector<1x32xf32> to vector<8x32xf32>
    %24 = arith.addf %22, %23 : vector<8x32xf32>
    %cst = arith.constant 0.000000e+00 : f32
    %25 = vector.broadcast %cst : f32 to vector<8x32xf32>
    %26 = arith.maximumf %24, %25 : vector<8x32xf32>
    %cst_16 = arith.constant dense<0.000000e+00> : vector<8x32xf32>
    %27 = tpu.matmul %26, %6, %cst_16 {dimension_numbers = #tpu.dot_dimension_numbers<[1], [0], [0], [1], [0, 0, 1, 1], [], []>} : vector<8x32xf32>, vector<32x32xf32>, vector<8x32xf32> -> vector<8x32xf32>
    %28 = vector.broadcast %9 : vector<1x32xf32> to vector<8x32xf32>
    %29 = arith.addf %27, %28 : vector<8x32xf32>
    %30 = arith.addf %1, %29 : vector<8x32xf32>
    %cst_17 = arith.constant dense<0.000000e+00> : vector<8xf32>
    %31 = vector.multi_reduction <add>, %30, %cst_17 [1] : vector<8x32xf32> to vector<8xf32>
    %32 = vector.shape_cast %31 : vector<8xf32> to vector<8x1xf32>
    %cst_18 = arith.constant 3.200000e+01 : f32
    %33 = vector.broadcast %cst_18 : f32 to vector<8x1xf32>
    %34 = arith.divf %32, %33 : vector<8x1xf32>
    %35 = vector.broadcast %34 : vector<8x1xf32> to vector<8x32xf32>
    %36 = arith.subf %30, %35 : vector<8x32xf32>
    %37 = arith.mulf %36, %36 : vector<8x32xf32>
    %cst_19 = arith.constant dense<0.000000e+00> : vector<8xf32>
    %38 = vector.multi_reduction <add>, %37, %cst_19 [1] : vector<8x32xf32> to vector<8xf32>
    %39 = vector.shape_cast %38 : vector<8xf32> to vector<8x1xf32>
    %cst_20 = arith.constant 3.200000e+01 : f32
    %40 = vector.broadcast %cst_20 : f32 to vector<8x1xf32>
    %41 = arith.divf %39, %40 : vector<8x1xf32>
    %42 = vector.broadcast %34 : vector<8x1xf32> to vector<8x32xf32>
    %43 = arith.subf %30, %42 : vector<8x32xf32>
    %cst_21 = arith.constant 9.99999997E-7 : f32
    %44 = vector.broadcast %cst_21 : f32 to vector<8x1xf32>
    %45 = arith.addf %41, %44 : vector<8x1xf32>
    %46 = math.rsqrt %45 : vector<8x1xf32>
    %47 = vector.broadcast %46 : vector<8x1xf32> to vector<8x32xf32>
    %48 = arith.mulf %43, %47 : vector<8x32xf32>
    %49 = vector.broadcast %10 : vector<1x32xf32> to vector<8x32xf32>
    %50 = arith.mulf %48, %49 : vector<8x32xf32>
    %51 = vector.broadcast %11 : vector<1x32xf32> to vector<8x32xf32>
    %52 = arith.addf %50, %51 : vector<8x32xf32>
    %c0_22 = arith.constant 0 : index
    %c0_23 = arith.constant 0 : index
    %c0_24 = arith.constant 0 : index
    %53 = vector.load %arg4[%c0_22, %c0_23, %c0_24] : memref<1x8x8xf32, #tpu.memory_space<vmem>>, vector<1x8x8xf32>
    %c0_25 = arith.constant 0 : index
    %c0_26 = arith.constant 0 : index
    %c0_27 = arith.constant 0 : index
    %54 = vector.load %arg5[%c0_25, %c0_26, %c0_27] : memref<1x1x8xf32, #tpu.memory_space<vmem>>, vector<1x1x8xf32>
    %55 = vector.shape_cast %54 : vector<1x1x8xf32> to vector<1x1x8xf32>
    %56 = vector.broadcast %55 : vector<1x1x8xf32> to vector<1x8x8xf32>
    %c0_28 = arith.constant 0 : index
    %c0_29 = arith.constant 0 : index
    %c0_30 = arith.constant 0 : index
    %57 = vector.load %arg15[%c0_28, %c0_29, %c0_30] : memref<2x8x32xf32, #tpu.memory_space<vmem>>, vector<1x1x32xf32>
    %58 = vector.shape_cast %57 : vector<1x1x32xf32> to vector<1x32xf32>
    %c0_31 = arith.constant 0 : index
    %c1_32 = arith.constant 1 : index
    %c0_33 = arith.constant 0 : index
    %59 = vector.load %arg15[%c0_31, %c1_32, %c0_33] : memref<2x8x32xf32, #tpu.memory_space<vmem>>, vector<1x1x32xf32>
    %60 = vector.shape_cast %59 : vector<1x1x32xf32> to vector<1x32xf32>
    %cst_34 = arith.constant 0.000000e+00 : f32
    %61 = vector.broadcast %cst_34 : f32 to vector<8x32xf32>
    %c0_35 = arith.constant 0 : index
    %c0_36 = arith.constant 0 : index
    %c0_37 = arith.constant 0 : index
    %c0_38 = arith.constant 0 : index
    %c0_39 = arith.constant 0 : index
    %62 = vector.load %arg8[%c0_35, %c0_36, %c0_37, %c0_38, %c0_39] : memref<2x2x2x32x16xf32, #tpu.memory_space<vmem>>, vector<1x1x1x32x16xf32>
    %63 = vector.shape_cast %62 : vector<1x1x1x32x16xf32> to vector<32x16xf32>
    %cst_40 = arith.constant dense<0.000000e+00> : vector<8x16xf32>
    %64 = tpu.matmul %52, %63, %cst_40 {dimension_numbers = #tpu.dot_dimension_numbers<[1], [0], [0], [1], [0, 0, 1, 1], [], []>} : vector<8x32xf32>, vector<32x16xf32>, vector<8x16xf32> -> vector<8x16xf32>
    %c0_41 = arith.constant 0 : index
    %c0_42 = arith.constant 0 : index
    %c0_43 = arith.constant 0 : index
    %c0_44 = arith.constant 0 : index
    %c0_45 = arith.constant 0 : index
    %65 = vector.load %arg9[%c0_41, %c0_42, %c0_43, %c0_44, %c0_45] : memref<2x2x2x32x16xf32, #tpu.memory_space<vmem>>, vector<1x1x1x32x16xf32>
    %66 = vector.shape_cast %65 : vector<1x1x1x32x16xf32> to vector<32x16xf32>
    %cst_46 = arith.constant dense<0.000000e+00> : vector<8x16xf32>
    %67 = tpu.matmul %52, %66, %cst_46 {dimension_numbers = #tpu.dot_dimension_numbers<[1], [0], [0], [1], [0, 0, 1, 1], [], []>} : vector<8x32xf32>, vector<32x16xf32>, vector<8x16xf32> -> vector<8x16xf32>
    %c0_47 = arith.constant 0 : index
    %c0_48 = arith.constant 0 : index
    %c0_49 = arith.constant 0 : index
    %c0_50 = arith.constant 0 : index
    %c0_51 = arith.constant 0 : index
    %68 = vector.load %arg10[%c0_47, %c0_48, %c0_49, %c0_50, %c0_51] : memref<2x2x2x32x16xf32, #tpu.memory_space<vmem>>, vector<1x1x1x32x16xf32>
    %69 = vector.shape_cast %68 : vector<1x1x1x32x16xf32> to vector<32x16xf32>
    %cst_52 = arith.constant dense<0.000000e+00> : vector<8x16xf32>
    %70 = tpu.matmul %52, %69, %cst_52 {dimension_numbers = #tpu.dot_dimension_numbers<[1], [0], [0], [1], [0, 0, 1, 1], [], []>} : vector<8x32xf32>, vector<32x16xf32>, vector<8x16xf32> -> vector<8x16xf32>
    %71 = vector.shape_cast %64 : vector<8x16xf32> to vector<1x8x16xf32>
    %72 = vector.shape_cast %67 : vector<8x16xf32> to vector<1x8x16xf32>
    %73 = vector.shape_cast %70 : vector<8x16xf32> to vector<1x8x16xf32>
    "tpu.trace_start"() <{level = 10 : i32, message = "bqk,bsk->bqs"}> : () -> ()
    %cst_53 = arith.constant dense<0.000000e+00> : vector<1x8x8xf32>
    %74 = tpu.matmul %71, %72, %cst_53 {dimension_numbers = #tpu.dot_dimension_numbers<[2], [2], [1], [1], [0, 0, 0, 1, 1, 1], [0], [0]>} : vector<1x8x16xf32>, vector<1x8x16xf32>, vector<1x8x8xf32> -> vector<1x8x8xf32>
    "tpu.trace_stop"() : () -> ()
    %75 = arith.addf %74, %53 : vector<1x8x8xf32>
    %cst_54 = arith.constant dense<0xFF800000> : vector<1x8xf32>
    %76 = vector.multi_reduction <maximumf>, %75, %cst_54 [2] : vector<1x8x8xf32> to vector<1x8xf32>
    %77 = vector.shape_cast %76 : vector<1x8xf32> to vector<1x8x1xf32>
    %78 = vector.broadcast %77 : vector<1x8x1xf32> to vector<1x8x8xf32>
    %79 = arith.subf %75, %78 : vector<1x8x8xf32>
    %80 = math.exp %79 : vector<1x8x8xf32>
    %cst_55 = arith.constant dense<0.000000e+00> : vector<1x8xf32>
    %81 = vector.multi_reduction <add>, %80, %cst_55 [2] : vector<1x8x8xf32> to vector<1x8xf32>
    %82 = vector.shape_cast %81 : vector<1x8xf32> to vector<1x8x1xf32>
    %83 = tpu.reciprocal %82 {approx = true} : vector<1x8x1xf32> -> vector<1x8x1xf32>
    %84 = vector.broadcast %83 : vector<1x8x1xf32> to vector<1x8x8xf32>
    %85 = arith.mulf %80, %84 : vector<1x8x8xf32>
    "tpu.trace_start"() <{level = 10 : i32, message = "bqs,bsv->bqv"}> : () -> ()
    %cst_56 = arith.constant dense<0.000000e+00> : vector<1x8x16xf32>
    %86 = tpu.matmul %85, %73, %cst_56 {dimension_numbers = #tpu.dot_dimension_numbers<[2], [1], [1], [2], [0, 0, 0, 1, 1, 2], [0], [0]>} : vector<1x8x8xf32>, vector<1x8x16xf32>, vector<1x8x16xf32> -> vector<1x8x16xf32>
    "tpu.trace_stop"() : () -> ()
    %87 = vector.shape_cast %86 : vector<1x8x16xf32> to vector<8x16xf32>
    %c0_57 = arith.constant 0 : index
    %c0_58 = arith.constant 0 : index
    %c0_59 = arith.constant 0 : index
    %c0_60 = arith.constant 0 : index
    %c0_61 = arith.constant 0 : index
    %88 = vector.load %arg11[%c0_57, %c0_58, %c0_59, %c0_60, %c0_61] : memref<2x2x2x16x32xf32, #tpu.memory_space<vmem>>, vector<1x1x1x16x32xf32>
    %89 = vector.shape_cast %88 : vector<1x1x1x16x32xf32> to vector<16x32xf32>
    %cst_62 = arith.constant dense<0.000000e+00> : vector<8x32xf32>
    %90 = tpu.matmul %87, %89, %cst_62 {dimension_numbers = #tpu.dot_dimension_numbers<[1], [0], [0], [1], [0, 0, 1, 1], [], []>} : vector<8x16xf32>, vector<16x32xf32>, vector<8x32xf32> -> vector<8x32xf32>
    %91 = arith.addf %61, %90 : vector<8x32xf32>
    %c0_63 = arith.constant 0 : index
    %c0_64 = arith.constant 0 : index
    %c1_65 = arith.constant 1 : index
    %c0_66 = arith.constant 0 : index
    %c0_67 = arith.constant 0 : index
    %92 = vector.load %arg8[%c0_63, %c0_64, %c1_65, %c0_66, %c0_67] : memref<2x2x2x32x16xf32, #tpu.memory_space<vmem>>, vector<1x1x1x32x16xf32>
    %93 = vector.shape_cast %92 : vector<1x1x1x32x16xf32> to vector<32x16xf32>
    %cst_68 = arith.constant dense<0.000000e+00> : vector<8x16xf32>
    %94 = tpu.matmul %52, %93, %cst_68 {dimension_numbers = #tpu.dot_dimension_numbers<[1], [0], [0], [1], [0, 0, 1, 1], [], []>} : vector<8x32xf32>, vector<32x16xf32>, vector<8x16xf32> -> vector<8x16xf32>
    %c0_69 = arith.constant 0 : index
    %c0_70 = arith.constant 0 : index
    %c1_71 = arith.constant 1 : index
    %c0_72 = arith.constant 0 : index
    %c0_73 = arith.constant 0 : index
    %95 = vector.load %arg9[%c0_69, %c0_70, %c1_71, %c0_72, %c0_73] : memref<2x2x2x32x16xf32, #tpu.memory_space<vmem>>, vector<1x1x1x32x16xf32>
    %96 = vector.shape_cast %95 : vector<1x1x1x32x16xf32> to vector<32x16xf32>
    %cst_74 = arith.constant dense<0.000000e+00> : vector<8x16xf32>
    %97 = tpu.matmul %52, %96, %cst_74 {dimension_numbers = #tpu.dot_dimension_numbers<[1], [0], [0], [1], [0, 0, 1, 1], [], []>} : vector<8x32xf32>, vector<32x16xf32>, vector<8x16xf32> -> vector<8x16xf32>
    %c0_75 = arith.constant 0 : index
    %c0_76 = arith.constant 0 : index
    %c1_77 = arith.constant 1 : index
    %c0_78 = arith.constant 0 : index
    %c0_79 = arith.constant 0 : index
    %98 = vector.load %arg10[%c0_75, %c0_76, %c1_77, %c0_78, %c0_79] : memref<2x2x2x32x16xf32, #tpu.memory_space<vmem>>, vector<1x1x1x32x16xf32>
    %99 = vector.shape_cast %98 : vector<1x1x1x32x16xf32> to vector<32x16xf32>
    %cst_80 = arith.constant dense<0.000000e+00> : vector<8x16xf32>
    %100 = tpu.matmul %52, %99, %cst_80 {dimension_numbers = #tpu.dot_dimension_numbers<[1], [0], [0], [1], [0, 0, 1, 1], [], []>} : vector<8x32xf32>, vector<32x16xf32>, vector<8x16xf32> -> vector<8x16xf32>
    %101 = vector.shape_cast %94 : vector<8x16xf32> to vector<1x8x16xf32>
    %102 = vector.shape_cast %97 : vector<8x16xf32> to vector<1x8x16xf32>
    %103 = vector.shape_cast %100 : vector<8x16xf32> to vector<1x8x16xf32>
    "tpu.trace_start"() <{level = 10 : i32, message = "bqk,bsk->bqs"}> : () -> ()
    %cst_81 = arith.constant dense<0.000000e+00> : vector<1x8x8xf32>
    %104 = tpu.matmul %101, %102, %cst_81 {dimension_numbers = #tpu.dot_dimension_numbers<[2], [2], [1], [1], [0, 0, 0, 1, 1, 1], [0], [0]>} : vector<1x8x16xf32>, vector<1x8x16xf32>, vector<1x8x8xf32> -> vector<1x8x8xf32>
    "tpu.trace_stop"() : () -> ()
    %105 = arith.addf %104, %53 : vector<1x8x8xf32>
    %cst_82 = arith.constant dense<0xFF800000> : vector<1x8xf32>
    %106 = vector.multi_reduction <maximumf>, %105, %cst_82 [2] : vector<1x8x8xf32> to vector<1x8xf32>
    %107 = vector.shape_cast %106 : vector<1x8xf32> to vector<1x8x1xf32>
    %108 = vector.broadcast %107 : vector<1x8x1xf32> to vector<1x8x8xf32>
    %109 = arith.subf %105, %108 : vector<1x8x8xf32>
    %110 = math.exp %109 : vector<1x8x8xf32>
    %cst_83 = arith.constant dense<0.000000e+00> : vector<1x8xf32>
    %111 = vector.multi_reduction <add>, %110, %cst_83 [2] : vector<1x8x8xf32> to vector<1x8xf32>
    %112 = vector.shape_cast %111 : vector<1x8xf32> to vector<1x8x1xf32>
    %113 = tpu.reciprocal %112 {approx = true} : vector<1x8x1xf32> -> vector<1x8x1xf32>
    %114 = vector.broadcast %113 : vector<1x8x1xf32> to vector<1x8x8xf32>
    %115 = arith.mulf %110, %114 : vector<1x8x8xf32>
    "tpu.trace_start"() <{level = 10 : i32, message = "bqs,bsv->bqv"}> : () -> ()
    %cst_84 = arith.constant dense<0.000000e+00> : vector<1x8x16xf32>
    %116 = tpu.matmul %115, %103, %cst_84 {dimension_numbers = #tpu.dot_dimension_numbers<[2], [1], [1], [2], [0, 0, 0, 1, 1, 2], [0], [0]>} : vector<1x8x8xf32>, vector<1x8x16xf32>, vector<1x8x16xf32> -> vector<1x8x16xf32>
    "tpu.trace_stop"() : () -> ()
    %117 = vector.shape_cast %116 : vector<1x8x16xf32> to vector<8x16xf32>
    %c0_85 = arith.constant 0 : index
    %c0_86 = arith.constant 0 : index
    %c1_87 = arith.constant 1 : index
    %c0_88 = arith.constant 0 : index
    %c0_89 = arith.constant 0 : index
    %118 = vector.load %arg11[%c0_85, %c0_86, %c1_87, %c0_88, %c0_89] : memref<2x2x2x16x32xf32, #tpu.memory_space<vmem>>, vector<1x1x1x16x32xf32>
    %119 = vector.shape_cast %118 : vector<1x1x1x16x32xf32> to vector<16x32xf32>
    %cst_90 = arith.constant dense<0.000000e+00> : vector<8x32xf32>
    %120 = tpu.matmul %117, %119, %cst_90 {dimension_numbers = #tpu.dot_dimension_numbers<[1], [0], [0], [1], [0, 0, 1, 1], [], []>} : vector<8x16xf32>, vector<16x32xf32>, vector<8x32xf32> -> vector<8x32xf32>
    %121 = arith.addf %91, %120 : vector<8x32xf32>
    %122 = arith.addf %121, %52 : vector<8x32xf32>
    %cst_91 = arith.constant dense<0.000000e+00> : vector<8xf32>
    %123 = vector.multi_reduction <add>, %122, %cst_91 [1] : vector<8x32xf32> to vector<8xf32>
    %124 = vector.shape_cast %123 : vector<8xf32> to vector<8x1xf32>
    %cst_92 = arith.constant 3.200000e+01 : f32
    %125 = vector.broadcast %cst_92 : f32 to vector<8x1xf32>
    %126 = arith.divf %124, %125 : vector<8x1xf32>
    %127 = vector.broadcast %126 : vector<8x1xf32> to vector<8x32xf32>
    %128 = arith.subf %122, %127 : vector<8x32xf32>
    %129 = arith.mulf %128, %128 : vector<8x32xf32>
    %cst_93 = arith.constant dense<0.000000e+00> : vector<8xf32>
    %130 = vector.multi_reduction <add>, %129, %cst_93 [1] : vector<8x32xf32> to vector<8xf32>
    %131 = vector.shape_cast %130 : vector<8xf32> to vector<8x1xf32>
    %cst_94 = arith.constant 3.200000e+01 : f32
    %132 = vector.broadcast %cst_94 : f32 to vector<8x1xf32>
    %133 = arith.divf %131, %132 : vector<8x1xf32>
    %134 = vector.broadcast %126 : vector<8x1xf32> to vector<8x32xf32>
    %135 = arith.subf %122, %134 : vector<8x32xf32>
    %cst_95 = arith.constant 9.99999997E-7 : f32
    %136 = vector.broadcast %cst_95 : f32 to vector<8x1xf32>
    %137 = arith.addf %133, %136 : vector<8x1xf32>
    %138 = math.rsqrt %137 : vector<8x1xf32>
    %139 = vector.broadcast %138 : vector<8x1xf32> to vector<8x32xf32>
    %140 = arith.mulf %135, %139 : vector<8x32xf32>
    %141 = vector.broadcast %58 : vector<1x32xf32> to vector<8x32xf32>
    %142 = arith.mulf %140, %141 : vector<8x32xf32>
    %143 = vector.broadcast %60 : vector<1x32xf32> to vector<8x32xf32>
    %144 = arith.addf %142, %143 : vector<8x32xf32>
    %c0_96 = arith.constant 0 : index
    %c2_97 = arith.constant 2 : index
    %c0_98 = arith.constant 0 : index
    %145 = vector.load %arg15[%c0_96, %c2_97, %c0_98] : memref<2x8x32xf32, #tpu.memory_space<vmem>>, vector<1x1x32xf32>
    %146 = vector.shape_cast %145 : vector<1x1x32xf32> to vector<1x32xf32>
    %c0_99 = arith.constant 0 : index
    %c3_100 = arith.constant 3 : index
    %c0_101 = arith.constant 0 : index
    %147 = vector.load %arg15[%c0_99, %c3_100, %c0_101] : memref<2x8x32xf32, #tpu.memory_space<vmem>>, vector<1x1x32xf32>
    %148 = vector.shape_cast %147 : vector<1x1x32xf32> to vector<1x32xf32>
    %cst_102 = arith.constant 0.000000e+00 : f32
    %149 = vector.broadcast %cst_102 : f32 to vector<8x32xf32>
    %c0_103 = arith.constant 0 : index
    %c1_104 = arith.constant 1 : index
    %c0_105 = arith.constant 0 : index
    %c0_106 = arith.constant 0 : index
    %c0_107 = arith.constant 0 : index
    %150 = vector.load %arg8[%c0_103, %c1_104, %c0_105, %c0_106, %c0_107] : memref<2x2x2x32x16xf32, #tpu.memory_space<vmem>>, vector<1x1x1x32x16xf32>
    %151 = vector.shape_cast %150 : vector<1x1x1x32x16xf32> to vector<32x16xf32>
    %cst_108 = arith.constant dense<0.000000e+00> : vector<8x16xf32>
    %152 = tpu.matmul %144, %151, %cst_108 {dimension_numbers = #tpu.dot_dimension_numbers<[1], [0], [0], [1], [0, 0, 1, 1], [], []>} : vector<8x32xf32>, vector<32x16xf32>, vector<8x16xf32> -> vector<8x16xf32>
    %c0_109 = arith.constant 0 : index
    %c1_110 = arith.constant 1 : index
    %c0_111 = arith.constant 0 : index
    %c0_112 = arith.constant 0 : index
    %c0_113 = arith.constant 0 : index
    %153 = vector.load %arg9[%c0_109, %c1_110, %c0_111, %c0_112, %c0_113] : memref<2x2x2x32x16xf32, #tpu.memory_space<vmem>>, vector<1x1x1x32x16xf32>
    %154 = vector.shape_cast %153 : vector<1x1x1x32x16xf32> to vector<32x16xf32>
    %cst_114 = arith.constant dense<0.000000e+00> : vector<8x16xf32>
    %155 = tpu.matmul %5, %154, %cst_114 {dimension_numbers = #tpu.dot_dimension_numbers<[1], [0], [0], [1], [0, 0, 1, 1], [], []>} : vector<8x32xf32>, vector<32x16xf32>, vector<8x16xf32> -> vector<8x16xf32>
    %c0_115 = arith.constant 0 : index
    %c1_116 = arith.constant 1 : index
    %c0_117 = arith.constant 0 : index
    %c0_118 = arith.constant 0 : index
    %c0_119 = arith.constant 0 : index
    %156 = vector.load %arg10[%c0_115, %c1_116, %c0_117, %c0_118, %c0_119] : memref<2x2x2x32x16xf32, #tpu.memory_space<vmem>>, vector<1x1x1x32x16xf32>
    %157 = vector.shape_cast %156 : vector<1x1x1x32x16xf32> to vector<32x16xf32>
    %cst_120 = arith.constant dense<0.000000e+00> : vector<8x16xf32>
    %158 = tpu.matmul %5, %157, %cst_120 {dimension_numbers = #tpu.dot_dimension_numbers<[1], [0], [0], [1], [0, 0, 1, 1], [], []>} : vector<8x32xf32>, vector<32x16xf32>, vector<8x16xf32> -> vector<8x16xf32>
    %159 = vector.shape_cast %152 : vector<8x16xf32> to vector<1x8x16xf32>
    %160 = vector.shape_cast %155 : vector<8x16xf32> to vector<1x8x16xf32>
    %161 = vector.shape_cast %158 : vector<8x16xf32> to vector<1x8x16xf32>
    "tpu.trace_start"() <{level = 10 : i32, message = "bqk,bsk->bqs"}> : () -> ()
    %cst_121 = arith.constant dense<0.000000e+00> : vector<1x8x8xf32>
    %162 = tpu.matmul %159, %160, %cst_121 {dimension_numbers = #tpu.dot_dimension_numbers<[2], [2], [1], [1], [0, 0, 0, 1, 1, 1], [0], [0]>} : vector<1x8x16xf32>, vector<1x8x16xf32>, vector<1x8x8xf32> -> vector<1x8x8xf32>
    "tpu.trace_stop"() : () -> ()
    %163 = arith.addf %162, %56 : vector<1x8x8xf32>
    %cst_122 = arith.constant dense<0xFF800000> : vector<1x8xf32>
    %164 = vector.multi_reduction <maximumf>, %163, %cst_122 [2] : vector<1x8x8xf32> to vector<1x8xf32>
    %165 = vector.shape_cast %164 : vector<1x8xf32> to vector<1x8x1xf32>
    %166 = vector.broadcast %165 : vector<1x8x1xf32> to vector<1x8x8xf32>
    %167 = arith.subf %163, %166 : vector<1x8x8xf32>
    %168 = math.exp %167 : vector<1x8x8xf32>
    %cst_123 = arith.constant dense<0.000000e+00> : vector<1x8xf32>
    %169 = vector.multi_reduction <add>, %168, %cst_123 [2] : vector<1x8x8xf32> to vector<1x8xf32>
    %170 = vector.shape_cast %169 : vector<1x8xf32> to vector<1x8x1xf32>
    %171 = tpu.reciprocal %170 {approx = true} : vector<1x8x1xf32> -> vector<1x8x1xf32>
    %172 = vector.broadcast %171 : vector<1x8x1xf32> to vector<1x8x8xf32>
    %173 = arith.mulf %168, %172 : vector<1x8x8xf32>
    "tpu.trace_start"() <{level = 10 : i32, message = "bqs,bsv->bqv"}> : () -> ()
    %cst_124 = arith.constant dense<0.000000e+00> : vector<1x8x16xf32>
    %174 = tpu.matmul %173, %161, %cst_124 {dimension_numbers = #tpu.dot_dimension_numbers<[2], [1], [1], [2], [0, 0, 0, 1, 1, 2], [0], [0]>} : vector<1x8x8xf32>, vector<1x8x16xf32>, vector<1x8x16xf32> -> vector<1x8x16xf32>
    "tpu.trace_stop"() : () -> ()
    %175 = vector.shape_cast %174 : vector<1x8x16xf32> to vector<8x16xf32>
    %c0_125 = arith.constant 0 : index
    %c1_126 = arith.constant 1 : index
    %c0_127 = arith.constant 0 : index
    %c0_128 = arith.constant 0 : index
    %c0_129 = arith.constant 0 : index
    %176 = vector.load %arg11[%c0_125, %c1_126, %c0_127, %c0_128, %c0_129] : memref<2x2x2x16x32xf32, #tpu.memory_space<vmem>>, vector<1x1x1x16x32xf32>
    %177 = vector.shape_cast %176 : vector<1x1x1x16x32xf32> to vector<16x32xf32>
    %cst_130 = arith.constant dense<0.000000e+00> : vector<8x32xf32>
    %178 = tpu.matmul %175, %177, %cst_130 {dimension_numbers = #tpu.dot_dimension_numbers<[1], [0], [0], [1], [0, 0, 1, 1], [], []>} : vector<8x16xf32>, vector<16x32xf32>, vector<8x32xf32> -> vector<8x32xf32>
    %179 = arith.addf %149, %178 : vector<8x32xf32>
    %c0_131 = arith.constant 0 : index
    %c1_132 = arith.constant 1 : index
    %c1_133 = arith.constant 1 : index
    %c0_134 = arith.constant 0 : index
    %c0_135 = arith.constant 0 : index
    %180 = vector.load %arg8[%c0_131, %c1_132, %c1_133, %c0_134, %c0_135] : memref<2x2x2x32x16xf32, #tpu.memory_space<vmem>>, vector<1x1x1x32x16xf32>
    %181 = vector.shape_cast %180 : vector<1x1x1x32x16xf32> to vector<32x16xf32>
    %cst_136 = arith.constant dense<0.000000e+00> : vector<8x16xf32>
    %182 = tpu.matmul %144, %181, %cst_136 {dimension_numbers = #tpu.dot_dimension_numbers<[1], [0], [0], [1], [0, 0, 1, 1], [], []>} : vector<8x32xf32>, vector<32x16xf32>, vector<8x16xf32> -> vector<8x16xf32>
    %c0_137 = arith.constant 0 : index
    %c1_138 = arith.constant 1 : index
    %c1_139 = arith.constant 1 : index
    %c0_140 = arith.constant 0 : index
    %c0_141 = arith.constant 0 : index
    %183 = vector.load %arg9[%c0_137, %c1_138, %c1_139, %c0_140, %c0_141] : memref<2x2x2x32x16xf32, #tpu.memory_space<vmem>>, vector<1x1x1x32x16xf32>
    %184 = vector.shape_cast %183 : vector<1x1x1x32x16xf32> to vector<32x16xf32>
    %cst_142 = arith.constant dense<0.000000e+00> : vector<8x16xf32>
    %185 = tpu.matmul %5, %184, %cst_142 {dimension_numbers = #tpu.dot_dimension_numbers<[1], [0], [0], [1], [0, 0, 1, 1], [], []>} : vector<8x32xf32>, vector<32x16xf32>, vector<8x16xf32> -> vector<8x16xf32>
    %c0_143 = arith.constant 0 : index
    %c1_144 = arith.constant 1 : index
    %c1_145 = arith.constant 1 : index
    %c0_146 = arith.constant 0 : index
    %c0_147 = arith.constant 0 : index
    %186 = vector.load %arg10[%c0_143, %c1_144, %c1_145, %c0_146, %c0_147] : memref<2x2x2x32x16xf32, #tpu.memory_space<vmem>>, vector<1x1x1x32x16xf32>
    %187 = vector.shape_cast %186 : vector<1x1x1x32x16xf32> to vector<32x16xf32>
    %cst_148 = arith.constant dense<0.000000e+00> : vector<8x16xf32>
    %188 = tpu.matmul %5, %187, %cst_148 {dimension_numbers = #tpu.dot_dimension_numbers<[1], [0], [0], [1], [0, 0, 1, 1], [], []>} : vector<8x32xf32>, vector<32x16xf32>, vector<8x16xf32> -> vector<8x16xf32>
    %189 = vector.shape_cast %182 : vector<8x16xf32> to vector<1x8x16xf32>
    %190 = vector.shape_cast %185 : vector<8x16xf32> to vector<1x8x16xf32>
    %191 = vector.shape_cast %188 : vector<8x16xf32> to vector<1x8x16xf32>
    "tpu.trace_start"() <{level = 10 : i32, message = "bqk,bsk->bqs"}> : () -> ()
    %cst_149 = arith.constant dense<0.000000e+00> : vector<1x8x8xf32>
    %192 = tpu.matmul %189, %190, %cst_149 {dimension_numbers = #tpu.dot_dimension_numbers<[2], [2], [1], [1], [0, 0, 0, 1, 1, 1], [0], [0]>} : vector<1x8x16xf32>, vector<1x8x16xf32>, vector<1x8x8xf32> -> vector<1x8x8xf32>
    "tpu.trace_stop"() : () -> ()
    %193 = arith.addf %192, %56 : vector<1x8x8xf32>
    %cst_150 = arith.constant dense<0xFF800000> : vector<1x8xf32>
    %194 = vector.multi_reduction <maximumf>, %193, %cst_150 [2] : vector<1x8x8xf32> to vector<1x8xf32>
    %195 = vector.shape_cast %194 : vector<1x8xf32> to vector<1x8x1xf32>
    %196 = vector.broadcast %195 : vector<1x8x1xf32> to vector<1x8x8xf32>
    %197 = arith.subf %193, %196 : vector<1x8x8xf32>
    %198 = math.exp %197 : vector<1x8x8xf32>
    %cst_151 = arith.constant dense<0.000000e+00> : vector<1x8xf32>
    %199 = vector.multi_reduction <add>, %198, %cst_151 [2] : vector<1x8x8xf32> to vector<1x8xf32>
    %200 = vector.shape_cast %199 : vector<1x8xf32> to vector<1x8x1xf32>
    %201 = tpu.reciprocal %200 {approx = true} : vector<1x8x1xf32> -> vector<1x8x1xf32>
    %202 = vector.broadcast %201 : vector<1x8x1xf32> to vector<1x8x8xf32>
    %203 = arith.mulf %198, %202 : vector<1x8x8xf32>
    "tpu.trace_start"() <{level = 10 : i32, message = "bqs,bsv->bqv"}> : () -> ()
    %cst_152 = arith.constant dense<0.000000e+00> : vector<1x8x16xf32>
    %204 = tpu.matmul %203, %191, %cst_152 {dimension_numbers = #tpu.dot_dimension_numbers<[2], [1], [1], [2], [0, 0, 0, 1, 1, 2], [0], [0]>} : vector<1x8x8xf32>, vector<1x8x16xf32>, vector<1x8x16xf32> -> vector<1x8x16xf32>
    "tpu.trace_stop"() : () -> ()
    %205 = vector.shape_cast %204 : vector<1x8x16xf32> to vector<8x16xf32>
    %c0_153 = arith.constant 0 : index
    %c1_154 = arith.constant 1 : index
    %c1_155 = arith.constant 1 : index
    %c0_156 = arith.constant 0 : index
    %c0_157 = arith.constant 0 : index
    %206 = vector.load %arg11[%c0_153, %c1_154, %c1_155, %c0_156, %c0_157] : memref<2x2x2x16x32xf32, #tpu.memory_space<vmem>>, vector<1x1x1x16x32xf32>
    %207 = vector.shape_cast %206 : vector<1x1x1x16x32xf32> to vector<16x32xf32>
    %cst_158 = arith.constant dense<0.000000e+00> : vector<8x32xf32>
    %208 = tpu.matmul %205, %207, %cst_158 {dimension_numbers = #tpu.dot_dimension_numbers<[1], [0], [0], [1], [0, 0, 1, 1], [], []>} : vector<8x16xf32>, vector<16x32xf32>, vector<8x32xf32> -> vector<8x32xf32>
    %209 = arith.addf %179, %208 : vector<8x32xf32>
    %210 = arith.addf %209, %144 : vector<8x32xf32>
    %cst_159 = arith.constant dense<0.000000e+00> : vector<8xf32>
    %211 = vector.multi_reduction <add>, %210, %cst_159 [1] : vector<8x32xf32> to vector<8xf32>
    %212 = vector.shape_cast %211 : vector<8xf32> to vector<8x1xf32>
    %cst_160 = arith.constant 3.200000e+01 : f32
    %213 = vector.broadcast %cst_160 : f32 to vector<8x1xf32>
    %214 = arith.divf %212, %213 : vector<8x1xf32>
    %215 = vector.broadcast %214 : vector<8x1xf32> to vector<8x32xf32>
    %216 = arith.subf %210, %215 : vector<8x32xf32>
    %217 = arith.mulf %216, %216 : vector<8x32xf32>
    %cst_161 = arith.constant dense<0.000000e+00> : vector<8xf32>
    %218 = vector.multi_reduction <add>, %217, %cst_161 [1] : vector<8x32xf32> to vector<8xf32>
    %219 = vector.shape_cast %218 : vector<8xf32> to vector<8x1xf32>
    %cst_162 = arith.constant 3.200000e+01 : f32
    %220 = vector.broadcast %cst_162 : f32 to vector<8x1xf32>
    %221 = arith.divf %219, %220 : vector<8x1xf32>
    %222 = vector.broadcast %214 : vector<8x1xf32> to vector<8x32xf32>
    %223 = arith.subf %210, %222 : vector<8x32xf32>
    %cst_163 = arith.constant 9.99999997E-7 : f32
    %224 = vector.broadcast %cst_163 : f32 to vector<8x1xf32>
    %225 = arith.addf %221, %224 : vector<8x1xf32>
    %226 = math.rsqrt %225 : vector<8x1xf32>
    %227 = vector.broadcast %226 : vector<8x1xf32> to vector<8x32xf32>
    %228 = arith.mulf %223, %227 : vector<8x32xf32>
    %229 = vector.broadcast %146 : vector<1x32xf32> to vector<8x32xf32>
    %230 = arith.mulf %228, %229 : vector<8x32xf32>
    %231 = vector.broadcast %148 : vector<1x32xf32> to vector<8x32xf32>
    %232 = arith.addf %230, %231 : vector<8x32xf32>
    %c0_164 = arith.constant 0 : index
    %c0_165 = arith.constant 0 : index
    %c0_166 = arith.constant 0 : index
    %233 = vector.load %arg12[%c0_164, %c0_165, %c0_166] : memref<2x32x64xf32, #tpu.memory_space<vmem>>, vector<1x32x64xf32>
    %234 = vector.shape_cast %233 : vector<1x32x64xf32> to vector<32x64xf32>
    %c0_167 = arith.constant 0 : index
    %c0_168 = arith.constant 0 : index
    %c0_169 = arith.constant 0 : index
    %235 = vector.load %arg14[%c0_167, %c0_168, %c0_169] : memref<2x1x64xf32, #tpu.memory_space<vmem>>, vector<1x1x64xf32>
    %236 = vector.shape_cast %235 : vector<1x1x64xf32> to vector<1x64xf32>
    %c0_170 = arith.constant 0 : index
    %c0_171 = arith.constant 0 : index
    %c0_172 = arith.constant 0 : index
    %237 = vector.load %arg13[%c0_170, %c0_171, %c0_172] : memref<2x64x32xf32, #tpu.memory_space<vmem>>, vector<1x64x32xf32>
    %238 = vector.shape_cast %237 : vector<1x64x32xf32> to vector<64x32xf32>
    %c0_173 = arith.constant 0 : index
    %c6 = arith.constant 6 : index
    %c0_174 = arith.constant 0 : index
    %239 = vector.load %arg15[%c0_173, %c6, %c0_174] : memref<2x8x32xf32, #tpu.memory_space<vmem>>, vector<1x1x32xf32>
    %240 = vector.shape_cast %239 : vector<1x1x32xf32> to vector<1x32xf32>
    %c0_175 = arith.constant 0 : index
    %c4 = arith.constant 4 : index
    %c0_176 = arith.constant 0 : index
    %241 = vector.load %arg15[%c0_175, %c4, %c0_176] : memref<2x8x32xf32, #tpu.memory_space<vmem>>, vector<1x1x32xf32>
    %242 = vector.shape_cast %241 : vector<1x1x32xf32> to vector<1x32xf32>
    %c0_177 = arith.constant 0 : index
    %c5 = arith.constant 5 : index
    %c0_178 = arith.constant 0 : index
    %243 = vector.load %arg15[%c0_177, %c5, %c0_178] : memref<2x8x32xf32, #tpu.memory_space<vmem>>, vector<1x1x32xf32>
    %244 = vector.shape_cast %243 : vector<1x1x32xf32> to vector<1x32xf32>
    %cst_179 = arith.constant dense<0.000000e+00> : vector<8x64xf32>
    %245 = tpu.matmul %232, %234, %cst_179 {dimension_numbers = #tpu.dot_dimension_numbers<[1], [0], [0], [1], [0, 0, 1, 1], [], []>} : vector<8x32xf32>, vector<32x64xf32>, vector<8x64xf32> -> vector<8x64xf32>
    %246 = vector.broadcast %236 : vector<1x64xf32> to vector<8x64xf32>
    %247 = arith.addf %245, %246 : vector<8x64xf32>
    %cst_180 = arith.constant 0.000000e+00 : f32
    %248 = vector.broadcast %cst_180 : f32 to vector<8x64xf32>
    %249 = arith.maximumf %247, %248 : vector<8x64xf32>
    %cst_181 = arith.constant dense<0.000000e+00> : vector<8x32xf32>
    %250 = tpu.matmul %249, %238, %cst_181 {dimension_numbers = #tpu.dot_dimension_numbers<[1], [0], [0], [1], [0, 0, 1, 1], [], []>} : vector<8x64xf32>, vector<64x32xf32>, vector<8x32xf32> -> vector<8x32xf32>
    %251 = vector.broadcast %240 : vector<1x32xf32> to vector<8x32xf32>
    %252 = arith.addf %250, %251 : vector<8x32xf32>
    %253 = arith.addf %252, %232 : vector<8x32xf32>
    %cst_182 = arith.constant dense<0.000000e+00> : vector<8xf32>
    %254 = vector.multi_reduction <add>, %253, %cst_182 [1] : vector<8x32xf32> to vector<8xf32>
    %255 = vector.shape_cast %254 : vector<8xf32> to vector<8x1xf32>
    %cst_183 = arith.constant 3.200000e+01 : f32
    %256 = vector.broadcast %cst_183 : f32 to vector<8x1xf32>
    %257 = arith.divf %255, %256 : vector<8x1xf32>
    %258 = vector.broadcast %257 : vector<8x1xf32> to vector<8x32xf32>
    %259 = arith.subf %253, %258 : vector<8x32xf32>
    %260 = arith.mulf %259, %259 : vector<8x32xf32>
    %cst_184 = arith.constant dense<0.000000e+00> : vector<8xf32>
    %261 = vector.multi_reduction <add>, %260, %cst_184 [1] : vector<8x32xf32> to vector<8xf32>
    %262 = vector.shape_cast %261 : vector<8xf32> to vector<8x1xf32>
    %cst_185 = arith.constant 3.200000e+01 : f32
    %263 = vector.broadcast %cst_185 : f32 to vector<8x1xf32>
    %264 = arith.divf %262, %263 : vector<8x1xf32>
    %265 = vector.broadcast %257 : vector<8x1xf32> to vector<8x32xf32>
    %266 = arith.subf %253, %265 : vector<8x32xf32>
    %cst_186 = arith.constant 9.99999997E-7 : f32
    %267 = vector.broadcast %cst_186 : f32 to vector<8x1xf32>
    %268 = arith.addf %264, %267 : vector<8x1xf32>
    %269 = math.rsqrt %268 : vector<8x1xf32>
    %270 = vector.broadcast %269 : vector<8x1xf32> to vector<8x32xf32>
    %271 = arith.mulf %266, %270 : vector<8x32xf32>
    %272 = vector.broadcast %242 : vector<1x32xf32> to vector<8x32xf32>
    %273 = arith.mulf %271, %272 : vector<8x32xf32>
    %274 = vector.broadcast %244 : vector<1x32xf32> to vector<8x32xf32>
    %275 = arith.addf %273, %274 : vector<8x32xf32>
    %c1_187 = arith.constant 1 : index
    %c0_188 = arith.constant 0 : index
    %c0_189 = arith.constant 0 : index
    %276 = vector.load %arg15[%c1_187, %c0_188, %c0_189] : memref<2x8x32xf32, #tpu.memory_space<vmem>>, vector<1x1x32xf32>
    %277 = vector.shape_cast %276 : vector<1x1x32xf32> to vector<1x32xf32>
    %c1_190 = arith.constant 1 : index
    %c1_191 = arith.constant 1 : index
    %c0_192 = arith.constant 0 : index
    %278 = vector.load %arg15[%c1_190, %c1_191, %c0_192] : memref<2x8x32xf32, #tpu.memory_space<vmem>>, vector<1x1x32xf32>
    %279 = vector.shape_cast %278 : vector<1x1x32xf32> to vector<1x32xf32>
    %cst_193 = arith.constant 0.000000e+00 : f32
    %280 = vector.broadcast %cst_193 : f32 to vector<8x32xf32>
    %c1_194 = arith.constant 1 : index
    %c0_195 = arith.constant 0 : index
    %c0_196 = arith.constant 0 : index
    %c0_197 = arith.constant 0 : index
    %c0_198 = arith.constant 0 : index
    %281 = vector.load %arg8[%c1_194, %c0_195, %c0_196, %c0_197, %c0_198] : memref<2x2x2x32x16xf32, #tpu.memory_space<vmem>>, vector<1x1x1x32x16xf32>
    %282 = vector.shape_cast %281 : vector<1x1x1x32x16xf32> to vector<32x16xf32>
    %cst_199 = arith.constant dense<0.000000e+00> : vector<8x16xf32>
    %283 = tpu.matmul %275, %282, %cst_199 {dimension_numbers = #tpu.dot_dimension_numbers<[1], [0], [0], [1], [0, 0, 1, 1], [], []>} : vector<8x32xf32>, vector<32x16xf32>, vector<8x16xf32> -> vector<8x16xf32>
    %c1_200 = arith.constant 1 : index
    %c0_201 = arith.constant 0 : index
    %c0_202 = arith.constant 0 : index
    %c0_203 = arith.constant 0 : index
    %c0_204 = arith.constant 0 : index
    %284 = vector.load %arg9[%c1_200, %c0_201, %c0_202, %c0_203, %c0_204] : memref<2x2x2x32x16xf32, #tpu.memory_space<vmem>>, vector<1x1x1x32x16xf32>
    %285 = vector.shape_cast %284 : vector<1x1x1x32x16xf32> to vector<32x16xf32>
    %cst_205 = arith.constant dense<0.000000e+00> : vector<8x16xf32>
    %286 = tpu.matmul %275, %285, %cst_205 {dimension_numbers = #tpu.dot_dimension_numbers<[1], [0], [0], [1], [0, 0, 1, 1], [], []>} : vector<8x32xf32>, vector<32x16xf32>, vector<8x16xf32> -> vector<8x16xf32>
    %c1_206 = arith.constant 1 : index
    %c0_207 = arith.constant 0 : index
    %c0_208 = arith.constant 0 : index
    %c0_209 = arith.constant 0 : index
    %c0_210 = arith.constant 0 : index
    %287 = vector.load %arg10[%c1_206, %c0_207, %c0_208, %c0_209, %c0_210] : memref<2x2x2x32x16xf32, #tpu.memory_space<vmem>>, vector<1x1x1x32x16xf32>
    %288 = vector.shape_cast %287 : vector<1x1x1x32x16xf32> to vector<32x16xf32>
    %cst_211 = arith.constant dense<0.000000e+00> : vector<8x16xf32>
    %289 = tpu.matmul %275, %288, %cst_211 {dimension_numbers = #tpu.dot_dimension_numbers<[1], [0], [0], [1], [0, 0, 1, 1], [], []>} : vector<8x32xf32>, vector<32x16xf32>, vector<8x16xf32> -> vector<8x16xf32>
    %290 = vector.shape_cast %283 : vector<8x16xf32> to vector<1x8x16xf32>
    %291 = vector.shape_cast %286 : vector<8x16xf32> to vector<1x8x16xf32>
    %292 = vector.shape_cast %289 : vector<8x16xf32> to vector<1x8x16xf32>
    "tpu.trace_start"() <{level = 10 : i32, message = "bqk,bsk->bqs"}> : () -> ()
    %cst_212 = arith.constant dense<0.000000e+00> : vector<1x8x8xf32>
    %293 = tpu.matmul %290, %291, %cst_212 {dimension_numbers = #tpu.dot_dimension_numbers<[2], [2], [1], [1], [0, 0, 0, 1, 1, 1], [0], [0]>} : vector<1x8x16xf32>, vector<1x8x16xf32>, vector<1x8x8xf32> -> vector<1x8x8xf32>
    "tpu.trace_stop"() : () -> ()
    %294 = arith.addf %293, %53 : vector<1x8x8xf32>
    %cst_213 = arith.constant dense<0xFF800000> : vector<1x8xf32>
    %295 = vector.multi_reduction <maximumf>, %294, %cst_213 [2] : vector<1x8x8xf32> to vector<1x8xf32>
    %296 = vector.shape_cast %295 : vector<1x8xf32> to vector<1x8x1xf32>
    %297 = vector.broadcast %296 : vector<1x8x1xf32> to vector<1x8x8xf32>
    %298 = arith.subf %294, %297 : vector<1x8x8xf32>
    %299 = math.exp %298 : vector<1x8x8xf32>
    %cst_214 = arith.constant dense<0.000000e+00> : vector<1x8xf32>
    %300 = vector.multi_reduction <add>, %299, %cst_214 [2] : vector<1x8x8xf32> to vector<1x8xf32>
    %301 = vector.shape_cast %300 : vector<1x8xf32> to vector<1x8x1xf32>
    %302 = tpu.reciprocal %301 {approx = true} : vector<1x8x1xf32> -> vector<1x8x1xf32>
    %303 = vector.broadcast %302 : vector<1x8x1xf32> to vector<1x8x8xf32>
    %304 = arith.mulf %299, %303 : vector<1x8x8xf32>
    "tpu.trace_start"() <{level = 10 : i32, message = "bqs,bsv->bqv"}> : () -> ()
    %cst_215 = arith.constant dense<0.000000e+00> : vector<1x8x16xf32>
    %305 = tpu.matmul %304, %292, %cst_215 {dimension_numbers = #tpu.dot_dimension_numbers<[2], [1], [1], [2], [0, 0, 0, 1, 1, 2], [0], [0]>} : vector<1x8x8xf32>, vector<1x8x16xf32>, vector<1x8x16xf32> -> vector<1x8x16xf32>
    "tpu.trace_stop"() : () -> ()
    %306 = vector.shape_cast %305 : vector<1x8x16xf32> to vector<8x16xf32>
    %c1_216 = arith.constant 1 : index
    %c0_217 = arith.constant 0 : index
    %c0_218 = arith.constant 0 : index
    %c0_219 = arith.constant 0 : index
    %c0_220 = arith.constant 0 : index
    %307 = vector.load %arg11[%c1_216, %c0_217, %c0_218, %c0_219, %c0_220] : memref<2x2x2x16x32xf32, #tpu.memory_space<vmem>>, vector<1x1x1x16x32xf32>
    %308 = vector.shape_cast %307 : vector<1x1x1x16x32xf32> to vector<16x32xf32>
    %cst_221 = arith.constant dense<0.000000e+00> : vector<8x32xf32>
    %309 = tpu.matmul %306, %308, %cst_221 {dimension_numbers = #tpu.dot_dimension_numbers<[1], [0], [0], [1], [0, 0, 1, 1], [], []>} : vector<8x16xf32>, vector<16x32xf32>, vector<8x32xf32> -> vector<8x32xf32>
    %310 = arith.addf %280, %309 : vector<8x32xf32>
    %c1_222 = arith.constant 1 : index
    %c0_223 = arith.constant 0 : index
    %c1_224 = arith.constant 1 : index
    %c0_225 = arith.constant 0 : index
    %c0_226 = arith.constant 0 : index
    %311 = vector.load %arg8[%c1_222, %c0_223, %c1_224, %c0_225, %c0_226] : memref<2x2x2x32x16xf32, #tpu.memory_space<vmem>>, vector<1x1x1x32x16xf32>
    %312 = vector.shape_cast %311 : vector<1x1x1x32x16xf32> to vector<32x16xf32>
    %cst_227 = arith.constant dense<0.000000e+00> : vector<8x16xf32>
    %313 = tpu.matmul %275, %312, %cst_227 {dimension_numbers = #tpu.dot_dimension_numbers<[1], [0], [0], [1], [0, 0, 1, 1], [], []>} : vector<8x32xf32>, vector<32x16xf32>, vector<8x16xf32> -> vector<8x16xf32>
    %c1_228 = arith.constant 1 : index
    %c0_229 = arith.constant 0 : index
    %c1_230 = arith.constant 1 : index
    %c0_231 = arith.constant 0 : index
    %c0_232 = arith.constant 0 : index
    %314 = vector.load %arg9[%c1_228, %c0_229, %c1_230, %c0_231, %c0_232] : memref<2x2x2x32x16xf32, #tpu.memory_space<vmem>>, vector<1x1x1x32x16xf32>
    %315 = vector.shape_cast %314 : vector<1x1x1x32x16xf32> to vector<32x16xf32>
    %cst_233 = arith.constant dense<0.000000e+00> : vector<8x16xf32>
    %316 = tpu.matmul %275, %315, %cst_233 {dimension_numbers = #tpu.dot_dimension_numbers<[1], [0], [0], [1], [0, 0, 1, 1], [], []>} : vector<8x32xf32>, vector<32x16xf32>, vector<8x16xf32> -> vector<8x16xf32>
    %c1_234 = arith.constant 1 : index
    %c0_235 = arith.constant 0 : index
    %c1_236 = arith.constant 1 : index
    %c0_237 = arith.constant 0 : index
    %c0_238 = arith.constant 0 : index
    %317 = vector.load %arg10[%c1_234, %c0_235, %c1_236, %c0_237, %c0_238] : memref<2x2x2x32x16xf32, #tpu.memory_space<vmem>>, vector<1x1x1x32x16xf32>
    %318 = vector.shape_cast %317 : vector<1x1x1x32x16xf32> to vector<32x16xf32>
    %cst_239 = arith.constant dense<0.000000e+00> : vector<8x16xf32>
    %319 = tpu.matmul %275, %318, %cst_239 {dimension_numbers = #tpu.dot_dimension_numbers<[1], [0], [0], [1], [0, 0, 1, 1], [], []>} : vector<8x32xf32>, vector<32x16xf32>, vector<8x16xf32> -> vector<8x16xf32>
    %320 = vector.shape_cast %313 : vector<8x16xf32> to vector<1x8x16xf32>
    %321 = vector.shape_cast %316 : vector<8x16xf32> to vector<1x8x16xf32>
    %322 = vector.shape_cast %319 : vector<8x16xf32> to vector<1x8x16xf32>
    "tpu.trace_start"() <{level = 10 : i32, message = "bqk,bsk->bqs"}> : () -> ()
    %cst_240 = arith.constant dense<0.000000e+00> : vector<1x8x8xf32>
    %323 = tpu.matmul %320, %321, %cst_240 {dimension_numbers = #tpu.dot_dimension_numbers<[2], [2], [1], [1], [0, 0, 0, 1, 1, 1], [0], [0]>} : vector<1x8x16xf32>, vector<1x8x16xf32>, vector<1x8x8xf32> -> vector<1x8x8xf32>
    "tpu.trace_stop"() : () -> ()
    %324 = arith.addf %323, %53 : vector<1x8x8xf32>
    %cst_241 = arith.constant dense<0xFF800000> : vector<1x8xf32>
    %325 = vector.multi_reduction <maximumf>, %324, %cst_241 [2] : vector<1x8x8xf32> to vector<1x8xf32>
    %326 = vector.shape_cast %325 : vector<1x8xf32> to vector<1x8x1xf32>
    %327 = vector.broadcast %326 : vector<1x8x1xf32> to vector<1x8x8xf32>
    %328 = arith.subf %324, %327 : vector<1x8x8xf32>
    %329 = math.exp %328 : vector<1x8x8xf32>
    %cst_242 = arith.constant dense<0.000000e+00> : vector<1x8xf32>
    %330 = vector.multi_reduction <add>, %329, %cst_242 [2] : vector<1x8x8xf32> to vector<1x8xf32>
    %331 = vector.shape_cast %330 : vector<1x8xf32> to vector<1x8x1xf32>
    %332 = tpu.reciprocal %331 {approx = true} : vector<1x8x1xf32> -> vector<1x8x1xf32>
    %333 = vector.broadcast %332 : vector<1x8x1xf32> to vector<1x8x8xf32>
    %334 = arith.mulf %329, %333 : vector<1x8x8xf32>
    "tpu.trace_start"() <{level = 10 : i32, message = "bqs,bsv->bqv"}> : () -> ()
    %cst_243 = arith.constant dense<0.000000e+00> : vector<1x8x16xf32>
    %335 = tpu.matmul %334, %322, %cst_243 {dimension_numbers = #tpu.dot_dimension_numbers<[2], [1], [1], [2], [0, 0, 0, 1, 1, 2], [0], [0]>} : vector<1x8x8xf32>, vector<1x8x16xf32>, vector<1x8x16xf32> -> vector<1x8x16xf32>
    "tpu.trace_stop"() : () -> ()
    %336 = vector.shape_cast %335 : vector<1x8x16xf32> to vector<8x16xf32>
    %c1_244 = arith.constant 1 : index
    %c0_245 = arith.constant 0 : index
    %c1_246 = arith.constant 1 : index
    %c0_247 = arith.constant 0 : index
    %c0_248 = arith.constant 0 : index
    %337 = vector.load %arg11[%c1_244, %c0_245, %c1_246, %c0_247, %c0_248] : memref<2x2x2x16x32xf32, #tpu.memory_space<vmem>>, vector<1x1x1x16x32xf32>
    %338 = vector.shape_cast %337 : vector<1x1x1x16x32xf32> to vector<16x32xf32>
    %cst_249 = arith.constant dense<0.000000e+00> : vector<8x32xf32>
    %339 = tpu.matmul %336, %338, %cst_249 {dimension_numbers = #tpu.dot_dimension_numbers<[1], [0], [0], [1], [0, 0, 1, 1], [], []>} : vector<8x16xf32>, vector<16x32xf32>, vector<8x32xf32> -> vector<8x32xf32>
    %340 = arith.addf %310, %339 : vector<8x32xf32>
    %341 = arith.addf %340, %275 : vector<8x32xf32>
    %cst_250 = arith.constant dense<0.000000e+00> : vector<8xf32>
    %342 = vector.multi_reduction <add>, %341, %cst_250 [1] : vector<8x32xf32> to vector<8xf32>
    %343 = vector.shape_cast %342 : vector<8xf32> to vector<8x1xf32>
    %cst_251 = arith.constant 3.200000e+01 : f32
    %344 = vector.broadcast %cst_251 : f32 to vector<8x1xf32>
    %345 = arith.divf %343, %344 : vector<8x1xf32>
    %346 = vector.broadcast %345 : vector<8x1xf32> to vector<8x32xf32>
    %347 = arith.subf %341, %346 : vector<8x32xf32>
    %348 = arith.mulf %347, %347 : vector<8x32xf32>
    %cst_252 = arith.constant dense<0.000000e+00> : vector<8xf32>
    %349 = vector.multi_reduction <add>, %348, %cst_252 [1] : vector<8x32xf32> to vector<8xf32>
    %350 = vector.shape_cast %349 : vector<8xf32> to vector<8x1xf32>
    %cst_253 = arith.constant 3.200000e+01 : f32
    %351 = vector.broadcast %cst_253 : f32 to vector<8x1xf32>
    %352 = arith.divf %350, %351 : vector<8x1xf32>
    %353 = vector.broadcast %345 : vector<8x1xf32> to vector<8x32xf32>
    %354 = arith.subf %341, %353 : vector<8x32xf32>
    %cst_254 = arith.constant 9.99999997E-7 : f32
    %355 = vector.broadcast %cst_254 : f32 to vector<8x1xf32>
    %356 = arith.addf %352, %355 : vector<8x1xf32>
    %357 = math.rsqrt %356 : vector<8x1xf32>
    %358 = vector.broadcast %357 : vector<8x1xf32> to vector<8x32xf32>
    %359 = arith.mulf %354, %358 : vector<8x32xf32>
    %360 = vector.broadcast %277 : vector<1x32xf32> to vector<8x32xf32>
    %361 = arith.mulf %359, %360 : vector<8x32xf32>
    %362 = vector.broadcast %279 : vector<1x32xf32> to vector<8x32xf32>
    %363 = arith.addf %361, %362 : vector<8x32xf32>
    %c1_255 = arith.constant 1 : index
    %c2_256 = arith.constant 2 : index
    %c0_257 = arith.constant 0 : index
    %364 = vector.load %arg15[%c1_255, %c2_256, %c0_257] : memref<2x8x32xf32, #tpu.memory_space<vmem>>, vector<1x1x32xf32>
    %365 = vector.shape_cast %364 : vector<1x1x32xf32> to vector<1x32xf32>
    %c1_258 = arith.constant 1 : index
    %c3_259 = arith.constant 3 : index
    %c0_260 = arith.constant 0 : index
    %366 = vector.load %arg15[%c1_258, %c3_259, %c0_260] : memref<2x8x32xf32, #tpu.memory_space<vmem>>, vector<1x1x32xf32>
    %367 = vector.shape_cast %366 : vector<1x1x32xf32> to vector<1x32xf32>
    %cst_261 = arith.constant 0.000000e+00 : f32
    %368 = vector.broadcast %cst_261 : f32 to vector<8x32xf32>
    %c1_262 = arith.constant 1 : index
    %c1_263 = arith.constant 1 : index
    %c0_264 = arith.constant 0 : index
    %c0_265 = arith.constant 0 : index
    %c0_266 = arith.constant 0 : index
    %369 = vector.load %arg8[%c1_262, %c1_263, %c0_264, %c0_265, %c0_266] : memref<2x2x2x32x16xf32, #tpu.memory_space<vmem>>, vector<1x1x1x32x16xf32>
    %370 = vector.shape_cast %369 : vector<1x1x1x32x16xf32> to vector<32x16xf32>
    %cst_267 = arith.constant dense<0.000000e+00> : vector<8x16xf32>
    %371 = tpu.matmul %363, %370, %cst_267 {dimension_numbers = #tpu.dot_dimension_numbers<[1], [0], [0], [1], [0, 0, 1, 1], [], []>} : vector<8x32xf32>, vector<32x16xf32>, vector<8x16xf32> -> vector<8x16xf32>
    %c1_268 = arith.constant 1 : index
    %c1_269 = arith.constant 1 : index
    %c0_270 = arith.constant 0 : index
    %c0_271 = arith.constant 0 : index
    %c0_272 = arith.constant 0 : index
    %372 = vector.load %arg9[%c1_268, %c1_269, %c0_270, %c0_271, %c0_272] : memref<2x2x2x32x16xf32, #tpu.memory_space<vmem>>, vector<1x1x1x32x16xf32>
    %373 = vector.shape_cast %372 : vector<1x1x1x32x16xf32> to vector<32x16xf32>
    %cst_273 = arith.constant dense<0.000000e+00> : vector<8x16xf32>
    %374 = tpu.matmul %5, %373, %cst_273 {dimension_numbers = #tpu.dot_dimension_numbers<[1], [0], [0], [1], [0, 0, 1, 1], [], []>} : vector<8x32xf32>, vector<32x16xf32>, vector<8x16xf32> -> vector<8x16xf32>
    %c1_274 = arith.constant 1 : index
    %c1_275 = arith.constant 1 : index
    %c0_276 = arith.constant 0 : index
    %c0_277 = arith.constant 0 : index
    %c0_278 = arith.constant 0 : index
    %375 = vector.load %arg10[%c1_274, %c1_275, %c0_276, %c0_277, %c0_278] : memref<2x2x2x32x16xf32, #tpu.memory_space<vmem>>, vector<1x1x1x32x16xf32>
    %376 = vector.shape_cast %375 : vector<1x1x1x32x16xf32> to vector<32x16xf32>
    %cst_279 = arith.constant dense<0.000000e+00> : vector<8x16xf32>
    %377 = tpu.matmul %5, %376, %cst_279 {dimension_numbers = #tpu.dot_dimension_numbers<[1], [0], [0], [1], [0, 0, 1, 1], [], []>} : vector<8x32xf32>, vector<32x16xf32>, vector<8x16xf32> -> vector<8x16xf32>
    %378 = vector.shape_cast %371 : vector<8x16xf32> to vector<1x8x16xf32>
    %379 = vector.shape_cast %374 : vector<8x16xf32> to vector<1x8x16xf32>
    %380 = vector.shape_cast %377 : vector<8x16xf32> to vector<1x8x16xf32>
    "tpu.trace_start"() <{level = 10 : i32, message = "bqk,bsk->bqs"}> : () -> ()
    %cst_280 = arith.constant dense<0.000000e+00> : vector<1x8x8xf32>
    %381 = tpu.matmul %378, %379, %cst_280 {dimension_numbers = #tpu.dot_dimension_numbers<[2], [2], [1], [1], [0, 0, 0, 1, 1, 1], [0], [0]>} : vector<1x8x16xf32>, vector<1x8x16xf32>, vector<1x8x8xf32> -> vector<1x8x8xf32>
    "tpu.trace_stop"() : () -> ()
    %382 = arith.addf %381, %56 : vector<1x8x8xf32>
    %cst_281 = arith.constant dense<0xFF800000> : vector<1x8xf32>
    %383 = vector.multi_reduction <maximumf>, %382, %cst_281 [2] : vector<1x8x8xf32> to vector<1x8xf32>
    %384 = vector.shape_cast %383 : vector<1x8xf32> to vector<1x8x1xf32>
    %385 = vector.broadcast %384 : vector<1x8x1xf32> to vector<1x8x8xf32>
    %386 = arith.subf %382, %385 : vector<1x8x8xf32>
    %387 = math.exp %386 : vector<1x8x8xf32>
    %cst_282 = arith.constant dense<0.000000e+00> : vector<1x8xf32>
    %388 = vector.multi_reduction <add>, %387, %cst_282 [2] : vector<1x8x8xf32> to vector<1x8xf32>
    %389 = vector.shape_cast %388 : vector<1x8xf32> to vector<1x8x1xf32>
    %390 = tpu.reciprocal %389 {approx = true} : vector<1x8x1xf32> -> vector<1x8x1xf32>
    %391 = vector.broadcast %390 : vector<1x8x1xf32> to vector<1x8x8xf32>
    %392 = arith.mulf %387, %391 : vector<1x8x8xf32>
    "tpu.trace_start"() <{level = 10 : i32, message = "bqs,bsv->bqv"}> : () -> ()
    %cst_283 = arith.constant dense<0.000000e+00> : vector<1x8x16xf32>
    %393 = tpu.matmul %392, %380, %cst_283 {dimension_numbers = #tpu.dot_dimension_numbers<[2], [1], [1], [2], [0, 0, 0, 1, 1, 2], [0], [0]>} : vector<1x8x8xf32>, vector<1x8x16xf32>, vector<1x8x16xf32> -> vector<1x8x16xf32>
    "tpu.trace_stop"() : () -> ()
    %394 = vector.shape_cast %393 : vector<1x8x16xf32> to vector<8x16xf32>
    %c1_284 = arith.constant 1 : index
    %c1_285 = arith.constant 1 : index
    %c0_286 = arith.constant 0 : index
    %c0_287 = arith.constant 0 : index
    %c0_288 = arith.constant 0 : index
    %395 = vector.load %arg11[%c1_284, %c1_285, %c0_286, %c0_287, %c0_288] : memref<2x2x2x16x32xf32, #tpu.memory_space<vmem>>, vector<1x1x1x16x32xf32>
    %396 = vector.shape_cast %395 : vector<1x1x1x16x32xf32> to vector<16x32xf32>
    %cst_289 = arith.constant dense<0.000000e+00> : vector<8x32xf32>
    %397 = tpu.matmul %394, %396, %cst_289 {dimension_numbers = #tpu.dot_dimension_numbers<[1], [0], [0], [1], [0, 0, 1, 1], [], []>} : vector<8x16xf32>, vector<16x32xf32>, vector<8x32xf32> -> vector<8x32xf32>
    %398 = arith.addf %368, %397 : vector<8x32xf32>
    %c1_290 = arith.constant 1 : index
    %c1_291 = arith.constant 1 : index
    %c1_292 = arith.constant 1 : index
    %c0_293 = arith.constant 0 : index
    %c0_294 = arith.constant 0 : index
    %399 = vector.load %arg8[%c1_290, %c1_291, %c1_292, %c0_293, %c0_294] : memref<2x2x2x32x16xf32, #tpu.memory_space<vmem>>, vector<1x1x1x32x16xf32>
    %400 = vector.shape_cast %399 : vector<1x1x1x32x16xf32> to vector<32x16xf32>
    %cst_295 = arith.constant dense<0.000000e+00> : vector<8x16xf32>
    %401 = tpu.matmul %363, %400, %cst_295 {dimension_numbers = #tpu.dot_dimension_numbers<[1], [0], [0], [1], [0, 0, 1, 1], [], []>} : vector<8x32xf32>, vector<32x16xf32>, vector<8x16xf32> -> vector<8x16xf32>
    %c1_296 = arith.constant 1 : index
    %c1_297 = arith.constant 1 : index
    %c1_298 = arith.constant 1 : index
    %c0_299 = arith.constant 0 : index
    %c0_300 = arith.constant 0 : index
    %402 = vector.load %arg9[%c1_296, %c1_297, %c1_298, %c0_299, %c0_300] : memref<2x2x2x32x16xf32, #tpu.memory_space<vmem>>, vector<1x1x1x32x16xf32>
    %403 = vector.shape_cast %402 : vector<1x1x1x32x16xf32> to vector<32x16xf32>
    %cst_301 = arith.constant dense<0.000000e+00> : vector<8x16xf32>
    %404 = tpu.matmul %5, %403, %cst_301 {dimension_numbers = #tpu.dot_dimension_numbers<[1], [0], [0], [1], [0, 0, 1, 1], [], []>} : vector<8x32xf32>, vector<32x16xf32>, vector<8x16xf32> -> vector<8x16xf32>
    %c1_302 = arith.constant 1 : index
    %c1_303 = arith.constant 1 : index
    %c1_304 = arith.constant 1 : index
    %c0_305 = arith.constant 0 : index
    %c0_306 = arith.constant 0 : index
    %405 = vector.load %arg10[%c1_302, %c1_303, %c1_304, %c0_305, %c0_306] : memref<2x2x2x32x16xf32, #tpu.memory_space<vmem>>, vector<1x1x1x32x16xf32>
    %406 = vector.shape_cast %405 : vector<1x1x1x32x16xf32> to vector<32x16xf32>
    %cst_307 = arith.constant dense<0.000000e+00> : vector<8x16xf32>
    %407 = tpu.matmul %5, %406, %cst_307 {dimension_numbers = #tpu.dot_dimension_numbers<[1], [0], [0], [1], [0, 0, 1, 1], [], []>} : vector<8x32xf32>, vector<32x16xf32>, vector<8x16xf32> -> vector<8x16xf32>
    %408 = vector.shape_cast %401 : vector<8x16xf32> to vector<1x8x16xf32>
    %409 = vector.shape_cast %404 : vector<8x16xf32> to vector<1x8x16xf32>
    %410 = vector.shape_cast %407 : vector<8x16xf32> to vector<1x8x16xf32>
    "tpu.trace_start"() <{level = 10 : i32, message = "bqk,bsk->bqs"}> : () -> ()
    %cst_308 = arith.constant dense<0.000000e+00> : vector<1x8x8xf32>
    %411 = tpu.matmul %408, %409, %cst_308 {dimension_numbers = #tpu.dot_dimension_numbers<[2], [2], [1], [1], [0, 0, 0, 1, 1, 1], [0], [0]>} : vector<1x8x16xf32>, vector<1x8x16xf32>, vector<1x8x8xf32> -> vector<1x8x8xf32>
    "tpu.trace_stop"() : () -> ()
    %412 = arith.addf %411, %56 : vector<1x8x8xf32>
    %cst_309 = arith.constant dense<0xFF800000> : vector<1x8xf32>
    %413 = vector.multi_reduction <maximumf>, %412, %cst_309 [2] : vector<1x8x8xf32> to vector<1x8xf32>
    %414 = vector.shape_cast %413 : vector<1x8xf32> to vector<1x8x1xf32>
    %415 = vector.broadcast %414 : vector<1x8x1xf32> to vector<1x8x8xf32>
    %416 = arith.subf %412, %415 : vector<1x8x8xf32>
    %417 = math.exp %416 : vector<1x8x8xf32>
    %cst_310 = arith.constant dense<0.000000e+00> : vector<1x8xf32>
    %418 = vector.multi_reduction <add>, %417, %cst_310 [2] : vector<1x8x8xf32> to vector<1x8xf32>
    %419 = vector.shape_cast %418 : vector<1x8xf32> to vector<1x8x1xf32>
    %420 = tpu.reciprocal %419 {approx = true} : vector<1x8x1xf32> -> vector<1x8x1xf32>
    %421 = vector.broadcast %420 : vector<1x8x1xf32> to vector<1x8x8xf32>
    %422 = arith.mulf %417, %421 : vector<1x8x8xf32>
    "tpu.trace_start"() <{level = 10 : i32, message = "bqs,bsv->bqv"}> : () -> ()
    %cst_311 = arith.constant dense<0.000000e+00> : vector<1x8x16xf32>
    %423 = tpu.matmul %422, %410, %cst_311 {dimension_numbers = #tpu.dot_dimension_numbers<[2], [1], [1], [2], [0, 0, 0, 1, 1, 2], [0], [0]>} : vector<1x8x8xf32>, vector<1x8x16xf32>, vector<1x8x16xf32> -> vector<1x8x16xf32>
    "tpu.trace_stop"() : () -> ()
    %424 = vector.shape_cast %423 : vector<1x8x16xf32> to vector<8x16xf32>
    %c1_312 = arith.constant 1 : index
    %c1_313 = arith.constant 1 : index
    %c1_314 = arith.constant 1 : index
    %c0_315 = arith.constant 0 : index
    %c0_316 = arith.constant 0 : index
    %425 = vector.load %arg11[%c1_312, %c1_313, %c1_314, %c0_315, %c0_316] : memref<2x2x2x16x32xf32, #tpu.memory_space<vmem>>, vector<1x1x1x16x32xf32>
    %426 = vector.shape_cast %425 : vector<1x1x1x16x32xf32> to vector<16x32xf32>
    %cst_317 = arith.constant dense<0.000000e+00> : vector<8x32xf32>
    %427 = tpu.matmul %424, %426, %cst_317 {dimension_numbers = #tpu.dot_dimension_numbers<[1], [0], [0], [1], [0, 0, 1, 1], [], []>} : vector<8x16xf32>, vector<16x32xf32>, vector<8x32xf32> -> vector<8x32xf32>
    %428 = arith.addf %398, %427 : vector<8x32xf32>
    %429 = arith.addf %428, %363 : vector<8x32xf32>
    %cst_318 = arith.constant dense<0.000000e+00> : vector<8xf32>
    %430 = vector.multi_reduction <add>, %429, %cst_318 [1] : vector<8x32xf32> to vector<8xf32>
    %431 = vector.shape_cast %430 : vector<8xf32> to vector<8x1xf32>
    %cst_319 = arith.constant 3.200000e+01 : f32
    %432 = vector.broadcast %cst_319 : f32 to vector<8x1xf32>
    %433 = arith.divf %431, %432 : vector<8x1xf32>
    %434 = vector.broadcast %433 : vector<8x1xf32> to vector<8x32xf32>
    %435 = arith.subf %429, %434 : vector<8x32xf32>
    %436 = arith.mulf %435, %435 : vector<8x32xf32>
    %cst_320 = arith.constant dense<0.000000e+00> : vector<8xf32>
    %437 = vector.multi_reduction <add>, %436, %cst_320 [1] : vector<8x32xf32> to vector<8xf32>
    %438 = vector.shape_cast %437 : vector<8xf32> to vector<8x1xf32>
    %cst_321 = arith.constant 3.200000e+01 : f32
    %439 = vector.broadcast %cst_321 : f32 to vector<8x1xf32>
    %440 = arith.divf %438, %439 : vector<8x1xf32>
    %441 = vector.broadcast %433 : vector<8x1xf32> to vector<8x32xf32>
    %442 = arith.subf %429, %441 : vector<8x32xf32>
    %cst_322 = arith.constant 9.99999997E-7 : f32
    %443 = vector.broadcast %cst_322 : f32 to vector<8x1xf32>
    %444 = arith.addf %440, %443 : vector<8x1xf32>
    %445 = math.rsqrt %444 : vector<8x1xf32>
    %446 = vector.broadcast %445 : vector<8x1xf32> to vector<8x32xf32>
    %447 = arith.mulf %442, %446 : vector<8x32xf32>
    %448 = vector.broadcast %365 : vector<1x32xf32> to vector<8x32xf32>
    %449 = arith.mulf %447, %448 : vector<8x32xf32>
    %450 = vector.broadcast %367 : vector<1x32xf32> to vector<8x32xf32>
    %451 = arith.addf %449, %450 : vector<8x32xf32>
    %c1_323 = arith.constant 1 : index
    %c0_324 = arith.constant 0 : index
    %c0_325 = arith.constant 0 : index
    %452 = vector.load %arg12[%c1_323, %c0_324, %c0_325] : memref<2x32x64xf32, #tpu.memory_space<vmem>>, vector<1x32x64xf32>
    %453 = vector.shape_cast %452 : vector<1x32x64xf32> to vector<32x64xf32>
    %c1_326 = arith.constant 1 : index
    %c0_327 = arith.constant 0 : index
    %c0_328 = arith.constant 0 : index
    %454 = vector.load %arg14[%c1_326, %c0_327, %c0_328] : memref<2x1x64xf32, #tpu.memory_space<vmem>>, vector<1x1x64xf32>
    %455 = vector.shape_cast %454 : vector<1x1x64xf32> to vector<1x64xf32>
    %c1_329 = arith.constant 1 : index
    %c0_330 = arith.constant 0 : index
    %c0_331 = arith.constant 0 : index
    %456 = vector.load %arg13[%c1_329, %c0_330, %c0_331] : memref<2x64x32xf32, #tpu.memory_space<vmem>>, vector<1x64x32xf32>
    %457 = vector.shape_cast %456 : vector<1x64x32xf32> to vector<64x32xf32>
    %c1_332 = arith.constant 1 : index
    %c6_333 = arith.constant 6 : index
    %c0_334 = arith.constant 0 : index
    %458 = vector.load %arg15[%c1_332, %c6_333, %c0_334] : memref<2x8x32xf32, #tpu.memory_space<vmem>>, vector<1x1x32xf32>
    %459 = vector.shape_cast %458 : vector<1x1x32xf32> to vector<1x32xf32>
    %c1_335 = arith.constant 1 : index
    %c4_336 = arith.constant 4 : index
    %c0_337 = arith.constant 0 : index
    %460 = vector.load %arg15[%c1_335, %c4_336, %c0_337] : memref<2x8x32xf32, #tpu.memory_space<vmem>>, vector<1x1x32xf32>
    %461 = vector.shape_cast %460 : vector<1x1x32xf32> to vector<1x32xf32>
    %c1_338 = arith.constant 1 : index
    %c5_339 = arith.constant 5 : index
    %c0_340 = arith.constant 0 : index
    %462 = vector.load %arg15[%c1_338, %c5_339, %c0_340] : memref<2x8x32xf32, #tpu.memory_space<vmem>>, vector<1x1x32xf32>
    %463 = vector.shape_cast %462 : vector<1x1x32xf32> to vector<1x32xf32>
    %cst_341 = arith.constant dense<0.000000e+00> : vector<8x64xf32>
    %464 = tpu.matmul %451, %453, %cst_341 {dimension_numbers = #tpu.dot_dimension_numbers<[1], [0], [0], [1], [0, 0, 1, 1], [], []>} : vector<8x32xf32>, vector<32x64xf32>, vector<8x64xf32> -> vector<8x64xf32>
    %465 = vector.broadcast %455 : vector<1x64xf32> to vector<8x64xf32>
    %466 = arith.addf %464, %465 : vector<8x64xf32>
    %cst_342 = arith.constant 0.000000e+00 : f32
    %467 = vector.broadcast %cst_342 : f32 to vector<8x64xf32>
    %468 = arith.maximumf %466, %467 : vector<8x64xf32>
    %cst_343 = arith.constant dense<0.000000e+00> : vector<8x32xf32>
    %469 = tpu.matmul %468, %457, %cst_343 {dimension_numbers = #tpu.dot_dimension_numbers<[1], [0], [0], [1], [0, 0, 1, 1], [], []>} : vector<8x64xf32>, vector<64x32xf32>, vector<8x32xf32> -> vector<8x32xf32>
    %470 = vector.broadcast %459 : vector<1x32xf32> to vector<8x32xf32>
    %471 = arith.addf %469, %470 : vector<8x32xf32>
    %472 = arith.addf %471, %451 : vector<8x32xf32>
    %cst_344 = arith.constant dense<0.000000e+00> : vector<8xf32>
    %473 = vector.multi_reduction <add>, %472, %cst_344 [1] : vector<8x32xf32> to vector<8xf32>
    %474 = vector.shape_cast %473 : vector<8xf32> to vector<8x1xf32>
    %cst_345 = arith.constant 3.200000e+01 : f32
    %475 = vector.broadcast %cst_345 : f32 to vector<8x1xf32>
    %476 = arith.divf %474, %475 : vector<8x1xf32>
    %477 = vector.broadcast %476 : vector<8x1xf32> to vector<8x32xf32>
    %478 = arith.subf %472, %477 : vector<8x32xf32>
    %479 = arith.mulf %478, %478 : vector<8x32xf32>
    %cst_346 = arith.constant dense<0.000000e+00> : vector<8xf32>
    %480 = vector.multi_reduction <add>, %479, %cst_346 [1] : vector<8x32xf32> to vector<8xf32>
    %481 = vector.shape_cast %480 : vector<8xf32> to vector<8x1xf32>
    %cst_347 = arith.constant 3.200000e+01 : f32
    %482 = vector.broadcast %cst_347 : f32 to vector<8x1xf32>
    %483 = arith.divf %481, %482 : vector<8x1xf32>
    %484 = vector.broadcast %476 : vector<8x1xf32> to vector<8x32xf32>
    %485 = arith.subf %472, %484 : vector<8x32xf32>
    %cst_348 = arith.constant 9.99999997E-7 : f32
    %486 = vector.broadcast %cst_348 : f32 to vector<8x1xf32>
    %487 = arith.addf %483, %486 : vector<8x1xf32>
    %488 = math.rsqrt %487 : vector<8x1xf32>
    %489 = vector.broadcast %488 : vector<8x1xf32> to vector<8x32xf32>
    %490 = arith.mulf %485, %489 : vector<8x32xf32>
    %491 = vector.broadcast %461 : vector<1x32xf32> to vector<8x32xf32>
    %492 = arith.mulf %490, %491 : vector<8x32xf32>
    %493 = vector.broadcast %463 : vector<1x32xf32> to vector<8x32xf32>
    %494 = arith.addf %492, %493 : vector<8x32xf32>
    %495 = vector.shape_cast %494 : vector<8x32xf32> to vector<1x8x32xf32>
    %c0_349 = arith.constant 0 : index
    %c0_350 = arith.constant 0 : index
    %c0_351 = arith.constant 0 : index
    %496 = vector.load %arg16[%c0_349, %c0_350, %c0_351] : memref<1x8x32xf32, #tpu.memory_space<vmem>>, vector<1x8x32xf32>
    tpu.vector_store %arg16[%c0_349, %c0_350, %c0_351], %495 {strides = array<i32>} : memref<1x8x32xf32, #tpu.memory_space<vmem>>, vector<1x8x32xf32>,
    return
  }
  func.func @transform_0(%arg0: i32) -> (i32, i32, i32) {
    %c0_i32 = arith.constant 0 : i32
    %c0_i32_0 = arith.constant 0 : i32
    %c0_i32_1 = arith.constant 0 : i32
    return %arg0, %c0_i32, %c0_i32_0 : i32, i32, i32
  }
  func.func @transform_1(%arg0: i32) -> (i32, i32, i32) {
    %c0_i32 = arith.constant 0 : i32
    %c0_i32_0 = arith.constant 0 : i32
    %c0_i32_1 = arith.constant 0 : i32
    return %arg0, %c0_i32, %c0_i32_0 : i32, i32, i32
  }
  func.func @transform_2(%arg0: i32) -> (i32, i32, i32) {
    %c0_i32 = arith.constant 0 : i32
    %c0_i32_0 = arith.constant 0 : i32
    %c0_i32_1 = arith.constant 0 : i32
    return %arg0, %c0_i32, %c0_i32_0 : i32, i32, i32
  }
  func.func @transform_3(%arg0: i32) -> (i32, i32, i32) {
    %c0_i32 = arith.constant 0 : i32
    %c0_i32_0 = arith.constant 0 : i32
    %c0_i32_1 = arith.constant 0 : i32
    return %arg0, %c0_i32, %c0_i32_0 : i32, i32, i32
  }
  func.func @transform_4(%arg0: i32) -> (i32, i32, i32) {
    %c0_i32 = arith.constant 0 : i32
    %c0_i32_0 = arith.constant 0 : i32
    %c0_i32_1 = arith.constant 0 : i32
    return %arg0, %c0_i32, %c0_i32_0 : i32, i32, i32
  }
  func.func @transform_5(%arg0: i32) -> (i32, i32) {
    %c0_i32 = arith.constant 0 : i32
    %c0_i32_0 = arith.constant 0 : i32
    %c0_i32_1 = arith.constant 0 : i32
    return %c0_i32, %c0_i32_0 : i32, i32
  }
  func.func @transform_6(%arg0: i32) -> (i32, i32) {
    %c0_i32 = arith.constant 0 : i32
    %c0_i32_0 = arith.constant 0 : i32
    %c0_i32_1 = arith.constant 0 : i32
    return %c0_i32, %c0_i32_0 : i32, i32
  }
  func.func @transform_7(%arg0: i32) -> (i32, i32, i32, i32, i32) {
    %c0_i32 = arith.constant 0 : i32
    %c0_i32_0 = arith.constant 0 : i32
    %c0_i32_1 = arith.constant 0 : i32
    %c0_i32_2 = arith.constant 0 : i32
    %c0_i32_3 = arith.constant 0 : i32
    %c0_i32_4 = arith.constant 0 : i32
    return %c0_i32, %c0_i32_0, %c0_i32_1, %c0_i32_2, %c0_i32_3 : i32, i32, i32, i32, i32
  }
  func.func @transform_8(%arg0: i32) -> (i32, i32, i32, i32, i32) {
    %c0_i32 = arith.constant 0 : i32
    %c0_i32_0 = arith.constant 0 : i32
    %c0_i32_1 = arith.constant 0 : i32
    %c0_i32_2 = arith.constant 0 : i32
    %c0_i32_3 = arith.constant 0 : i32
    %c0_i32_4 = arith.constant 0 : i32
    return %c0_i32, %c0_i32_0, %c0_i32_1, %c0_i32_2, %c0_i32_3 : i32, i32, i32, i32, i32
  }
  func.func @transform_9(%arg0: i32) -> (i32, i32, i32, i32, i32) {
    %c0_i32 = arith.constant 0 : i32
    %c0_i32_0 = arith.constant 0 : i32
    %c0_i32_1 = arith.constant 0 : i32
    %c0_i32_2 = arith.constant 0 : i32
    %c0_i32_3 = arith.constant 0 : i32
    %c0_i32_4 = arith.constant 0 : i32
    return %c0_i32, %c0_i32_0, %c0_i32_1, %c0_i32_2, %c0_i32_3 : i32, i32, i32, i32, i32
  }
  func.func @transform_10(%arg0: i32) -> (i32, i32, i32, i32, i32) {
    %c0_i32 = arith.constant 0 : i32
    %c0_i32_0 = arith.constant 0 : i32
    %c0_i32_1 = arith.constant 0 : i32
    %c0_i32_2 = arith.constant 0 : i32
    %c0_i32_3 = arith.constant 0 : i32
    %c0_i32_4 = arith.constant 0 : i32
    return %c0_i32, %c0_i32_0, %c0_i32_1, %c0_i32_2, %c0_i32_3 : i32, i32, i32, i32, i32
  }
  func.func @transform_11(%arg0: i32) -> (i32, i32, i32) {
    %c0_i32 = arith.constant 0 : i32
    %c0_i32_0 = arith.constant 0 : i32
    %c0_i32_1 = arith.constant 0 : i32
    %c0_i32_2 = arith.constant 0 : i32
    return %c0_i32, %c0_i32_0, %c0_i32_1 : i32, i32, i32
  }
  func.func @transform_12(%arg0: i32) -> (i32, i32, i32) {
    %c0_i32 = arith.constant 0 : i32
    %c0_i32_0 = arith.constant 0 : i32
    %c0_i32_1 = arith.constant 0 : i32
    %c0_i32_2 = arith.constant 0 : i32
    return %c0_i32, %c0_i32_0, %c0_i32_1 : i32, i32, i32
  }
  func.func @transform_13(%arg0: i32) -> (i32, i32, i32) {
    %c0_i32 = arith.constant 0 : i32
    %c0_i32_0 = arith.constant 0 : i32
    %c0_i32_1 = arith.constant 0 : i32
    %c0_i32_2 = arith.constant 0 : i32
    return %c0_i32, %c0_i32_0, %c0_i32_1 : i32, i32, i32
  }
  func.func @transform_14(%arg0: i32) -> (i32, i32, i32) {
    %c0_i32 = arith.constant 0 : i32
    %c0_i32_0 = arith.constant 0 : i32
    %c0_i32_1 = arith.constant 0 : i32
    %c0_i32_2 = arith.constant 0 : i32
    return %c0_i32, %c0_i32_0, %c0_i32_1 : i32, i32, i32
  }
  func.func @transform_15(%arg0: i32) -> (i32, i32, i32) {
    %c0_i32 = arith.constant 0 : i32
    %c0_i32_0 = arith.constant 0 : i32
    %c0_i32_1 = arith.constant 0 : i32
    return %arg0, %c0_i32, %c0_i32_0 : i32, i32, i32
  }
}

</mosaic_0001>

<bundles_post_ra>
// kernel: decoder_forward.1
= control target key start
LH: loop header
LB: loop body
LE: loop exit
PB: predicated region body
PF: predicated region fallthrough
CT: control target
= control target key end

     0   :  { %s7315_s0 = inlined_call_operand.vmem [shape: f32[2,8,2], index: 0, kind: input, shape index: {}]   ;;  %s7316_s1 = inlined_call_operand.vmem [shape: f32[2,8,32], index: 1, kind: input, shape index: {}]   ;;  %s7317_s2 = inlined_call_operand.vmem [shape: f32[2,8,32], index: 2, kind: input, shape index: {}]   ;;  %s7318_s3 = inlined_call_operand.vmem [shape: f32[2,8,8], index: 3, kind: input, shape index: {}]   ;;  %s7319_s4 = inlined_call_operand.vmem [shape: f32[2,1,8], index: 4, kind: input, shape index: {}]   ;;  %s7320_s5 = inlined_call_operand.vmem [shape: f32[34,32], index: 5, kind: input, shape index: {}]   ;;  %s7321_s6 = inlined_call_operand.vmem [shape: f32[4,32], index: 6, kind: input, shape index: {}]   ;;  %s7322_s7 = inlined_call_operand.vmem [shape: f32[2,2,2,32,16], index: 7, kind: input, shape index: {}]   ;;  %s7323_s8 = inlined_call_operand.vmem [shape: f32[2,2,2,32,16], index: 8, kind: input, shape index: {}]   ;;  %s7324_s9 = inlined_call_operand.vmem [shape: f32[2,2,2,32,16], index: 9, kind: input, shape index: {}]   ;;  %s7325_s10 = inlined_call_operand.vmem [shape: f32[2,2,2,16,32], index: 10, kind: input, shape index: {}]   ;;  %s7326_s11 = inlined_call_operand.vmem [shape: f32[2,32,64], index: 11, kind: input, shape index: {}]   ;;  %s7327_s12 = inlined_call_operand.vmem [shape: f32[2,64,32], index: 12, kind: input, shape index: {}]   ;;  %s7328_s13 = inlined_call_operand.vmem [shape: f32[2,1,64], index: 13, kind: input, shape index: {}]   ;;  %s7329_s14 = inlined_call_operand.vmem [shape: f32[2,8,32], index: 14, kind: input, shape index: {}]   ;;  %s7330_s15 = inlined_call_operand.hbm [shape: f32[2,8,32], index: 15, kind: output, shape index: {}]  }
   0x1   :  { %7334 = sst [smem:[#allocation8_spill]] %s7315_s0 }
   0x2   :  { %7335 = sst [smem:[#allocation9_spill]] %s7316_s1 }
   0x3   :  { %7336 = sst [smem:[#allocation10_spill]] %s7318_s3 }
   0x4   :  { %7337 = sst [smem:[#allocation11_spill]] %s7320_s5 }
   0x5   :  { %20 = vsyncpa [#allocation3], 0 }
   0x6   :  { %22 = vsyncpa [#allocation3 + $0x1], 0  ;;  %s6373_s18 = smov 0   ;;  %s6375_s19 = smov 0  }
   0x7   :  { %s6377_s20 = smov 0   ;;  %s6379_s21 = smov 0  }
   0x8 LB: > { %7338 = sst [smem:[#allocation5_spill]] %s6281_s20  ;;  %s6394_s22 = sadd.s32 4294967295, %s6285_s21   ;;  %s6285_s21 = sphi %s6379_s21, %s7347_s21   ;;  %s6281_s20 = sphi %s6377_s20, %s7349_s20   ;;  %s6277_s19 = sphi %s6375_s19, %s7351_s19   ;;  %s6273_s18 = sphi %s6373_s18, %s7350_s18  }
   0x9   : > { %s5027_s23 = sadd.s32 4294967294, %s6285_s21   ;;  %s6398_s24 = sadd.s32 1, %s6285_s21  }
   0xa   : > { %7339 = sst [smem:[#allocation6_spill]] %s6398_s24  ;;  %s375_s25 = sadd.s32 1, %s6281_s20 }
   0xb   : > { %s372_s26 = ssub.s32 %s6285_s21, %s6398_s24  ;;  %p385_p0 = scmp.ne.s32.totalorder %s6281_s20, %s6277_s19 }
   0xc   : > { %p373_p1 = scmp.eq.s32.totalorder %s372_s26, 0  ;;  %p386_p2 = scmp.eq.s32.totalorder %s6394_s22, 1 }
   0xd   : > { %p391_p3 = scmp.ne.s32.totalorder %s6277_s19, %s6273_s18  ;;  %p392_p4 = scmp.eq.s32.totalorder %s5027_s23, 1 }
   0xe   : > { %s6409_s27 = scalar_select %p373_p1, %s6281_s20, %s375_s25  }
   0xf   : > { %p6411_p5 = por %p386_p2, %p385_p0  ;;  %p6415_p6 = por %p392_p4, %p391_p3 }
  0x10   : > { %7340 = sst [smem:[#allocation7_spill]] %s6409_s27  ;;  %p5030_p7 = scmp.ge.s32.totalorder %s6285_s21, 1 }
  0x11   : > { %p474_p8 = scmp.lt.s32.totalorder %s6285_s21, 3 }
  0x13   : > { %p475_p9 = pnand %p5030_p7, %p474_p8 }
  0x14   : > { %p536_p10 = scmp.lt.s32.totalorder (!%p475_p9), %s6394_s22, 1  ;;  %v6287_v0 = vmov (!%p475_p9), 0   ;;  %s7343_s0 = sld [smem:[#allocation8_spill]] (!%p475_p9)  ;;  %v6288_v4 = vmov (!%p475_p9), 1   ;;  %v6289_v6 = vmov (!%p475_p9), 0.0|0.0   ;;  %vm6290_vm0 = vmmov (!%p475_p9), 0  }
  0x15   : > { %478 = sbr.rel (%p475_p9) target bundleno = 11146 (0x2b8a), region = 80  ;;  %6174 = vset.pattern.permute.xlu0 (!%p475_p9), %v6287_v0  ;;  %s7344_s5 = sld [smem:[#allocation11_spill]] (!%p475_p9)  ;;  %5920 = vmatprep.subr.bf16.mxu0 (!%p475_p9), %v6289_v6  ;;  %v6291_v10 = vmov (!%p475_p9), 0.0   ;;  %v572_v11 = vlaneseq (!%p475_p9)  ;;  %v5036_v22 = vld [vmem:[%s7321_s6] ss:$0 sm:$0xff] (!%p475_p9)  ;;  %vm597_vm1 = vcmask (!%p475_p9), 261120  }
  0x16   : > { %5926 = vmatprep.subr.bf16.mxu1 (!%p475_p9), %v6289_v6  ;;  %5457 = vmatprep.mubr.msk.f32.mxu0 (!%p475_p9), %vm6290_vm0, %v6291_v10  ;;  %s7345_s1 = sld [smem:[#allocation9_spill]] (!%p475_p9)  ;;  %v5037_v26 = vld [vmem:[%s7321_s6 + $0x1] ss:$0 sm:$0xff] (!%p475_p9)  ;;  %v707_v39 = vld [vmem:[%s7322_s7 + $0x8] sm:$0xff] (!%p475_p9)  ;;  %v708_v44 = vld [vmem:[%s7322_s7 + $0x10] sm:$0xff] (!%p475_p9)  ;;  %vm931_vm2 = vcmask (!%p475_p9), 130048  }
  0x17   : > { %5468 = vmatprep.mubr.msk.f32.mxu1 (!%p475_p9), %vm6290_vm0, %v6291_v10  ;;  %v573_v12 = vshrl.u32 (!%p475_p9), %v572_v11, 7  ;;  %v706_v38 = vld [vmem:[%s7322_s7] sm:$0xff] (!%p475_p9)  ;;  %v784_v42 = vld [vmem:[%s7323_s8 + $0x8] sm:$0xff] (!%p475_p9)  ;;  %v709_v45 = vld [vmem:[%s7322_s7 + $0x18] sm:$0xff] (!%p475_p9)  ;;  %s7346_s3 = sld [smem:[#allocation10_spill]] (!%p475_p9)  ;;  %vm1008_vm3 = vcmask (!%p475_p9), 64512  }
  0x18   : > { %v5927_v40 = vpack.c.bf16 (!%p475_p9), %v707_v39, %v706_v38  ;;  %v783_v41 = vld [vmem:[%s7323_s8] sm:$0xff] (!%p475_p9)  ;;  %v5930_v46 = vpack.c.bf16 (!%p475_p9), %v709_v45, %v708_v44  ;;  %v785_v47 = vld [vmem:[%s7323_s8 + $0x10] sm:$0xff] (!%p475_p9)  ;;  %v786_v48 = vld [vmem:[%s7323_s8 + $0x18] sm:$0xff] (!%p475_p9)  ;;  %vm2707_vm4 = vcmask (!%p475_p9), 523264   ;;  %s5237_s26 = sshll.u32 (!%p475_p9), %s6394_s22, 7 }
  0x19   : > { %v574_v13 = vsub.s32 (!%p475_p9), 0, %v573_v12  ;;  %v583_v14 = vsub.s32 (!%p475_p9), 1, %v573_v12  ;;  %v5933_v43 = vpack.c.bf16 (!%p475_p9), %v784_v42, %v783_v41  ;;  %v5936_v49 = vpack.c.bf16 (!%p475_p9), %v786_v48, %v785_v47  ;;  %v5039_v54 = vld [vmem:[%s7321_s6 + $0x2] ss:$0 sm:$0xff] (!%p475_p9)  ;;  %v858_v57 = vld [vmem:[%s7324_s9 + $0x8] sm:$0xff] (!%p475_p9)  ;;  %v859_v62 = vld [vmem:[%s7324_s9 + $0x10] sm:$0xff] (!%p475_p9) }
  0x1a   : > { %5928 = vmatpush3.bf16.msra.mxu1 (!%p475_p9), %v5927_v40  ;;  %v857_v56 = vld [vmem:[%s7324_s9] sm:$0xff] (!%p475_p9)  ;;  %v860_v63 = vld [vmem:[%s7324_s9 + $0x18] sm:$0xff] (!%p475_p9)  ;;  %v5060_v39 = vld [vmem:[%s7324_s9 + $0x30] sm:$0xff] (!%p475_p9) }
  0x1b   : > { %v558_v2 = vld [vmem:[%s7344_s5] sm:$0xff] (!%p475_p9)  ;;  %v559_v3 = vld [vmem:[%s7344_s5 + $0x8] sm:$0xff] (!%p475_p9)  ;;  %v560_v7 = vld [vmem:[%s7344_s5 + $0x10] sm:$0xff] (!%p475_p9)  ;;  %5929 = vmatprep.subr.bf16.mxu1 (!%p475_p9), %v6289_v6  ;;  %v5939_v60 = vpack.c.bf16 (!%p475_p9), %v858_v57, %v857_v56  ;;  %v5942_v0 = vpack.c.bf16 (!%p475_p9), %v860_v63, %v859_v62 }
  0x1c   : > { %s6423_s30 = scalar_select %p536_p10, %s6394_s22, 1  ;;  %v5921_v5 = vpack.c.bf16 %v559_v3, %v558_v2  ;;  %v561_v8 = vld [vmem:[%s7344_s5 + $0x18] sm:$0xff]  ;;  %v562_v15 = vld [vmem:[%s7344_s5 + $0x20] sm:$0x3]  ;;  %v5040_v58 = vld [vmem:[%s7321_s6 + $0x3] ss:$0 sm:$0xff] }
  0x1d   : > { %v5924_v9 = vpack.c.bf16 %v561_v8, %v560_v7  ;;  %v575_v17 = vrot.slane %v562_v15, %v574_v13  ;;  %v584_v18 = vrot.slane %v562_v15, %v583_v14  ;;  %v5054_v2 = vld [vmem:[%s7323_s8 + $0x28] sm:$0xff]  ;;  %v5061_v40 = vld [vmem:[%s7324_s9 + $0x38] sm:$0xff]  ;;  %v5066_v57 = vld [vmem:[%s7325_s10 + $0x10] sm:$0xff]  ;;  %s6292_s22 = smov [#allocation2]  }
  0x1e   : > { %s6426_s16 = sshll.u32 %s6423_s30, 3  ;;  %5922 = vmatpush3.bf16.msra.mxu0 %v5921_v5  ;;  %5931 = vmatpush3.bf16.msra.mxu1 %v5930_v46  ;;  %v5056_v5 = vld [vmem:[%s7323_s8 + $0x38] sm:$0xff]  ;;  %v5960_v41 = vpack.c.bf16 %v5061_v40, %v5060_v39  ;;  %v1093_v62 = vld [vmem:[%s7325_s10] sm:$0xff]  ;;  %v1094_v63 = vld [vmem:[%s7325_s10 + $0x8] sm:$0xff]  ;;  %s554_s27 = scalar_lea.vmem %s7319_s4, %s6423_s30 }
  0x1f   : > { %s539_s25 = scalar_lea.vmem %s7343_s0, %s6426_s16  ;;  %5923 = vmatprep.subr.bf16.mxu0 %v6289_v6  ;;  %5938 = vmatprep.subr.bf16.mxu1 %v6289_v6  ;;  %s551_s23 = scalar_lea.vmem %s7346_s3, %s6426_s16  ;;  %v5083_v39 = vld [vmem:[%s7324_s9 + $0x48] sm:$0xff]  ;;  %v5071_v40 = vld [vmem:[%s7329_s14 + $0x1] ss:$0 sm:$0xff] }
  0x20   : > { %v556_v1 = vld [vmem:[%s539_s25] sm:$0xff]  ;;  %s543_s25 = scalar_lea.vmem %s7345_s1, %s6426_s16  ;;  %s6655_s3 = scalar_lea.vmem %s7317_s2, %s6426_s16 }
  0x21   : > { %569 = vperm.xlu0 %6174, %v556_v1   ;;  %v555_v28 = vld [vmem:[%s543_s25] sm:$0xff]  ;;  %s533_s30 = sand.u32 1, %s6277_s19  }
  0x22   : > { %5925 = vmatpush3.bf16.msra.mxu0 %v5924_v9  ;;  %s5031_s5 = sshll.u32 %s533_s30, 3 }
  0x23   : > { %5932 = vmatprep.subr.bf16.mxu0 %v6289_v6  ;;  %s535_s16 = scalar_lea.vmem [#allocation2], %s5031_s5  ;;  %s6227_s5 = sshll.u32 %s6292_s22, 4  ;;  %s6228_s5 = int_to_ptr.vmem [resolvable:$false] %s6227_s5 }
  0x24   : > { %s4923_s17 = sshll.u32 %s535_s16, 4  ;;  %s6229_s20 = scalar_lea.vmem %s6228_s5, 256  ;;  %s7274_s17 = int_to_ptr.vmem [resolvable:$true] %s4923_s17 }
  0x25   : > { %6175 = vset.pattern.permute.xlu0 %v6288_v4  ;;  %v5055_v4 = vld [vmem:[%s7323_s8 + $0x30] sm:$0xff]  ;;  %s6223_s25 = scalar_lea.vmem %s7274_s17, 128  ;;  %p6230_p0 = scmp.lt.s32.totalorder %s7274_s17, %s6228_s5 }
  0x26   : > { %578 = vperm.xlu0 %6175, %v556_v1   ;;  %v5053_v1 = vld [vmem:[%s7323_s8 + $0x20] sm:$0xff]  ;;  %v5954_v7 = vpack.c.bf16 %v5056_v5, %v5055_v4  ;;  %p6224_p11 = scmp.ne.s32.totalorder %s7274_s17, %s6223_s25  ;;  %p6231_p1 = scmp.lt.s32.totalorder %s6229_s20, %s6223_s25 }
  0x27   : > { %v5951_v3 = vpack.c.bf16 %v5054_v2, %v5053_v1  ;;  %v5966_v1 = vpack.c.bf16 %v1094_v63, %v1093_v62  ;;  %v6738_v62 = vld [vmem:[%s554_s27] ss:$0 sm:$0xff]  ;;  %s7272_s27 = scalar_lea.hbm %s7330_s15, %s5237_s26 }
  0x28   : > { %p6225_p12 = pnand %p6224_p11, %p6411_p5  ;;  %p6232_p2 = por %p6231_p1, %p6230_p0 }
  0x2a   : > { %p6226_p13 = pneg %p6225_p12 }
  0x2c   : > { %p6233_p3 = pnand %p6232_p2, %p6226_p13 }
  0xa0   : > { %v570_v16 = vpop.permute.xlu0 %569 }
  0xa1   : > { %v576_v20 = vmul.f32 %v575_v17, %v570_v16  ;;  %v6562_v17 = vld [vmem:[%s551_s23] sm:$0xff] }
  0xa5   : > { %v579_v19 = vpop.permute.xlu0 %578 }
  0xa6   : > { %v585_v21 = vmul.f32 %v584_v18, %v579_v19 }
  0xa8   : > { %v586_v23 = vadd.f32 %v585_v21, %v576_v20 }
  0xaa   : > { %v591_v24 = vadd.f32 %v5036_v22, %v586_v23 }
  0xac   : > { %v592_v25 = vmax.f32 %v591_v24, 0.0 }
  0xae   : > { %5458 = vmatmul.mubr.msk.f32.vlgmr.msra.gmra.mrb[0].mxu0 %vm597_vm1, %v592_v25 }
  0xaf   : > { %5479 = vmatprep.mubr.msk.f32.mxu0 %vm6290_vm0, %v6291_v10  ;;  %5934 = vmatpush3.bf16.msra.mxu0 %v5933_v43 }
  0xb0   : > { %5935 = vmatprep.subr.bf16.mxu0 %v6289_v6 }
  0xb3   : > { %5937 = vmatpush3.bf16.msra.mxu0 %v5936_v49 }
  0xb4   : > { %5493 = vmatprep.subr.mxu0 %v6291_v10 }
 0x181   : > { %v667_v27 = vpop.f32.mrb[0].mxu0 }
 0x182   : > { %v668_v29 = vadd.f32 %v5037_v26, %v667_v27  ;;  %v5459_v30 = vpop.f32.mrb[1].mxu0 }
 0x184   : > { %v671_v31 = vadd.f32 %v668_v29, %v555_v28  ;;  %v5048_v28 = vld [vmem:[%s7322_s7 + $0x20] sm:$0xff]  ;;  %v5049_v29 = vld [vmem:[%s7322_s7 + $0x28] sm:$0xff] }
 0x186   : > { %v672_v32 = vsel %vm597_vm1, %v671_v31, 0.0 }
 0x187   : > { %673 = vadd.xlane.f32.xlu1 %v672_v32 }
 0x214   : > { %v674_v33 = vpop.xlane.xlu1 %673 }
 0x215   : > { %v676_v34 = vmul.f32 0.03125, %v674_v33  ;;  %v5050_v33 = vld [vmem:[%s7322_s7 + $0x30] sm:$0xff] }
 0x217   : > { %v677_v35 = vsub.f32 %v671_v31, %v676_v34  ;;  %v5945_v31 = vpack.c.bf16 %v5049_v29, %v5048_v28  ;;  %v5051_v34 = vld [vmem:[%s7322_s7 + $0x38] sm:$0xff]  ;;  %v6665_v28 = vld [vmem:[%s6655_s3] sm:$0xff]  ;;  %v5074_v29 = vld [vmem:[%s7322_s7 + $0x50] sm:$0xff] }
 0x219   : > { %v678_v36 = vmul.f32 %v677_v35, %v677_v35 }
 0x21b   : > { %v679_v37 = vsel %vm597_vm1, %v678_v36, 0.0  ;;  %v5058_v36 = vld [vmem:[%s7324_s9 + $0x20] sm:$0xff] }
 0x21c   : > { %680 = vadd.xlane.f32.xlu1 %v679_v37  ;;  %v5059_v37 = vld [vmem:[%s7324_s9 + $0x28] sm:$0xff] }
 0x21d   : > { %v5957_v38 = vpack.c.bf16 %v5059_v37, %v5058_v36  ;;  %v5070_v36 = vld [vmem:[%s7329_s14] ss:$0 sm:$0xff] }
 0x2a9   : > { %v681_v50 = vpop.xlane.xlu1 %680 }
 0x2aa   : > { %v682_v51 = vmul.f32 0.03125, %v681_v50 }
 0x2ac   : > { %v683_v52 = vadd.f32 1e-06, %v682_v51 }
 0x2ae   : > { %6176 = vrsqrt.f32 %v683_v52 }
 0x2b8   : > { %v6177_v53 = vpop.eup %6176 }
 0x2b9   : > { %v685_v55 = vmul.f32 %v6177_v53, %v677_v35  ;;  %v5948_v35 = vpack.c.bf16 %v5051_v34, %v5050_v33 }
 0x2bb   : > { %v690_v59 = vmul.f32 %v5039_v54, %v685_v55 }
 0x2bd   : > { %v6510_v61 = vadd.f32 %v5040_v58, %v690_v59  ;;  %v5067_v58 = vld [vmem:[%s7325_s10 + $0x18] sm:$0xff] }
 0x2be   : > { %v5963_v59 = vpack.c.bf16 %v5067_v58, %v5066_v57 }
 0x2bf   : > { %5469 = vmatmul.mubr.msk.f32.vlgmr.msra.gmra.mrb[0].mxu1 %vm597_vm1, %v6510_v61  ;;  %5480 = vmatmul.mubr.msk.f32.vlgmr.msra.gmra.mrb[2].mxu0 %vm597_vm1, %v6510_v61 }
 0x2c0   : > { %5940 = vmatpush3.bf16.msra.mxu1 %v5939_v60  ;;  %5490 = vmatprep.mubr.msk.f32.mxu1 %vm6290_vm0, %v6291_v10 }
 0x2c1   : > { %5941 = vmatprep.subr.bf16.mxu1 %v6289_v6  ;;  %5495 = vmatprep.mubr.msk.f32.mxu0 %vm6290_vm0, %v6291_v10 }
 0x2c4   : > { %5943 = vmatpush3.bf16.msra.mxu1 %v5942_v0 }
 0x2c5   : > { %5950 = vmatprep.subr.bf16.mxu1 %v6289_v6 }
 0x2c7   : > { %5491 = vmatmul.mubr.msk.f32.vlgmr.msra.gmra.mrb[2].mxu1 %vm597_vm1, %v6510_v61 }
 0x2c8   : > { %5952 = vmatpush3.bf16.msra.mxu1 %v5951_v3  ;;  %5522 = vmatprep.mubr.msk.f32.mxu1 %vm6290_vm0, %v6291_v10 }
 0x2c9   : > { %5953 = vmatprep.subr.bf16.mxu1 %v6289_v6 }
 0x2cc   : > { %5955 = vmatpush3.bf16.msra.mxu1 %v5954_v7 }
 0x2cd   : > { %5536 = vmatprep.subr.mxu1 %v6291_v10 }
 0x2cf   : > { %5523 = vmatmul.mubr.msk.f32.vlgmr.msra.gmra.mrb[4].mxu1 %vm597_vm1, %v6510_v61 }
 0x2d0   : > { %5538 = vmatprep.mubr.msk.f32.mxu1 %vm6290_vm0, %v6291_v10 }
 0x392   : > { %v779_v8 = vpop.f32.mrb[0].mxu1  ;;  %v853_v9 = vpop.f32.mrb[2].mxu0 }
 0x393   : > { %v5470_v11 = vpop.f32.mrb[1].mxu1  ;;  %v5481_v12 = vpop.f32.mrb[3].mxu0  ;;  %5494 = vmatpush3.xpose.msk.msra.mxu0 %vm931_vm2, %v853_v9 }
 0x394   : > { %5498 = vmatprep.subr.mxu0 %v6291_v10 }
 0x396   : > { %5496 = vmatmul.mubr.msk.f32.vlgmr.msra.gmra.mrb[4].mxu0 %vm931_vm2, %v779_v8 }
 0x397   : > { %5500 = vmatprep.mubr.msk.f32.mxu0 %vm6290_vm0, %v6291_v10 }
 0x39a   : > { %v927_v13 = vpop.f32.mrb[2].mxu1 }
 0x39b   : > { %v5492_v14 = vpop.f32.mrb[3].mxu1  ;;  %5499 = vmatpush3.msra.mxu0 %v927_v13 }
 0x39c   : > { %5944 = vmatprep.subr.bf16.mxu0 %v6289_v6 }
 0x3a2   : > { %v1241_v15 = vpop.f32.mrb[4].mxu1 }
 0x3a3   : > { %v5524_v16 = vpop.f32.mrb[5].mxu1  ;;  %5537 = vmatpush3.xpose.msk.msra.mxu1 %vm931_vm2, %v1241_v15 }
 0x3a4   : > { %5541 = vmatprep.subr.mxu1 %v6291_v10 }
 0x469   : > { %v1004_v18 = vpop.f32.mrb[4].mxu0 }
 0x46a   : > { %v1005_v19 = vadd.f32 %v1004_v18, %v6562_v17  ;;  %v5497_v20 = vpop.f32.mrb[5].mxu0 }
 0x46b   : > { %v5077_v20 = vld [vmem:[%s7323_s8 + $0x40] sm:$0xff] }
 0x46c   : > { %v1009_v21 = vsel %vm1008_vm3, %v1005_v19, -inf }
 0x46d   : > { %1010 = vmax.xlane.f32.xlu1 %v1009_v21  ;;  %v5078_v21 = vld [vmem:[%s7323_s8 + $0x48] sm:$0xff] }
 0x4fa   : > { %v1011_v22 = vpop.xlane.xlu1 %1010 }
 0x4fb   : > { %v1012_v23 = vsub.f32 %v1005_v19, %v1011_v22  ;;  %v5975_v22 = vpack.c.bf16 %v5078_v21, %v5077_v20 }
 0x4fd   : > { %v1013_v24 = vmul.f32 1.442695, %v1012_v23  ;;  %v5073_v23 = vld [vmem:[%s7322_s7 + $0x48] sm:$0xff] }
 0x4ff   : > { %6178 = vpow2.f32 %v1013_v24 }
 0x509   : > { %v6179_v25 = vpop.eup %6178 }
 0x50a   : > { %v1015_v26 = vsel %vm1008_vm3, %v6179_v25, 0.0 }
 0x50b   : > { %1016 = vadd.xlane.f32.xlu0 %v1015_v26  ;;  %v5080_v26 = vld [vmem:[%s7323_s8 + $0x58] sm:$0xff] }
 0x598   : > { %v1017_v27 = vpop.xlane.xlu0 %1016 }
 0x599   : > { %6180 = vrcp.f32 %v1017_v27 }
 0x5a3   : > { %v6181_v30 = vpop.eup %6180 }
 0x5a4   : > { %v1019_v32 = vmul.f32 %v6181_v30, %v6179_v25  ;;  %v5079_v25 = vld [vmem:[%s7323_s8 + $0x50] sm:$0xff]  ;;  %v5075_v30 = vld [vmem:[%s7322_s7 + $0x58] sm:$0xff] }
 0x5a5   : > { %v5978_v27 = vpack.c.bf16 %v5080_v26, %v5079_v25  ;;  %v5104_v25 = vld [vmem:[%s7324_s9 + $0x70] sm:$0xff] }
 0x5a6   : > { %5501 = vmatmul.mubr.msk.f32.vlgmr.msra.gmra.mrb[6].mxu0 %vm1008_vm3, %v1019_v32 }
 0x5a7   : > { %5946 = vmatpush3.bf16.msra.mxu0 %v5945_v31  ;;  %5511 = vmatprep.mubr.msk.f32.mxu0 %vm6290_vm0, %v6291_v10  ;;  %v5972_v31 = vpack.c.bf16 %v5075_v30, %v5074_v29 }
 0x5a8   : > { %5947 = vmatprep.subr.bf16.mxu0 %v6289_v6 }
 0x5ab   : > { %5949 = vmatpush3.bf16.msra.mxu0 %v5948_v35 }
 0x5ac   : > { %5956 = vmatprep.subr.bf16.mxu0 %v6289_v6 }
 0x5ae   : > { %5512 = vmatmul.mubr.msk.f32.vlgmr.msra.gmra.mrb[8].mxu0 %vm597_vm1, %v6510_v61 }
 0x5af   : > { %5958 = vmatpush3.bf16.msra.mxu0 %v5957_v38  ;;  %5533 = vmatprep.mubr.msk.f32.mxu0 %vm6290_vm0, %v6291_v10  ;;  %v5082_v38 = vld [vmem:[%s7324_s9 + $0x40] sm:$0xff] }
 0x5b0   : > { %5959 = vmatprep.subr.bf16.mxu0 %v6289_v6 }
 0x5b3   : > { %5961 = vmatpush3.bf16.msra.mxu0 %v5960_v41 }
 0x5b4   : > { %5962 = vmatprep.subr.bf16.mxu0 %v6289_v6 }
 0x5b6   : > { %5534 = vmatmul.mubr.msk.f32.vlgmr.msra.gmra.mrb[10].mxu0 %vm597_vm1, %v6510_v61 }
 0x5b7   : > { %5550 = vmatprep.mubr.msk.f32.mxu0 %vm6290_vm0, %v6291_v10  ;;  %5964 = vmatpush3.bf16.msra.mxu0 %v5963_v59 }
 0x5b8   : > { %5968 = vmatprep.subr.bf16.mxu0 %v6289_v6 }
 0x679   : > { %v1089_v42 = vpop.f32.mrb[6].mxu0 }
 0x67a   : > { %v5502_v43 = vpop.f32.mrb[7].mxu0 }
 0x681   : > { %v1166_v44 = vpop.f32.mrb[8].mxu0 }
 0x682   : > { %v5513_v45 = vpop.f32.mrb[9].mxu0  ;;  %5539 = vmatmul.mubr.msk.f32.vlgmr.msra.gmra.mrb[6].mxu1 %vm931_vm2, %v1166_v44  ;;  %v5084_v44 = vld [vmem:[%s7324_s9 + $0x50] sm:$0xff] }
 0x683   : > { %5543 = vmatprep.mubr.msk.f32.mxu1 %vm6290_vm0, %v6291_v10  ;;  %v5085_v45 = vld [vmem:[%s7324_s9 + $0x58] sm:$0xff] }
 0x689   : > { %v1316_v46 = vpop.f32.mrb[10].mxu0 }
 0x68a   : > { %v5535_v47 = vpop.f32.mrb[11].mxu0  ;;  %5542 = vmatpush3.msra.mxu1 %v1316_v46  ;;  %v5984_v46 = vpack.c.bf16 %v5085_v45, %v5084_v44 }
 0x68b   : > { %5965 = vmatprep.subr.bf16.mxu1 %v6289_v6  ;;  %v5092_v47 = vld [vmem:[%s7322_s7 + $0x60] sm:$0xff] }
 0x755   : > { %v1392_v48 = vpop.f32.mrb[6].mxu1 }
 0x756   : > { %v1393_v49 = vadd.f32 %v1392_v48, %v6562_v17  ;;  %v5540_v50 = vpop.f32.mrb[7].mxu1  ;;  %v5093_v48 = vld [vmem:[%s7322_s7 + $0x68] sm:$0xff] }
 0x757   : > { %v5094_v50 = vld [vmem:[%s7322_s7 + $0x70] sm:$0xff] }
 0x758   : > { %v1396_v51 = vsel %vm1008_vm3, %v1393_v49, -inf }
 0x759   : > { %1397 = vmax.xlane.f32.xlu1 %v1396_v51  ;;  %v5095_v51 = vld [vmem:[%s7322_s7 + $0x78] sm:$0xff] }
 0x7e6   : > { %v1398_v52 = vpop.xlane.xlu1 %1397 }
 0x7e7   : > { %v1399_v53 = vsub.f32 %v1393_v49, %v1398_v52  ;;  %v5987_v49 = vpack.c.bf16 %v5093_v48, %v5092_v47  ;;  %v5990_v52 = vpack.c.bf16 %v5095_v51, %v5094_v50  ;;  %v5091_v47 = vld [vmem:[%s7325_s10 + $0x28] sm:$0xff] }
 0x7e9   : > { %v1400_v54 = vmul.f32 1.442695, %v1399_v53 }
 0x7eb   : > { %6182 = vpow2.f32 %v1400_v54 }
 0x7f5   : > { %v6183_v55 = vpop.eup %6182 }
 0x7f6   : > { %v1402_v56 = vsel %vm1008_vm3, %v6183_v55, 0.0 }
 0x7f7   : > { %1403 = vadd.xlane.f32.xlu1 %v1402_v56 }
 0x884   : > { %v1404_v60 = vpop.xlane.xlu1 %1403 }
 0x885   : > { %6184 = vrcp.f32 %v1404_v60 }
 0x88f   : > { %v6185_v0 = vpop.eup %6184 }
 0x890   : > { %v1406_v2 = vmul.f32 %v6185_v0, %v6183_v55 }
 0x892   : > { %5544 = vmatmul.mubr.msk.f32.vlgmr.msra.gmra.mrb[8].mxu1 %vm1008_vm3, %v1406_v2 }
 0x893   : > { %5967 = vmatpush3.bf16.msra.mxu1 %v5966_v1  ;;  %5557 = vmatprep.mubr.msk.f32.mxu1 %vm6290_vm0, %v6291_v10 }
 0x894   : > { %5974 = vmatprep.subr.bf16.mxu1 %v6289_v6 }
 0x896   : > { %5558 = vmatmul.mubr.msk.f32.vlgmr.msra.gmra.mrb[10].mxu1 %vm931_vm2, %v1089_v42  ;;  %v5981_v42 = vpack.c.bf16 %v5083_v39, %v5082_v38 }
 0x897   : > { %5579 = vmatprep.mubr.msk.f32.mxu1 %vm6290_vm0, %v6291_v10  ;;  %5976 = vmatpush3.bf16.msra.mxu1 %v5975_v22 }
 0x898   : > { %5977 = vmatprep.subr.bf16.mxu1 %v6289_v6 }
 0x89b   : > { %5979 = vmatpush3.bf16.msra.mxu1 %v5978_v27  ;;  %v5105_v27 = vld [vmem:[%s7324_s9 + $0x78] sm:$0xff] }
 0x89c   : > { %5593 = vmatprep.subr.mxu1 %v6291_v10  ;;  %v6002_v29 = vpack.c.bf16 %v5105_v27, %v5104_v25  ;;  %v5115_v25 = vld [vmem:[%s7329_s14 + $0x3] ss:$0 sm:$0xff] }
 0x89e   : > { %5580 = vmatmul.mubr.msk.f32.vlgmr.msra.gmra.mrb[12].mxu1 %vm597_vm1, %v6665_v28 }
 0x89f   : > { %5595 = vmatprep.mubr.msk.f32.mxu1 %vm6290_vm0, %v6291_v10 }
 0x965   : > { %v1476_v3 = vpop.f32.mrb[8].mxu1 }
 0x966   : > { %v5545_v4 = vpop.f32.mrb[9].mxu1  ;;  %5551 = vmatmul.mubr.msk.f32.vlgmr.msra.gmra.mrb[12].mxu0 %vm931_vm2, %v1476_v3 }
 0x967   : > { %5568 = vmatprep.mubr.msk.f32.mxu0 %vm6290_vm0, %v6291_v10 }
 0x969   : > { %v1625_v5 = vpop.f32.mrb[10].mxu1 }
 0x96a   : > { %v5559_v7 = vpop.f32.mrb[11].mxu1 }
 0x971   : > { %v1807_v53 = vpop.f32.mrb[12].mxu1 }
 0x972   : > { %v5581_v54 = vpop.f32.mrb[13].mxu1  ;;  %5594 = vmatpush3.xpose.msk.msra.mxu1 %vm931_vm2, %v1807_v53 }
 0x973   : > { %5598 = vmatprep.subr.mxu1 %v6291_v10 }
 0xa39   : > { %v1552_v8 = vpop.f32.mrb[12].mxu0 }
 0xa3a   : > { %v1626_v9 = vadd.f32 %v1625_v5, %v1552_v8  ;;  %v5552_v11 = vpop.f32.mrb[13].mxu0 }
 0xa3b   : > { %v5097_v11 = vld [vmem:[%s7323_s8 + $0x60] sm:$0xff] }
 0xa3c   : > { %v1629_v12 = vadd.f32 %v1626_v9, %v6510_v61  ;;  %v5072_v61 = vld [vmem:[%s7322_s7 + $0x40] sm:$0xff] }
 0xa3d   : > { %v5969_v24 = vpack.c.bf16 %v5073_v23, %v5072_v61  ;;  %v5102_v23 = vld [vmem:[%s7324_s9 + $0x60] sm:$0xff] }
 0xa3e   : > { %v1630_v13 = vsel %vm597_vm1, %v1629_v12, 0.0 }
 0xa3f   : > { %1631 = vadd.xlane.f32.xlu1 %v1630_v13  ;;  %5970 = vmatpush3.bf16.msra.mxu0 %v5969_v24  ;;  %v5103_v24 = vld [vmem:[%s7324_s9 + $0x68] sm:$0xff] }
 0xa40   : > { %5971 = vmatprep.subr.bf16.mxu0 %v6289_v6  ;;  %v5999_v26 = vpack.c.bf16 %v5103_v24, %v5102_v23  ;;  %v5114_v23 = vld [vmem:[%s7329_s14 + $0x2] ss:$0 sm:$0xff] }
 0xa43   : > { %5973 = vmatpush3.bf16.msra.mxu0 %v5972_v31 }
 0xa44   : > { %5980 = vmatprep.subr.bf16.mxu0 %v6289_v6 }
 0xacc   : > { %v1632_v14 = vpop.xlane.xlu1 %1631 }
 0xacd   : > { %v1633_v15 = vmul.f32 0.03125, %v1632_v14 }
 0xacf   : > { %v1634_v16 = vsub.f32 %v1629_v12, %v1633_v15  ;;  %v5098_v12 = vld [vmem:[%s7323_s8 + $0x68] sm:$0xff] }
 0xad0   : > { %v5993_v14 = vpack.c.bf16 %v5098_v12, %v5097_v11  ;;  %v2613_v11 = vld [vmem:[%s7327_s12 + $0x8] sm:$0xff]  ;;  %v2614_v12 = vld [vmem:[%s7327_s12 + $0x10] sm:$0xff] }
 0xad1   : > { %v1635_v18 = vmul.f32 %v1634_v16, %v1634_v16 }
 0xad3   : > { %v1636_v19 = vsel %vm597_vm1, %v1635_v18, 0.0  ;;  %v5100_v18 = vld [vmem:[%s7323_s8 + $0x78] sm:$0xff] }
 0xad4   : > { %1637 = vadd.xlane.f32.xlu1 %v1636_v19 }
 0xb61   : > { %v1638_v32 = vpop.xlane.xlu1 %1637 }
 0xb62   : > { %v1639_v33 = vmul.f32 0.03125, %v1638_v32 }
 0xb64   : > { %v1640_v34 = vadd.f32 1e-06, %v1639_v33 }
 0xb66   : > { %6186 = vrsqrt.f32 %v1640_v34 }
 0xb70   : > { %v6187_v35 = vpop.eup %6186 }
 0xb71   : > { %v1642_v37 = vmul.f32 %v6187_v35, %v1634_v16  ;;  %v5099_v16 = vld [vmem:[%s7323_s8 + $0x70] sm:$0xff] }
 0xb72   : > { %v5996_v19 = vpack.c.bf16 %v5100_v18, %v5099_v16  ;;  %v2616_v16 = vld [vmem:[%s7327_s12 + $0x20] sm:$0xff]  ;;  %v2617_v18 = vld [vmem:[%s7327_s12 + $0x28] sm:$0xff] }
 0xb73   : > { %v1647_v41 = vmul.f32 %v5070_v36, %v1642_v37 }
 0xb75   : > { %v6692_v43 = vadd.f32 %v5071_v40, %v1647_v41  ;;  %v5110_v41 = vld [vmem:[%s7325_s10 + $0x30] sm:$0xff] }
 0xb77   : > { %5569 = vmatmul.mubr.msk.f32.vlgmr.msra.gmra.mrb[14].mxu0 %vm597_vm1, %v6692_v43 }
 0xb78   : > { %5982 = vmatpush3.bf16.msra.mxu0 %v5981_v42  ;;  %5590 = vmatprep.mubr.msk.f32.mxu0 %vm6290_vm0, %v6291_v10  ;;  %v5111_v42 = vld [vmem:[%s7325_s10 + $0x38] sm:$0xff] }
 0xb79   : > { %5983 = vmatprep.subr.bf16.mxu0 %v6289_v6  ;;  %v6005_v44 = vpack.c.bf16 %v5111_v42, %v5110_v41 }
 0xb7c   : > { %5985 = vmatpush3.bf16.msra.mxu0 %v5984_v46  ;;  %v5090_v46 = vld [vmem:[%s7325_s10 + $0x20] sm:$0xff] }
 0xb7d   : > { %5986 = vmatprep.subr.bf16.mxu0 %v6289_v6 }
 0xb7f   : > { %5591 = vmatmul.mubr.msk.f32.vlgmr.msra.gmra.mrb[16].mxu0 %vm597_vm1, %v6665_v28 }
 0xb80   : > { %5988 = vmatpush3.bf16.msra.mxu0 %v5987_v49  ;;  %5611 = vmatprep.mubr.msk.f32.mxu0 %vm6290_vm0, %v6291_v10  ;;  %v6008_v49 = vpack.c.bf16 %v5091_v47, %v5090_v46 }
 0xb81   : > { %5989 = vmatprep.subr.bf16.mxu0 %v6289_v6 }
 0xb84   : > { %5991 = vmatpush3.bf16.msra.mxu0 %v5990_v52 }
 0xb85   : > { %5998 = vmatprep.subr.bf16.mxu0 %v6289_v6 }
 0xb87   : > { %5612 = vmatmul.mubr.msk.f32.vlgmr.msra.gmra.mrb[18].mxu0 %vm597_vm1, %v6692_v43 }
 0xb88   : > { %5633 = vmatprep.mubr.msk.f32.mxu0 %vm6290_vm0, %v6291_v10  ;;  %6000 = vmatpush3.bf16.msra.mxu0 %v5999_v26 }
 0xb89   : > { %6001 = vmatprep.subr.bf16.mxu0 %v6289_v6 }
 0xb8c   : > { %6003 = vmatpush3.bf16.msra.mxu0 %v6002_v29  ;;  %v2618_v29 = vld [vmem:[%s7327_s12 + $0x30] sm:$0xff] }
 0xb8d   : > { %6004 = vmatprep.subr.bf16.mxu0 %v6289_v6 }
 0xb8f   : > { %5634 = vmatmul.mubr.msk.f32.vlgmr.msra.gmra.mrb[20].mxu0 %vm597_vm1, %v6665_v28 }
 0xb90   : > { %5650 = vmatprep.mubr.msk.f32.mxu0 %vm6290_vm0, %v6291_v10  ;;  %6006 = vmatpush3.bf16.msra.mxu0 %v6005_v44 }
 0xb91   : > { %6010 = vmatprep.subr.bf16.mxu0 %v6289_v6 }
 0xc4a   : > { %v1729_v55 = vpop.f32.mrb[14].mxu0 }
 0xc4b   : > { %v5570_v56 = vpop.f32.mrb[15].mxu0  ;;  %5596 = vmatmul.mubr.msk.f32.vlgmr.msra.gmra.mrb[14].mxu1 %vm931_vm2, %v1729_v55 }
 0xc4c   : > { %5600 = vmatprep.mubr.msk.f32.mxu1 %vm6290_vm0, %v6291_v10 }
 0xc52   : > { %v1882_v57 = vpop.f32.mrb[16].mxu0 }
 0xc53   : > { %v5592_v58 = vpop.f32.mrb[17].mxu0  ;;  %5599 = vmatpush3.msra.mxu1 %v1882_v57 }
 0xc54   : > { %5992 = vmatprep.subr.bf16.mxu1 %v6289_v6 }
 0xc5a   : > { %v2120_v59 = vpop.f32.mrb[18].mxu0 }
 0xc5b   : > { %v5613_v60 = vpop.f32.mrb[19].mxu0 }
 0xc62   : > { %v2270_v39 = vpop.f32.mrb[20].mxu0 }
 0xc63   : > { %v5635_v40 = vpop.f32.mrb[21].mxu0 }
 0xd1e   : > { %v1958_v63 = vpop.f32.mrb[14].mxu1 }
 0xd1f   : > { %v1959_v0 = vadd.f32 %v6738_v62, %v1958_v63  ;;  %v5597_v1 = vpop.f32.mrb[15].mxu1 }
 0xd21   : > { %v1962_v2 = vsel %vm1008_vm3, %v1959_v0, -inf }
 0xd22   : > { %1963 = vmax.xlane.f32.xlu1 %v1962_v2 }
 0xdaf   : > { %v1964_v3 = vpop.xlane.xlu1 %1963 }
 0xdb0   : > { %v1965_v4 = vsub.f32 %v1959_v0, %v1964_v3  ;;  %v2607_v3 = vld [vmem:[%s7326_s11] sm:$0xff] }
 0xdb2   : > { %v1966_v5 = vmul.f32 1.442695, %v1965_v4  ;;  %v2608_v4 = vld [vmem:[%s7326_s11 + $0x8] sm:$0xff] }
 0xdb4   : > { %6188 = vpow2.f32 %v1966_v5  ;;  %v6011_v5 = vpack.c.bf16 %v2608_v4, %v2607_v3  ;;  %v5120_v3 = vld [vmem:[%s7329_s14 + $0x4] ss:$0 sm:$0xff] }
 0xdbe   : > { %v6189_v7 = vpop.eup %6188 }
 0xdbf   : > { %v1968_v8 = vsel %vm1008_vm3, %v6189_v7, 0.0 }
 0xdc0   : > { %1969 = vadd.xlane.f32.xlu1 %v1968_v8 }
 0xe4d   : > { %v1970_v9 = vpop.xlane.xlu1 %1969 }
 0xe4e   : > { %6190 = vrcp.f32 %v1970_v9  ;;  %v2612_v9 = vld [vmem:[%s7327_s12] sm:$0xff] }
 0xe58   : > { %v6191_v13 = vpop.eup %6190 }
 0xe59   : > { %v1972_v15 = vmul.f32 %v6191_v13, %v6189_v7  ;;  %v2610_v7 = vld [vmem:[%s7326_s11 + $0x18] sm:$0xff]  ;;  %v6017_v13 = vpack.c.bf16 %v2613_v11, %v2612_v9 }
 0xe5b   : > { %5601 = vmatmul.mubr.msk.f32.vlgmr.msra.gmra.mrb[16].mxu1 %vm1008_vm3, %v1972_v15 }
 0xe5c   : > { %5994 = vmatpush3.bf16.msra.mxu1 %v5993_v14  ;;  %5622 = vmatprep.mubr.msk.f32.mxu1 %vm6290_vm0, %v6291_v10  ;;  %v2615_v14 = vld [vmem:[%s7327_s12 + $0x18] sm:$0xff] }
 0xe5d   : > { %5995 = vmatprep.subr.bf16.mxu1 %v6289_v6  ;;  %v6020_v15 = vpack.c.bf16 %v2615_v14, %v2614_v12  ;;  %v5131_v12 = vld [vmem:[%s7323_s8 + $0x90] sm:$0xff] }
 0xe60   : > { %5997 = vmatpush3.bf16.msra.mxu1 %v5996_v19  ;;  %v6023_v19 = vpack.c.bf16 %v2617_v18, %v2616_v16 }
 0xe61   : > { %5636 = vmatprep.subr.mxu1 %v6291_v10 }
 0xe63   : > { %5623 = vmatmul.mubr.msk.f32.vlgmr.msra.gmra.mrb[18].mxu1 %vm597_vm1, %v6665_v28 }
 0xe64   : > { %5638 = vmatprep.mubr.msk.f32.mxu1 %vm6290_vm0, %v6291_v10 }
 0xf2e   : > { %v2042_v20 = vpop.f32.mrb[16].mxu1 }
 0xf2f   : > { %v5602_v21 = vpop.f32.mrb[17].mxu1 }
 0xf36   : > { %v2195_v22 = vpop.f32.mrb[18].mxu1 }
 0xf37   : > { %v5624_v61 = vpop.f32.mrb[19].mxu1  ;;  %5637 = vmatpush3.xpose.msk.msra.mxu1 %vm931_vm2, %v2195_v22 }
 0xf38   : > { %5641 = vmatprep.subr.mxu1 %v6291_v10 }
 0xf3a   : > { %5639 = vmatmul.mubr.msk.f32.vlgmr.msra.gmra.mrb[20].mxu1 %vm931_vm2, %v2120_v59 }
 0xf3b   : > { %5643 = vmatprep.mubr.msk.f32.mxu1 %vm6290_vm0, %v6291_v10  ;;  %5642 = vmatpush3.msra.mxu1 %v2270_v39 }
 0xf3c   : > { %6007 = vmatprep.subr.bf16.mxu1 %v6289_v6 }
0x100d   : > { %v2346_v30 = vpop.f32.mrb[20].mxu1 }
0x100e   : > { %v2347_v31 = vadd.f32 %v6738_v62, %v2346_v30  ;;  %v5640_v32 = vpop.f32.mrb[21].mxu1  ;;  %v2619_v30 = vld [vmem:[%s7327_s12 + $0x38] sm:$0xff] }
0x100f   : > { %v5116_v32 = vld [vmem:[%s7328_s13] ss:$0 sm:$0xff] }
0x1010   : > { %v2350_v33 = vsel %vm1008_vm3, %v2347_v31, -inf }
0x1011   : > { %2351 = vmax.xlane.f32.xlu1 %v2350_v33 }
0x109e   : > { %v2352_v34 = vpop.xlane.xlu1 %2351 }
0x109f   : > { %v2353_v35 = vsub.f32 %v2347_v31, %v2352_v34  ;;  %v6026_v31 = vpack.c.bf16 %v2619_v30, %v2618_v29  ;;  %v5155_v29 = vld [vmem:[%s7324_s9 + $0xa8] sm:$0xff] }
0x10a1   : > { %v2354_v36 = vmul.f32 1.442695, %v2353_v35 }
0x10a3   : > { %6192 = vpow2.f32 %v2354_v36 }
0x10ad   : > { %v6193_v37 = vpop.eup %6192 }
0x10ae   : > { %v2356_v38 = vsel %vm1008_vm3, %v6193_v37, 0.0 }
0x10af   : > { %2357 = vadd.xlane.f32.xlu1 %v2356_v38 }
0x113c   : > { %v2358_v45 = vpop.xlane.xlu1 %2357 }
0x113d   : > { %6194 = vrcp.f32 %v2358_v45 }
0x1147   : > { %v6195_v48 = vpop.eup %6194 }
0x1148   : > { %v2360_v50 = vmul.f32 %v6195_v48, %v6193_v37  ;;  %v5118_v37 = vld [vmem:[%s7329_s14 + $0x6] ss:$0 sm:$0xff] }
0x114a   : > { %5644 = vmatmul.mubr.msk.f32.vlgmr.msra.gmra.mrb[22].mxu1 %vm1008_vm3, %v2360_v50  ;;  %v5125_v50 = vld [vmem:[%s7322_s7 + $0x88] sm:$0xff] }
0x114b   : > { %6009 = vmatpush3.bf16.msra.mxu1 %v6008_v49  ;;  %5657 = vmatprep.mubr.msk.f32.mxu1 %vm6290_vm0, %v6291_v10  ;;  %v5124_v49 = vld [vmem:[%s7322_s7 + $0x80] sm:$0xff] }
0x114c   : > { %6016 = vmatprep.subr.bf16.mxu1 %v6289_v6 }
0x114e   : > { %5658 = vmatmul.mubr.msk.f32.vlgmr.msra.gmra.mrb[24].mxu1 %vm931_vm2, %v2042_v20 }
0x114f   : > { %5687 = vmatprep.mubr.msk.f32.mxu1 %vm6290_vm0, %v6291_v10  ;;  %6018 = vmatpush3.bf16.msra.mxu1 %v6017_v13  ;;  %v5132_v13 = vld [vmem:[%s7323_s8 + $0x98] sm:$0xff] }
0x1150   : > { %6019 = vmatprep.subr.bf16.mxu1 %v6289_v6  ;;  %v6038_v14 = vpack.c.bf16 %v5132_v13, %v5131_v12  ;;  %v5142_v13 = vld [vmem:[%s7325_s10 + $0x40] sm:$0xff] }
0x1153   : > { %6021 = vmatpush3.bf16.msra.mxu1 %v6020_v15 }
0x1154   : > { %6022 = vmatprep.subr.bf16.mxu1 %v6289_v6 }
0x1157   : > { %6024 = vmatpush3.bf16.msra.mxu1 %v6023_v19 }
0x1158   : > { %6025 = vmatprep.subr.bf16.mxu1 %v6289_v6 }
0x115b   : > { %6027 = vmatpush3.bf16.msra.mxu1 %v6026_v31  ;;  %v5156_v31 = vld [vmem:[%s7324_s9 + $0xb0] sm:$0xff] }
0x115c   : > { %6040 = vmatprep.subr.bf16.mxu1 %v6289_v6 }
0x121d   : > { %v2430_v51 = vpop.f32.mrb[22].mxu1 }
0x121e   : > { %v5645_v52 = vpop.f32.mrb[23].mxu1  ;;  %5651 = vmatmul.mubr.msk.f32.vlgmr.msra.gmra.mrb[22].mxu0 %vm931_vm2, %v2430_v51  ;;  %v6029_v51 = vpack.c.bf16 %v5125_v50, %v5124_v49  ;;  %v5149_v49 = vld [vmem:[%s7323_s8 + $0xa0] sm:$0xff]  ;;  %v5150_v50 = vld [vmem:[%s7323_s8 + $0xa8] sm:$0xff] }
0x121f   : > { %5668 = vmatprep.mubr.msk.f32.mxu0 %vm6290_vm0, %v6291_v10  ;;  %6012 = vmatpush3.bf16.msra.mxu0 %v6011_v5  ;;  %v5134_v52 = vld [vmem:[%s7324_s9 + $0x80] sm:$0xff] }
0x1220   : > { %6013 = vmatprep.subr.bf16.mxu0 %v6289_v6  ;;  %v5129_v5 = vld [vmem:[%s7323_s8 + $0x80] sm:$0xff] }
0x1221   : > { %v2579_v53 = vpop.f32.mrb[24].mxu1 }
0x1222   : > { %v5659_v54 = vpop.f32.mrb[25].mxu1 }
0x12f1   : > { %v2506_v55 = vpop.f32.mrb[22].mxu0 }
0x12f2   : > { %v2580_v56 = vadd.f32 %v2579_v53, %v2506_v55  ;;  %v5652_v57 = vpop.f32.mrb[23].mxu0  ;;  %v5135_v53 = vld [vmem:[%s7324_s9 + $0x88] sm:$0xff]  ;;  %v5126_v55 = vld [vmem:[%s7322_s7 + $0x90] sm:$0xff] }
0x12f3   : > { %v6041_v54 = vpack.c.bf16 %v5135_v53, %v5134_v52  ;;  %v6053_v52 = vpack.c.bf16 %v5150_v50, %v5149_v49  ;;  %v5166_v49 = vld [vmem:[%s7329_s14 + $0x8] ss:$0 sm:$0xff] }
0x12f4   : > { %v2583_v58 = vadd.f32 %v2580_v56, %v6692_v43  ;;  %v2609_v43 = vld [vmem:[%s7326_s11 + $0x10] sm:$0xff]  ;;  %v5127_v56 = vld [vmem:[%s7322_s7 + $0x98] sm:$0xff] }
0x12f5   : > { %v6014_v8 = vpack.c.bf16 %v2610_v7, %v2609_v43  ;;  %v6032_v57 = vpack.c.bf16 %v5127_v56, %v5126_v55  ;;  %v5130_v43 = vld [vmem:[%s7323_s8 + $0x88] sm:$0xff]  ;;  %v5121_v7 = vld [vmem:[%s7329_s14 + $0x5] ss:$0 sm:$0xff]  ;;  %v5152_v55 = vld [vmem:[%s7323_s8 + $0xb8] sm:$0xff] }
0x12f6   : > { %v2584_v59 = vsel %vm597_vm1, %v2583_v58, 0.0  ;;  %v6035_v9 = vpack.c.bf16 %v5130_v43, %v5129_v5 }
0x12f7   : > { %2585 = vadd.xlane.f32.xlu0 %v2584_v59  ;;  %6015 = vmatpush3.bf16.msra.mxu0 %v6014_v8  ;;  %v5137_v59 = vld [vmem:[%s7324_s9 + $0x98] sm:$0xff] }
0x12f8   : > { %6028 = vmatprep.subr.bf16.mxu0 %v6289_v6 }
0x1384   : > { %v2586_v60 = vpop.xlane.xlu0 %2585 }
0x1385   : > { %v2587_v63 = vmul.f32 0.03125, %v2586_v60 }
0x1387   : > { %v2588_v0 = vsub.f32 %v2583_v58, %v2587_v63  ;;  %v5136_v58 = vld [vmem:[%s7324_s9 + $0x90] sm:$0xff] }
0x1388   : > { %v6044_v60 = vpack.c.bf16 %v5137_v59, %v5136_v58 }
0x1389   : > { %v2589_v1 = vmul.f32 %v2588_v0, %v2588_v0 }
0x138b   : > { %v2590_v2 = vsel %vm597_vm1, %v2589_v1, 0.0 }
0x138c   : > { %2591 = vadd.xlane.f32.xlu1 %v2590_v2 }
0x1419   : > { %v2592_v20 = vpop.xlane.xlu1 %2591 }
0x141a   : > { %v2593_v21 = vmul.f32 0.03125, %v2592_v20  ;;  %v5144_v20 = vld [vmem:[%s7322_s7 + $0xa0] sm:$0xff] }
0x141c   : > { %v2594_v22 = vadd.f32 1e-06, %v2593_v21  ;;  %v5145_v21 = vld [vmem:[%s7322_s7 + $0xa8] sm:$0xff] }
0x141e   : > { %6196 = vrsqrt.f32 %v2594_v22 }
0x1428   : > { %v6197_v61 = vpop.eup %6196 }
0x1429   : > { %v2596_v24 = vmul.f32 %v6197_v61, %v2588_v0 }
0x142b   : > { %v2601_v26 = vmul.f32 %v5114_v23, %v2596_v24  ;;  %v6047_v23 = vpack.c.bf16 %v5145_v21, %v5144_v20  ;;  %v5146_v24 = vld [vmem:[%s7322_s7 + $0xb0] sm:$0xff] }
0x142d   : > { %v2606_v27 = vadd.f32 %v5115_v25, %v2601_v26  ;;  %v5147_v25 = vld [vmem:[%s7322_s7 + $0xb8] sm:$0xff] }
0x142e   : > { %v6050_v26 = vpack.c.bf16 %v5147_v25, %v5146_v24 }
0x142f   : > { %5669 = vmatmul.mubr.msk.f32.vlgmr.msra.gmra.mrb[24].mxu0 %vm597_vm1, %v2606_v27 }
0x1430   : > { %5698 = vmatprep.mubr.msk.f32.mxu0 %vm6290_vm0, %v6291_v10  ;;  %6030 = vmatpush3.bf16.msra.mxu0 %v6029_v51 }
0x1431   : > { %6031 = vmatprep.subr.bf16.mxu0 %v6289_v6 }
0x1434   : > { %6033 = vmatpush3.bf16.msra.mxu0 %v6032_v57 }
0x1435   : > { %6034 = vmatprep.subr.bf16.mxu0 %v6289_v6 }
0x1502   : > { %v2698_v33 = vpop.f32.mrb[24].mxu0 }
0x1503   : > { %v2699_v34 = vadd.f32 %v5116_v32, %v2698_v33  ;;  %v5670_v35 = vpop.f32.mrb[25].mxu0  ;;  %v5157_v32 = vld [vmem:[%s7324_s9 + $0xb8] sm:$0xff] }
0x1504   : > { %v6062_v33 = vpack.c.bf16 %v5157_v32, %v5156_v31 }
0x1505   : > { %v2702_v36 = vmax.f32 %v2699_v34, 0.0 }
0x1507   : > { %5688 = vmatmul.mubr.msk.f32.vlgmr.msra.gmra.mrb[26].mxu1 %vm2707_vm4, %v2702_v36 }
0x1508   : > { %5720 = vmatprep.mubr.msk.f32.mxu1 %vm6290_vm0, %v6291_v10  ;;  %6042 = vmatpush3.bf16.msra.mxu1 %v6041_v54  ;;  %v5151_v54 = vld [vmem:[%s7323_s8 + $0xb0] sm:$0xff] }
0x1509   : > { %6043 = vmatprep.subr.bf16.mxu1 %v6289_v6  ;;  %v6056_v56 = vpack.c.bf16 %v5152_v55, %v5151_v54 }
0x150c   : > { %6045 = vmatpush3.bf16.msra.mxu1 %v6044_v60 }
0x150d   : > { %5728 = vmatprep.subr.mxu1 %v6291_v10 }
0x15da   : > { %v2777_v38 = vpop.f32.mrb[26].mxu1 }
0x15db   : > { %v2778_v39 = vadd.f32 %v5118_v37, %v2777_v38  ;;  %v5689_v40 = vpop.f32.mrb[27].mxu1 }
0x15dd   : > { %v2781_v41 = vadd.f32 %v2778_v39, %v2606_v27  ;;  %v5154_v27 = vld [vmem:[%s7324_s9 + $0xa0] sm:$0xff] }
0x15de   : > { %v6059_v30 = vpack.c.bf16 %v5155_v29, %v5154_v27 }
0x15df   : > { %v2782_v42 = vsel %vm597_vm1, %v2781_v41, 0.0 }
0x15e0   : > { %2783 = vadd.xlane.f32.xlu0 %v2782_v42 }
0x166d   : > { %v2784_v44 = vpop.xlane.xlu0 %2783 }
0x166e   : > { %v2785_v45 = vmul.f32 0.03125, %v2784_v44 }
0x1670   : > { %v2786_v46 = vsub.f32 %v2781_v41, %v2785_v45 }
0x1672   : > { %v2787_v47 = vmul.f32 %v2786_v46, %v2786_v46 }
0x1674   : > { %v2788_v48 = vsel %vm597_vm1, %v2787_v47, 0.0 }
0x1675   : > { %2789 = vadd.xlane.f32.xlu1 %v2788_v48 }
0x1702   : > { %v2790_v63 = vpop.xlane.xlu1 %2789 }
0x1703   : > { %v2791_v0 = vmul.f32 0.03125, %v2790_v63 }
0x1705   : > { %v2792_v1 = vadd.f32 1e-06, %v2791_v0 }
0x1707   : > { %6198 = vrsqrt.f32 %v2792_v1 }
0x1711   : > { %v6199_v2 = vpop.eup %6198 }
0x1712   : > { %v2794_v4 = vmul.f32 %v6199_v2, %v2786_v46 }
0x1714   : > { %v2799_v8 = vmul.f32 %v5120_v3, %v2794_v4 }
0x1716   : > { %v6919_v11 = vadd.f32 %v5121_v7, %v2799_v8  ;;  %v5162_v8 = vld [vmem:[%s7325_s10 + $0x50] sm:$0xff] }
0x1718   : > { %5699 = vmatmul.mubr.msk.f32.vlgmr.msra.gmra.mrb[26].mxu0 %vm597_vm1, %v6919_v11  ;;  %5721 = vmatmul.mubr.msk.f32.vlgmr.msra.gmra.mrb[28].mxu1 %vm597_vm1, %v6919_v11 }
0x1719   : > { %6036 = vmatpush3.bf16.msra.mxu0 %v6035_v9  ;;  %5709 = vmatprep.mubr.msk.f32.mxu0 %vm6290_vm0, %v6291_v10 }
0x171a   : > { %6037 = vmatprep.subr.bf16.mxu0 %v6289_v6  ;;  %5730 = vmatprep.mubr.msk.f32.mxu1 %vm6290_vm0, %v6291_v10 }
0x171d   : > { %6039 = vmatpush3.bf16.msra.mxu0 %v6038_v14  ;;  %v5143_v14 = vld [vmem:[%s7325_s10 + $0x48] sm:$0xff] }
0x171e   : > { %5723 = vmatprep.subr.mxu0 %v6291_v10 }
0x1720   : > { %5710 = vmatmul.mubr.msk.f32.vlgmr.msra.gmra.mrb[28].mxu0 %vm597_vm1, %v6919_v11 }
0x1721   : > { %5725 = vmatprep.mubr.msk.f32.mxu0 %vm6290_vm0, %v6291_v10 }
0x17eb   : > { %v2882_v15 = vpop.f32.mrb[26].mxu0  ;;  %v3032_v16 = vpop.f32.mrb[28].mxu1 }
0x17ec   : > { %v5700_v18 = vpop.f32.mrb[27].mxu0  ;;  %v5722_v19 = vpop.f32.mrb[29].mxu1  ;;  %5729 = vmatpush3.msra.mxu1 %v3032_v16  ;;  %v6068_v16 = vpack.c.bf16 %v5143_v14, %v5142_v13 }
0x17ed   : > { %6052 = vmatprep.subr.bf16.mxu1 %v6289_v6 }
0x17f3   : > { %v2957_v22 = vpop.f32.mrb[28].mxu0 }
0x17f4   : > { %v5711_v61 = vpop.f32.mrb[29].mxu0  ;;  %5724 = vmatpush3.xpose.msk.msra.mxu0 %vm931_vm2, %v2957_v22 }
0x17f5   : > { %6046 = vmatprep.subr.bf16.mxu0 %v6289_v6 }
0x17f7   : > { %5726 = vmatmul.mubr.msk.f32.vlgmr.msra.gmra.mrb[30].mxu0 %vm931_vm2, %v2882_v15 }
0x17f8   : > { %6048 = vmatpush3.bf16.msra.mxu0 %v6047_v23  ;;  %5741 = vmatprep.mubr.msk.f32.mxu0 %vm6290_vm0, %v6291_v10 }
0x17f9   : > { %6049 = vmatprep.subr.bf16.mxu0 %v6289_v6 }
0x17fc   : > { %6051 = vmatpush3.bf16.msra.mxu0 %v6050_v26 }
0x17fd   : > { %6058 = vmatprep.subr.bf16.mxu0 %v6289_v6 }
0x17ff   : > { %5742 = vmatmul.mubr.msk.f32.vlgmr.msra.gmra.mrb[32].mxu0 %vm597_vm1, %v6919_v11 }
0x1800   : > { %6060 = vmatpush3.bf16.msra.mxu0 %v6059_v30  ;;  %5763 = vmatprep.mubr.msk.f32.mxu0 %vm6290_vm0, %v6291_v10 }
0x1801   : > { %6061 = vmatprep.subr.bf16.mxu0 %v6289_v6 }
0x1804   : > { %6063 = vmatpush3.bf16.msra.mxu0 %v6062_v33  ;;  %v5175_v33 = vld [vmem:[%s7323_s8 + $0xc0] sm:$0xff] }
0x1805   : > { %6064 = vmatprep.subr.bf16.mxu0 %v6289_v6 }
0x1807   : > { %5764 = vmatmul.mubr.msk.f32.vlgmr.msra.gmra.mrb[34].mxu0 %vm597_vm1, %v6919_v11 }
0x1808   : > { %5780 = vmatprep.mubr.msk.f32.mxu0 %vm6290_vm0, %v6291_v10 }
0x18ca   : > { %v3108_v34 = vpop.f32.mrb[30].mxu0 }
0x18cb   : > { %v3109_v35 = vadd.f32 %v3108_v34, %v6562_v17  ;;  %v5727_v36 = vpop.f32.mrb[31].mxu0  ;;  %v5176_v34 = vld [vmem:[%s7323_s8 + $0xc8] sm:$0xff] }
0x18cc   : > { %v5171_v36 = vld [vmem:[%s7322_s7 + $0xc8] sm:$0xff] }
0x18cd   : > { %v3112_v37 = vsel %vm1008_vm3, %v3109_v35, -inf }
0x18ce   : > { %3113 = vmax.xlane.f32.xlu0 %v3112_v37 }
0x18d2   : > { %v3270_v38 = vpop.f32.mrb[32].mxu0 }
0x18d3   : > { %v5743_v39 = vpop.f32.mrb[33].mxu0 }
0x18d4   : > { %v5178_v39 = vld [vmem:[%s7323_s8 + $0xd8] sm:$0xff] }
0x18da   : > { %v3420_v40 = vpop.f32.mrb[34].mxu0 }
0x18db   : > { %v5765_v41 = vpop.f32.mrb[35].mxu0 }
0x18dc   : > { %v5172_v41 = vld [vmem:[%s7322_s7 + $0xd0] sm:$0xff] }
0x195b   : > { %v3114_v42 = vpop.xlane.xlu0 %3113 }
0x195c   : > { %v3115_v44 = vsub.f32 %v3109_v35, %v3114_v42  ;;  %v6077_v35 = vpack.c.bf16 %v5176_v34, %v5175_v33  ;;  %v5173_v42 = vld [vmem:[%s7322_s7 + $0xd8] sm:$0xff] }
0x195e   : > { %v3116_v45 = vmul.f32 1.442695, %v3115_v44  ;;  %v6074_v44 = vpack.c.bf16 %v5173_v42, %v5172_v41 }
0x1960   : > { %6200 = vpow2.f32 %v3116_v45 }
0x196a   : > { %v6201_v46 = vpop.eup %6200 }
0x196b   : > { %v3118_v47 = vsel %vm1008_vm3, %v6201_v46, 0.0 }
0x196c   : > { %3119 = vadd.xlane.f32.xlu1 %v3118_v47 }
0x19f9   : > { %v3120_v48 = vpop.xlane.xlu1 %3119 }
0x19fa   : > { %6202 = vrcp.f32 %v3120_v48 }
0x1a04   : > { %v6203_v51 = vpop.eup %6202 }
0x1a05   : > { %v3122_v53 = vmul.f32 %v6203_v51, %v6201_v46  ;;  %v5180_v51 = vld [vmem:[%s7324_s9 + $0xc0] sm:$0xff] }
0x1a07   : > { %5731 = vmatmul.mubr.msk.f32.vlgmr.msra.gmra.mrb[30].mxu1 %vm1008_vm3, %v3122_v53  ;;  %v5167_v53 = vld [vmem:[%s7329_s14 + $0x9] ss:$0 sm:$0xff] }
0x1a08   : > { %6054 = vmatpush3.bf16.msra.mxu1 %v6053_v52  ;;  %5752 = vmatprep.mubr.msk.f32.mxu1 %vm6290_vm0, %v6291_v10  ;;  %v5181_v52 = vld [vmem:[%s7324_s9 + $0xc8] sm:$0xff] }
0x1a09   : > { %6055 = vmatprep.subr.bf16.mxu1 %v6289_v6  ;;  %v6083_v55 = vpack.c.bf16 %v5181_v52, %v5180_v51 }
0x1a0c   : > { %6057 = vmatpush3.bf16.msra.mxu1 %v6056_v56 }
0x1a0d   : > { %5766 = vmatprep.subr.mxu1 %v6291_v10 }
0x1a0f   : > { %5753 = vmatmul.mubr.msk.f32.vlgmr.msra.gmra.mrb[32].mxu1 %vm597_vm1, %v6919_v11 }
0x1a10   : > { %5768 = vmatprep.mubr.msk.f32.mxu1 %vm6290_vm0, %v6291_v10 }
0x1ada   : > { %v3192_v57 = vpop.f32.mrb[30].mxu1 }
0x1adb   : > { %v5732_v58 = vpop.f32.mrb[31].mxu1 }
0x1adc   : > { %v5183_v58 = vld [vmem:[%s7324_s9 + $0xd8] sm:$0xff] }
0x1ae2   : > { %v3345_v59 = vpop.f32.mrb[32].mxu1 }
0x1ae3   : > { %v5754_v60 = vpop.f32.mrb[33].mxu1  ;;  %5767 = vmatpush3.xpose.msk.msra.mxu1 %vm931_vm2, %v3345_v59 }
0x1ae4   : > { %5771 = vmatprep.subr.mxu1 %v6291_v10  ;;  %v5190_v60 = vld [vmem:[%s7322_s7 + $0xe0] sm:$0xff] }
0x1ae6   : > { %5769 = vmatmul.mubr.msk.f32.vlgmr.msra.gmra.mrb[34].mxu1 %vm931_vm2, %v3270_v38  ;;  %v5177_v38 = vld [vmem:[%s7323_s8 + $0xd0] sm:$0xff] }
0x1ae7   : > { %5772 = vmatpush3.msra.mxu1 %v3420_v40  ;;  %5773 = vmatprep.mubr.msk.f32.mxu1 %vm6290_vm0, %v6291_v10  ;;  %v6080_v40 = vpack.c.bf16 %v5178_v39, %v5177_v38  ;;  %v5203_v38 = vld [vmem:[%s7324_s9 + $0xf8] sm:$0xff] }
0x1ae8   : > { %6067 = vmatprep.subr.bf16.mxu1 %v6289_v6 }
0x1bb9   : > { %v3496_v63 = vpop.f32.mrb[34].mxu1 }
0x1bba   : > { %v3497_v0 = vadd.f32 %v3496_v63, %v6562_v17  ;;  %v5770_v1 = vpop.f32.mrb[35].mxu1  ;;  %v5163_v17 = vld [vmem:[%s7325_s10 + $0x58] sm:$0xff]  ;;  %v5191_v63 = vld [vmem:[%s7322_s7 + $0xe8] sm:$0xff] }
0x1bbb   : > { %v6065_v9 = vpack.c.bf16 %v5163_v17, %v5162_v8  ;;  %v5192_v1 = vld [vmem:[%s7322_s7 + $0xf0] sm:$0xff] }
0x1bbc   : > { %v3500_v2 = vsel %vm1008_vm3, %v3497_v0, -inf }
0x1bbd   : > { %3501 = vmax.xlane.f32.xlu0 %v3500_v2  ;;  %6066 = vmatpush3.bf16.msra.mxu0 %v6065_v9  ;;  %v5193_v2 = vld [vmem:[%s7322_s7 + $0xf8] sm:$0xff] }
0x1bbe   : > { %6070 = vmatprep.subr.bf16.mxu0 %v6289_v6 }
0x1c4a   : > { %v3502_v3 = vpop.xlane.xlu0 %3501 }
0x1c4b   : > { %v3503_v4 = vsub.f32 %v3497_v0, %v3502_v3  ;;  %v6089_v0 = vpack.c.bf16 %v5191_v63, %v5190_v60  ;;  %v6092_v3 = vpack.c.bf16 %v5193_v2, %v5192_v1 }
0x1c4d   : > { %v3504_v5 = vmul.f32 1.442695, %v3503_v4 }
0x1c4f   : > { %6204 = vpow2.f32 %v3504_v5 }
0x1c59   : > { %v6205_v43 = vpop.eup %6204 }
0x1c5a   : > { %v3506_v7 = vsel %vm1008_vm3, %v6205_v43, 0.0 }
0x1c5b   : > { %3507 = vadd.xlane.f32.xlu1 %v3506_v7 }
0x1ce8   : > { %v3508_v12 = vpop.xlane.xlu1 %3507 }
0x1ce9   : > { %6206 = vrcp.f32 %v3508_v12 }
0x1cf3   : > { %v6207_v15 = vpop.eup %6206 }
0x1cf4   : > { %v3510_v18 = vmul.f32 %v6207_v15, %v6205_v43 }
0x1cf6   : > { %5774 = vmatmul.mubr.msk.f32.vlgmr.msra.gmra.mrb[36].mxu1 %vm1008_vm3, %v3510_v18 }
0x1cf7   : > { %6069 = vmatpush3.bf16.msra.mxu1 %v6068_v16  ;;  %5787 = vmatprep.mubr.msk.f32.mxu1 %vm6290_vm0, %v6291_v10 }
0x1cf8   : > { %6076 = vmatprep.subr.bf16.mxu1 %v6289_v6 }
0x1cfa   : > { %5788 = vmatmul.mubr.msk.f32.vlgmr.msra.gmra.mrb[38].mxu1 %vm931_vm2, %v3192_v57  ;;  %v5182_v57 = vld [vmem:[%s7324_s9 + $0xd0] sm:$0xff] }
0x1cfb   : > { %5809 = vmatprep.mubr.msk.f32.mxu1 %vm6290_vm0, %v6291_v10  ;;  %6078 = vmatpush3.bf16.msra.mxu1 %v6077_v35  ;;  %v6086_v59 = vpack.c.bf16 %v5183_v58, %v5182_v57  ;;  %v5188_v57 = vld [vmem:[%s7325_s10 + $0x60] sm:$0xff]  ;;  %v5189_v58 = vld [vmem:[%s7325_s10 + $0x68] sm:$0xff] }
0x1cfc   : > { %6079 = vmatprep.subr.bf16.mxu1 %v6289_v6  ;;  %v6110_v60 = vpack.c.bf16 %v5189_v58, %v5188_v57 }
0x1cff   : > { %6081 = vmatpush3.bf16.msra.mxu1 %v6080_v40  ;;  %v6222_v40 = vld [vmem:[%s6655_s3] sm:$0xff]  ;;  %s4910_s3 = scalar_lea.sflag [#allocation3], %s533_s30 }
0x1d00   : > { %5823 = vmatprep.subr.mxu1 %v6291_v10 }
0x1d02   : > { %5810 = vmatmul.mubr.msk.f32.vlgmr.msra.gmra.mrb[40].mxu1 %vm597_vm1, %v6665_v28 }
0x1d03   : > { %5825 = vmatprep.mubr.msk.f32.mxu1 %vm6290_vm0, %v6291_v10 }
0x1dc9   : > { %v3580_v19 = vpop.f32.mrb[36].mxu1 }
0x1dca   : > { %v5775_v20 = vpop.f32.mrb[37].mxu1  ;;  %5781 = vmatmul.mubr.msk.f32.vlgmr.msra.gmra.mrb[36].mxu0 %vm931_vm2, %v3580_v19 }
0x1dcb   : > { %5798 = vmatprep.mubr.msk.f32.mxu0 %vm6290_vm0, %v6291_v10 }
0x1dcd   : > { %v3729_v21 = vpop.f32.mrb[38].mxu1 }
0x1dce   : > { %v5789_v22 = vpop.f32.mrb[39].mxu1 }
0x1dd5   : > { %v3908_v4 = vpop.f32.mrb[40].mxu1 }
0x1dd6   : > { %v5811_v5 = vpop.f32.mrb[41].mxu1  ;;  %5824 = vmatpush3.xpose.msk.msra.mxu1 %vm931_vm2, %v3908_v4 }
0x1dd7   : > { %5828 = vmatprep.subr.mxu1 %v6291_v10 }
0x1e9d   : > { %v3656_v61 = vpop.f32.mrb[36].mxu0 }
0x1e9e   : > { %v3730_v23 = vadd.f32 %v3729_v21, %v3656_v61  ;;  %v5782_v24 = vpop.f32.mrb[37].mxu0 }
0x1e9f   : > { %v5196_v24 = vld [vmem:[%s7323_s8 + $0xe8] sm:$0xff] }
0x1ea0   : > { %v3733_v25 = vadd.f32 %v3730_v23, %v6919_v11  ;;  %v5170_v11 = vld [vmem:[%s7322_s7 + $0xc0] sm:$0xff] }
0x1ea1   : > { %v6071_v37 = vpack.c.bf16 %v5171_v36, %v5170_v11  ;;  %v5195_v23 = vld [vmem:[%s7323_s8 + $0xe0] sm:$0xff]  ;;  %v5201_v11 = vld [vmem:[%s7324_s9 + $0xe8] sm:$0xff]  ;;  %v5202_v36 = vld [vmem:[%s7324_s9 + $0xf0] sm:$0xff] }
0x1ea2   : > { %v3734_v26 = vsel %vm597_vm1, %v3733_v25, 0.0  ;;  %v6104_v39 = vpack.c.bf16 %v5203_v38, %v5202_v36  ;;  %v5226_v36 = vld [vmem:[%s7327_s12 + $0x78] sm:$0xff]  ;;  %v5230_v38 = vld [vmem:[%s7328_s13 + $0x1] ss:$0 sm:$0xff] }
0x1ea3   : > { %3735 = vadd.xlane.f32.xlu0 %v3734_v26  ;;  %6072 = vmatpush3.bf16.msra.mxu0 %v6071_v37  ;;  %v6095_v26 = vpack.c.bf16 %v5196_v24, %v5195_v23  ;;  %v5222_v23 = vld [vmem:[%s7327_s12 + $0x58] sm:$0xff] }
0x1ea4   : > { %6073 = vmatprep.subr.bf16.mxu0 %v6289_v6 }
0x1ea7   : > { %6075 = vmatpush3.bf16.msra.mxu0 %v6074_v44 }
0x1ea8   : > { %6082 = vmatprep.subr.bf16.mxu0 %v6289_v6 }
0x1f30   : > { %v3736_v27 = vpop.xlane.xlu0 %3735 }
0x1f31   : > { %v3737_v29 = vmul.f32 0.03125, %v3736_v27 }
0x1f33   : > { %v3738_v30 = vsub.f32 %v3733_v25, %v3737_v29  ;;  %v5197_v29 = vld [vmem:[%s7323_s8 + $0xf0] sm:$0xff] }
0x1f35   : > { %v3739_v31 = vmul.f32 %v3738_v30, %v3738_v30 }
0x1f37   : > { %v3740_v32 = vsel %vm597_vm1, %v3739_v31, 0.0 }
0x1f38   : > { %3741 = vadd.xlane.f32.xlu1 %v3740_v32 }
0x1fc5   : > { %v3742_v45 = vpop.xlane.xlu1 %3741 }
0x1fc6   : > { %v3743_v46 = vmul.f32 0.03125, %v3742_v45 }
0x1fc8   : > { %v3744_v47 = vadd.f32 1e-06, %v3743_v46 }
0x1fca   : > { %6208 = vrsqrt.f32 %v3744_v47 }
0x1fd4   : > { %v6209_v48 = vpop.eup %6208 }
0x1fd5   : > { %v3746_v50 = vmul.f32 %v6209_v48, %v3738_v30  ;;  %v5198_v30 = vld [vmem:[%s7323_s8 + $0xf8] sm:$0xff] }
0x1fd6   : > { %v6098_v31 = vpack.c.bf16 %v5198_v30, %v5197_v29 }
0x1fd7   : > { %v3751_v54 = vmul.f32 %v5166_v49, %v3746_v50 }
0x1fd9   : > { %v7086_v56 = vadd.f32 %v5167_v53, %v3751_v54  ;;  %v5209_v53 = vld [vmem:[%s7325_s10 + $0x78] sm:$0xff] }
0x1fdb   : > { %5799 = vmatmul.mubr.msk.f32.vlgmr.msra.gmra.mrb[38].mxu0 %vm597_vm1, %v7086_v56 }
0x1fdc   : > { %6084 = vmatpush3.bf16.msra.mxu0 %v6083_v55  ;;  %5820 = vmatprep.mubr.msk.f32.mxu0 %vm6290_vm0, %v6291_v10 }
0x1fdd   : > { %6085 = vmatprep.subr.bf16.mxu0 %v6289_v6 }
0x1fe0   : > { %6087 = vmatpush3.bf16.msra.mxu0 %v6086_v59 }
0x1fe1   : > { %6088 = vmatprep.subr.bf16.mxu0 %v6289_v6 }
0x1fe3   : > { %5821 = vmatmul.mubr.msk.f32.vlgmr.msra.gmra.mrb[40].mxu0 %vm597_vm1, %v6665_v28 }
0x1fe4   : > { %6090 = vmatpush3.bf16.msra.mxu0 %v6089_v0  ;;  %5841 = vmatprep.mubr.msk.f32.mxu0 %vm6290_vm0, %v6291_v10 }
0x1fe5   : > { %6091 = vmatprep.subr.bf16.mxu0 %v6289_v6 }
0x1fe8   : > { %6093 = vmatpush3.bf16.msra.mxu0 %v6092_v3 }
0x1fe9   : > { %6100 = vmatprep.subr.bf16.mxu0 %v6289_v6 }
0x1feb   : > { %5842 = vmatmul.mubr.msk.f32.vlgmr.msra.gmra.mrb[42].mxu0 %vm597_vm1, %v7086_v56 }
0x1fec   : > { %5863 = vmatprep.mubr.msk.f32.mxu0 %vm6290_vm0, %v6291_v10 }
0x20ae   : > { %v3833_v43 = vpop.f32.mrb[38].mxu0 }
0x20af   : > { %v5800_v7 = vpop.f32.mrb[39].mxu0  ;;  %5826 = vmatmul.mubr.msk.f32.vlgmr.msra.gmra.mrb[42].mxu1 %vm931_vm2, %v3833_v43 }
0x20b0   : > { %5830 = vmatprep.mubr.msk.f32.mxu1 %vm6290_vm0, %v6291_v10 }
0x20b6   : > { %v3983_v8 = vpop.f32.mrb[40].mxu0 }
0x20b7   : > { %v5822_v17 = vpop.f32.mrb[41].mxu0  ;;  %5829 = vmatpush3.msra.mxu1 %v3983_v8 }
0x20b8   : > { %6094 = vmatprep.subr.bf16.mxu1 %v6289_v6 }
0x20be   : > { %v4221_v9 = vpop.f32.mrb[42].mxu0 }
0x20bf   : > { %v5843_v12 = vpop.f32.mrb[43].mxu0 }
0x2182   : > { %v4059_v13 = vpop.f32.mrb[42].mxu1 }
0x2183   : > { %v4060_v14 = vadd.f32 %v6738_v62, %v4059_v13  ;;  %v5827_v15 = vpop.f32.mrb[43].mxu1 }
0x2184   : > { %v5215_v15 = vld [vmem:[%s7326_s11 + $0x28] sm:$0xff] }
0x2185   : > { %v4063_v16 = vsel %vm1008_vm3, %v4060_v14, -inf }
0x2186   : > { %4064 = vmax.xlane.f32.xlu0 %v4063_v16 }
0x2213   : > { %v4065_v18 = vpop.xlane.xlu0 %4064 }
0x2214   : > { %v4066_v19 = vsub.f32 %v4060_v14, %v4065_v18  ;;  %v5217_v18 = vld [vmem:[%s7326_s11 + $0x38] sm:$0xff] }
0x2216   : > { %v4067_v20 = vmul.f32 1.442695, %v4066_v19 }
0x2218   : > { %6210 = vpow2.f32 %v4067_v20  ;;  %v5219_v20 = vld [vmem:[%s7327_s12 + $0x40] sm:$0xff] }
0x2222   : > { %v6211_v21 = vpop.eup %6210 }
0x2223   : > { %v4069_v22 = vsel %vm1008_vm3, %v6211_v21, 0.0 }
0x2224   : > { %4070 = vadd.xlane.f32.xlu1 %v4069_v22  ;;  %v5221_v22 = vld [vmem:[%s7327_s12 + $0x50] sm:$0xff] }
0x2225   : > { %v6122_v24 = vpack.c.bf16 %v5222_v23, %v5221_v22 }
0x22b1   : > { %v4071_v61 = vpop.xlane.xlu1 %4070 }
0x22b2   : > { %6212 = vrcp.f32 %v4071_v61 }
0x22bc   : > { %v6213_v25 = vpop.eup %6212 }
0x22bd   : > { %v4073_v27 = vmul.f32 %v6213_v25, %v6211_v21  ;;  %v5220_v21 = vld [vmem:[%s7327_s12 + $0x48] sm:$0xff]  ;;  %v5223_v25 = vld [vmem:[%s7327_s12 + $0x60] sm:$0xff] }
0x22be   : > { %v6119_v61 = vpack.c.bf16 %v5220_v21, %v5219_v20 }
0x22bf   : > { %5831 = vmatmul.mubr.msk.f32.vlgmr.msra.gmra.mrb[44].mxu1 %vm1008_vm3, %v4073_v27 }
0x22c0   : > { %6096 = vmatpush3.bf16.msra.mxu1 %v6095_v26  ;;  %5852 = vmatprep.mubr.msk.f32.mxu1 %vm6290_vm0, %v6291_v10  ;;  %v5224_v26 = vld [vmem:[%s7327_s12 + $0x68] sm:$0xff] }
0x22c1   : > { %6097 = vmatprep.subr.bf16.mxu1 %v6289_v6  ;;  %v6125_v27 = vpack.c.bf16 %v5224_v26, %v5223_v25 }
0x22c4   : > { %6099 = vmatpush3.bf16.msra.mxu1 %v6098_v31 }
0x22c5   : > { %5866 = vmatprep.subr.mxu1 %v6291_v10 }
0x22c7   : > { %5853 = vmatmul.mubr.msk.f32.vlgmr.msra.gmra.mrb[46].mxu1 %vm597_vm1, %v6665_v28  ;;  %v5200_v28 = vld [vmem:[%s7324_s9 + $0xe0] sm:$0xff] }
0x22c8   : > { %5868 = vmatprep.mubr.msk.f32.mxu1 %vm6290_vm0, %v6291_v10  ;;  %v6101_v37 = vpack.c.bf16 %v5201_v11, %v5200_v28 }
0x22ca   : > { %6102 = vmatpush3.bf16.msra.mxu0 %v6101_v37 }
0x22cb   : > { %6103 = vmatprep.subr.bf16.mxu0 %v6289_v6 }
0x22ce   : > { %6105 = vmatpush3.bf16.msra.mxu0 %v6104_v39 }
0x22cf   : > { %6106 = vmatprep.subr.bf16.mxu0 %v6289_v6 }
0x22d1   : > { %5864 = vmatmul.mubr.msk.f32.vlgmr.msra.gmra.mrb[44].mxu0 %vm597_vm1, %v6222_v40 }
0x22d2   : > { %5880 = vmatprep.mubr.msk.f32.mxu0 %vm6290_vm0, %v6291_v10 }
0x2392   : > { %v4143_v32 = vpop.f32.mrb[44].mxu1 }
0x2393   : > { %v5832_v33 = vpop.f32.mrb[45].mxu1 }
0x2394   : > { %v5212_v33 = vld [vmem:[%s7329_s14 + $0xa] ss:$0 sm:$0xff] }
0x239a   : > { %v4296_v34 = vpop.f32.mrb[46].mxu1 }
0x239b   : > { %v5854_v35 = vpop.f32.mrb[47].mxu1  ;;  %5867 = vmatpush3.xpose.msk.msra.mxu1 %vm931_vm2, %v4296_v34 }
0x239c   : > { %5871 = vmatprep.subr.mxu1 %v6291_v10  ;;  %v5213_v35 = vld [vmem:[%s7329_s14 + $0xb] ss:$0 sm:$0xff] }
0x239e   : > { %5869 = vmatmul.mubr.msk.f32.vlgmr.msra.gmra.mrb[48].mxu1 %vm931_vm2, %v4221_v9 }
0x239f   : > { %5873 = vmatprep.mubr.msk.f32.mxu1 %vm6290_vm0, %v6291_v10 }
0x23a4   : > { %v4371_v51 = vpop.f32.mrb[44].mxu0 }
0x23a5   : > { %v5865_v52 = vpop.f32.mrb[45].mxu0  ;;  %5872 = vmatpush3.msra.mxu1 %v4371_v51 }
0x23a6   : > { %6109 = vmatprep.subr.bf16.mxu1 %v6289_v6 }
0x2471   : > { %v4447_v41 = vpop.f32.mrb[48].mxu1 }
0x2472   : > { %v4448_v42 = vadd.f32 %v6738_v62, %v4447_v41  ;;  %v5870_v44 = vpop.f32.mrb[49].mxu1  ;;  %v5208_v62 = vld [vmem:[%s7325_s10 + $0x70] sm:$0xff] }
0x2473   : > { %v6107_v54 = vpack.c.bf16 %v5209_v53, %v5208_v62  ;;  %v5232_v44 = vld [vmem:[%s7329_s14 + $0xe] ss:$0 sm:$0xff] }
0x2474   : > { %v4451_v45 = vsel %vm1008_vm3, %v4448_v42, -inf }
0x2475   : > { %4452 = vmax.xlane.f32.xlu0 %v4451_v45  ;;  %6108 = vmatpush3.bf16.msra.mxu0 %v6107_v54 }
0x2476   : > { %6112 = vmatprep.subr.bf16.mxu0 %v6289_v6 }
0x2502   : > { %v4453_v46 = vpop.xlane.xlu0 %4452 }
0x2503   : > { %v4454_v47 = vsub.f32 %v4448_v42, %v4453_v46 }
0x2505   : > { %v4455_v48 = vmul.f32 1.442695, %v4454_v47 }
0x2507   : > { %6214 = vpow2.f32 %v4455_v48 }
0x2511   : > { %v6215_v49 = vpop.eup %6214 }
0x2512   : > { %v4457_v50 = vsel %vm1008_vm3, %v6215_v49, 0.0 }
0x2513   : > { %4458 = vadd.xlane.f32.xlu1 %v4457_v50 }
0x25a0   : > { %v4459_v55 = vpop.xlane.xlu1 %4458 }
0x25a1   : > { %6216 = vrcp.f32 %v4459_v55 }
0x25ab   : > { %v6217_v59 = vpop.eup %6216 }
0x25ac   : > { %v4461_v63 = vmul.f32 %v6217_v59, %v6215_v49  ;;  %v5234_v59 = vld [vmem:[%s7329_s14 + $0xc] ss:$0 sm:$0xff] }
0x25ae   : > { %5874 = vmatmul.mubr.msk.f32.vlgmr.msra.gmra.mrb[50].mxu1 %vm1008_vm3, %v4461_v63  ;;  %v5235_v63 = vld [vmem:[%s7329_s14 + $0xd] ss:$0 sm:$0xff] }
0x25af   : > { %6111 = vmatpush3.bf16.msra.mxu1 %v6110_v60  ;;  %5887 = vmatprep.mubr.msk.f32.mxu1 %vm6290_vm0, %v6291_v10 }
0x25b0   : > { %6118 = vmatprep.subr.bf16.mxu1 %v6289_v6 }
0x25b2   : > { %5888 = vmatmul.mubr.msk.f32.vlgmr.msra.gmra.mrb[52].mxu1 %vm931_vm2, %v4143_v32 }
0x25b3   : > { %5917 = vmatprep.mubr.msk.f32.mxu1 %vm6290_vm0, %v6291_v10  ;;  %6120 = vmatpush3.bf16.msra.mxu1 %v6119_v61 }
0x25b4   : > { %6121 = vmatprep.subr.bf16.mxu1 %v6289_v6 }
0x25b7   : > { %6123 = vmatpush3.bf16.msra.mxu1 %v6122_v24 }
0x25b8   : > { %6124 = vmatprep.subr.bf16.mxu1 %v6289_v6 }
0x25bb   : > { %6126 = vmatpush3.bf16.msra.mxu1 %v6125_v27 }
0x25bc   : > { %6127 = vmatprep.subr.bf16.mxu1 %v6289_v6 }
0x2681   : > { %v4531_v0 = vpop.f32.mrb[50].mxu1 }
0x2682   : > { %v5875_v1 = vpop.f32.mrb[51].mxu1  ;;  %5881 = vmatmul.mubr.msk.f32.vlgmr.msra.gmra.mrb[46].mxu0 %vm931_vm2, %v4531_v0 }
0x2683   : > { %5898 = vmatprep.mubr.msk.f32.mxu0 %vm6290_vm0, %v6291_v10  ;;  %v5214_v10 = vld [vmem:[%s7326_s11 + $0x20] sm:$0xff] }
0x2684   : > { %v6113_v16 = vpack.c.bf16 %v5215_v15, %v5214_v10 }
0x2685   : > { %v4680_v2 = vpop.f32.mrb[52].mxu1 }
0x2686   : > { %v5889_v3 = vpop.f32.mrb[53].mxu1  ;;  %6114 = vmatpush3.bf16.msra.mxu0 %v6113_v16 }
0x2687   : > { %6115 = vmatprep.subr.bf16.mxu0 %v6289_v6  ;;  %v5225_v6 = vld [vmem:[%s7327_s12 + $0x70] sm:$0xff] }
0x2688   : > { %v6128_v37 = vpack.c.bf16 %v5226_v36, %v5225_v6 }
0x268a   : > { %6129 = vmatpush3.bf16.msra.mxu1 %v6128_v37 }
0x2755   : > { %v4607_v4 = vpop.f32.mrb[46].mxu0 }
0x2756   : > { %v4681_v5 = vadd.f32 %v4680_v2, %v4607_v4  ;;  %v5882_v43 = vpop.f32.mrb[47].mxu0 }
0x2758   : > { %v4684_v7 = vadd.f32 %v4681_v5, %v7086_v56  ;;  %v5216_v56 = vld [vmem:[%s7326_s11 + $0x30] sm:$0xff] }
0x2759   : > { %v6116_v19 = vpack.c.bf16 %v5217_v18, %v5216_v56 }
0x275a   : > { %v4685_v8 = vsel %vm597_vm1, %v4684_v7, 0.0 }
0x275b   : > { %4686 = vadd.xlane.f32.xlu0 %v4685_v8  ;;  %6117 = vmatpush3.bf16.msra.mxu0 %v6116_v19 }
0x27e8   : > { %v4687_v17 = vpop.xlane.xlu0 %4686 }
0x27e9   : > { %v4688_v9 = vmul.f32 0.03125, %v4687_v17 }
0x27eb   : > { %v4689_v12 = vsub.f32 %v4684_v7, %v4688_v9 }
0x27ed   : > { %v4690_v13 = vmul.f32 %v4689_v12, %v4689_v12 }
0x27ef   : > { %v4691_v14 = vsel %vm597_vm1, %v4690_v13, 0.0 }
0x27f0   : > { %4692 = vadd.xlane.f32.xlu1 %v4691_v14 }
0x287d   : > { %v4693_v29 = vpop.xlane.xlu1 %4692 }
0x287e   : > { %v4694_v30 = vmul.f32 0.03125, %v4693_v29 }
0x2880   : > { %v4695_v31 = vadd.f32 1e-06, %v4694_v30 }
0x2882   : > { %6218 = vrsqrt.f32 %v4695_v31 }
0x288c   : > { %v6219_v32 = vpop.eup %6218 }
0x288d   : > { %v4697_v34 = vmul.f32 %v6219_v32, %v4689_v12 }
0x288f   : > { %v4702_v28 = vmul.f32 %v5212_v33, %v4697_v34 }
0x2891   : > { %v4707_v11 = vadd.f32 %v5213_v35, %v4702_v28 }
0x2893   : > { %5899 = vmatmul.mubr.msk.f32.vlgmr.msra.gmra.mrb[48].mxu0 %vm597_vm1, %v4707_v11 }
0x2966   : > { %v4802_v39 = vpop.f32.mrb[48].mxu0 }
0x2967   : > { %v4803_v40 = vadd.f32 %v5230_v38, %v4802_v39  ;;  %v5900_v41 = vpop.f32.mrb[49].mxu0 }
0x2969   : > { %v4806_v42 = vmax.f32 %v4803_v40, 0.0 }
0x296b   : > { %5918 = vmatmul.mubr.msk.f32.vlgmr.msra.gmra.mrb[54].mxu1 %vm2707_vm4, %v4806_v42 }
0x2a3e   : > { %v4880_v45 = vpop.f32.mrb[54].mxu1 }
0x2a3f   : > { %v4881_v46 = vadd.f32 %v5232_v44, %v4880_v45  ;;  %v5919_v47 = vpop.f32.mrb[55].mxu1 }
0x2a41   : > { %v4884_v48 = vadd.f32 %v4881_v46, %v4707_v11 }
0x2a43   : > { %v4885_v49 = vsel %vm597_vm1, %v4884_v48, 0.0 }
0x2a44   : > { %4886 = vadd.xlane.f32.xlu0 %v4885_v49 }
0x2ad1   : > { %v4887_v50 = vpop.xlane.xlu0 %4886 }
0x2ad2   : > { %v4888_v51 = vmul.f32 0.03125, %v4887_v50 }
0x2ad4   : > { %v4889_v52 = vsub.f32 %v4884_v48, %v4888_v51 }
0x2ad6   : > { %v4890_v62 = vmul.f32 %v4889_v52, %v4889_v52 }
0x2ad8   : > { %v4891_v53 = vsel %vm597_vm1, %v4890_v62, 0.0 }
0x2ad9   : > { %4892 = vadd.xlane.f32.xlu1 %v4891_v53 }
0x2b66   : > { %v4893_v54 = vpop.xlane.xlu1 %4892 }
0x2b67   : > { %v4894_v55 = vmul.f32 0.03125, %v4893_v54 }
0x2b69   : > { %v4895_v57 = vadd.f32 1e-06, %v4894_v55 }
0x2b6b   : > { %6220 = vrsqrt.f32 %v4895_v57 }
0x2b75   : > { %v6221_v58 = vpop.eup %6220 }
0x2b76   : > { %v4897_v60 = vmul.f32 %v6221_v58, %v4889_v52 }
0x2b78   : > { %v4902_v0 = vmul.f32 %v5234_v59, %v4897_v60 }
0x2b7a   : > { %v4907_v1 = vadd.f32 %v5235_v63, %v4902_v0 }
0x2b7c   : > { %4908 = vst.msk [vmem:[%s535_s16] sm:$0xff] %vm597_vm1, %v4907_v1 }
0x2b7d   : > { %6236 = shalt.err (!%p6233_p3)
}
0x2b7e   : > { %s6237_s30 = scalar_lea.hbm %s7272_s27, 128  ;;  %s6241_s26 = scalar_lea.hbm %s7330_s15, 256 }
0x2b7f   : > { %p6238_p4 = scmp.ne.s32.totalorder %s7272_s27, %s6237_s30  ;;  %p6242_p9 = scmp.lt.u32.totalorder %s7272_s27, %s7330_s15 }
0x2b80   : > { %p6243_p10 = scmp.lt.u32.totalorder %s6241_s26, %s6237_s30  ;;  %p6245_p12 = scmp.lt.u32.totalorder %s6237_s30, %s7272_s27 }
0x2b81   : > { %p6239_p7 = pnand %p6238_p4, %p6411_p5 }
0x2b82   : > { %p6244_p11 = por %p6243_p10, %p6242_p9 }
0x2b83   : > { %p6240_p8 = pneg %p6239_p7 }
0x2b84   : > { %p6246_p13 = por %p6245_p12, %p6244_p11 }
0x2b86   : > { %p6247_p0 = pnand %p6246_p13, %p6240_p8 }
0x2b88   : > { %6250 = shalt.err (!%p6247_p0)
}
0x2b89   : > { %6130 = dma.vmem_to_hbm [thread:$0]  (%p6411_p5), %s7274_s17, 128, %s7272_s27, %s4910_s3  }
0x2b8a PF: > { %p6136_p1 = scmp.ge.s32.totalorder %s6285_s21, 2  ;;  %s4935_s1 = sand.u32 1, %s6273_s18  }
0x2b8b   : > { %s4936_s25 = scalar_lea.sflag [#allocation3], %s4935_s1 }
0x2b8c   : > { %p6133_p2 = pnand %p6136_p1, %p6415_p6 }
0x2b8e   : > { %6268 = dma.done.wait (!%p6133_p2), %s4936_s25, 128  }
0x2b8f   : > { %6270 = vsyncadd (!%p6133_p2), %s4936_s25, 4294967168  ;;  %s7347_s21 = sld [smem:[#allocation6_spill]]  ;;  %s7348_s22 = sld [smem:[#allocation5_spill]] }
0x2b90   : > { %s7349_s20 = sld [smem:[#allocation7_spill]]  ;;  %s7350_s18 = smov %s6277_s19 }
0x2b95   : > { %p25_p3 = scmp.ge.s32.totalorder %s7347_s21, 4   ;;  %s7351_s19 = smov %s7348_s22 }
0x2b97   :  { %27 = sbr.rel (!%p25_p3) target bundleno = 8 (0x8), region = 159 }
0x2b9e   :  { %4941 = vsyncpa [#allocation3], 1 }
0x2b9f   :  { %4943 = vsyncpa [#allocation3 + $0x1], 1 }

</bundles_post_ra>
